<compile_context>
chip_gen: v7x
topology: tpu7x:2x2x1
jax: 0.10.0
libtpu: 0.0.40
codegen_flags: <defaults>
</compile_context>

<pallas_src>
import jax
import jax.numpy as jnp
import numpy as np
from jax.experimental import pallas as pl
from jax.experimental.pallas import tpu as pltpu


# Fixed row offsets of the "live" data inside the zero-padded VMEM scratch
# buffers.  They must be >= n_res_block - 1 so every block's kernel taps land
# at a non-negative static slice start.
_OFFX = 8   # image offset inside the padded-input scratch (8-aligned store)
_OFFB = 8   # conv-a output offset inside its padded scratch (8-aligned store)
_OFFC = 1   # payload offset inside the 3x3-conv padded scratch


def _weight_offsets(n_blocks, K1, KC):
    """Static row ranges of each block's packed conv matrices inside Wall."""
    offs, r = [], 0
    for i in range(n_blocks):
        k = 2 * (i + 1)
        d = {}
        for name, rows in (("wa", k * K1), ("wb", k * KC), ("wc", 3 * KC),
                           ("wr1", 3 * KC), ("wr2", KC)):
            d[name] = (r, r + rows)
            r += rows
        offs.append(d)
    return offs, r


# ------------------------------ Pallas kernel -------------------------------

def _make_kernel(n_blocks, Ho1, Ho2, w_offs):
    f32 = jnp.float32

    def kernel(x_ref, w_ref, b_ref, out_ref, xpad, pb, pc):
        h_in = x_ref.shape[1]

        # Zero the padding rings once per grid step, place the image at a
        # fixed 8-aligned offset.  The per-block conv padding is folded into
        # the static strided-slice starts below, so nothing is re-zeroed.
        xpad[...] = jnp.zeros_like(xpad)
        pb[...] = jnp.zeros_like(pb)
        pc[...] = jnp.zeros_like(pc)
        xpad[_OFFX:_OFFX + h_in, :] = x_ref[0]

        acc = jnp.zeros((Ho2, out_ref.shape[2]), f32)

        for i in range(n_blocks):              # statically unrolled blocks
            k = 2 * (i + 1)                    # conv kernel size of block i
            offs = w_offs[i]

            def bias(j, _i=i):
                return b_ref[8 * _i + j:8 * _i + j + 1, :]

            def packed_dot(lhs_parts, name, brow, _offs=offs):
                lo, hi = _offs[name]
                lhs = jnp.concatenate(lhs_parts, axis=1)
                return jnp.dot(lhs, w_ref[lo:hi, :],
                               preferred_element_type=f32) + bias(brow)

            # ---- conv-a: k x k, stride 2, pad i, ReLU ----------------------
            ya = jnp.maximum(packed_dot(
                [xpad[pl.ds(dk - i + _OFFX, Ho1, stride=2), :]
                 for dk in range(k)], "wa", 0), 0.0)              # (Ho1, 128)
            pb[_OFFB:_OFFB + Ho1, :] = ya

            # ---- conv-b: k x k, stride 2, pad i, ReLU ----------------------
            yb = jnp.maximum(packed_dot(
                [pb[pl.ds(dk - i + _OFFB, Ho2, stride=2), :]
                 for dk in range(k)], "wb", 1), 0.0)              # (Ho2, 128)

            # ---- conv-c: 3x3, pad 1 (no activation) ------------------------
            pc[_OFFC:_OFFC + Ho2, :] = yb
            h3 = packed_dot([pc[di:di + Ho2, :] for di in range(3)], "wc", 2)

            # ---- ResBlock: ReLU -> 3x3 -> ReLU -> 1x1, +h3; block ReLU -----
            pc[_OFFC:_OFFC + Ho2, :] = jnp.maximum(h3, 0.0)
            t = jnp.maximum(packed_dot([pc[di:di + Ho2, :] for di in range(3)],
                                       "wr1", 3), 0.0)
            lo, hi = offs["wr2"]
            r2 = jnp.dot(t, w_ref[lo:hi, :], preferred_element_type=f32) + bias(4)

            acc = acc + jnp.maximum(r2 + h3, 0.0)

        out_ref[0] = acc                        # single lane-dense store

    return kernel


# --------------------- one-time parameter preparation -----------------------

def prepare_params(params, H):
    """Pack all conv weights into one lane-dense (rows, 128) matmul slab.

    Activations are stored as rows = H, lanes = (w, c); a conv then becomes a
    single dot of the lane-concatenated shifted row-slices against a packed
    (kernel_rows * W*C_in, W_out*C_out) Toeplitz matrix.  Stride-2 in the
    width direction is folded into the Toeplitz columns; stride-2 in the row
    direction is handled by strided row slices in the kernel.  Runs once in
    numpy.  (For v6e/v7x, cast the returned arrays to bf16 to halve DMA and
    use the native MXU rate — validate against the tolerance first.)
    """
    n_blocks = len(params)
    Ho1, Ho2 = H // 2, H // 4

    def expand(w, pad, stride, w_in, w_out):
        w = np.asarray(w, np.float32)
        kh, kw, ci, co = w.shape
        out = np.zeros((kh, w_in * ci, w_out * co), np.float32)
        for dk in range(kh):
            for cw in range(w_in):
                for wo in range(w_out):
                    dj = cw + pad - stride * wo
                    if 0 <= dj < kw:
                        out[dk, cw * ci:(cw + 1) * ci,
                            wo * co:(wo + 1) * co] = w[dk, dj]
        return out.reshape(kh * w_in * ci, w_out * co)

    w_rows, b_rows = [], []
    for i, p in enumerate(params):
        mats = [expand(p["wa"], i, 2, H, Ho1),      # (k*W*Cin, Ho1*C1)
                expand(p["wb"], i, 2, Ho1, Ho2),    # (k*Ho1*C1, Ho2*C)
                expand(p["wc"], 1, 1, Ho2, Ho2),    # (3*Ho2*C,  Ho2*C)
                expand(p["wr1"], 1, 1, Ho2, Ho2),   # (3*Ho2*C,  Ho2*Cr)
                expand(p["wr2"], 0, 1, Ho2, Ho2)]   # (Ho2*Cr,   Ho2*C)
        cols = {m.shape[1] for m in mats}
        assert len(cols) == 1, "all packed weights must share the lane width"
        kc = mats[0].shape[1]
        w_rows.extend(mats)

        biases = np.zeros((8, kc), np.float32)       # 8 rows/block (aligned)
        for j, (b, rep) in enumerate([(p["ba"], Ho1), (p["bb"], Ho2),
                                      (p["bc"], Ho2), (p["br1"], Ho2),
                                      (p["br2"], Ho2)]):
            biases[j] = np.tile(np.asarray(b, np.float32), rep)
        b_rows.append(biases)

    wall = jnp.asarray(np.concatenate(w_rows, axis=0))   # (total_rows, 128)
    ball = jnp.asarray(np.concatenate(b_rows, axis=0))   # (8*n_blocks, 128)
    return wall, ball


# ------------------------------ forward pass --------------------------------

def spec_encoder_forward(x_nchw, wall, ball):
    """Fused Pallas forward.  Input NCHW, output NCHW."""
    N, Cin, H, W = x_nchw.shape
    assert H == W, "square inputs expected"
    Ho1, Ho2 = H // 2, H // 4
    K1 = W * Cin                      # input lanes  = (w, c)
    KC = wall.shape[1]                # lanes of every later activation (128)
    n_blocks = ball.shape[0] // 8
    channel = KC // Ho2
    assert _OFFX >= n_blocks - 1 and _OFFB >= n_blocks - 1

    w_offs, total_rows = _weight_offsets(n_blocks, K1, KC)
    assert total_rows == wall.shape[0]

    # NCHW -> (N, H, W*Cin): rows = H, lanes = (w, c)
    x2d = jnp.transpose(x_nchw, (0, 2, 3, 1)).reshape(N, H, K1)
    x2d = x2d.astype(jnp.float32)

    # scratch row extents: live rows + zero ring big enough for every tap
    xrows = _OFFX + H + 2 * n_blocks
    brows = _OFFB + Ho1 + 2 * n_blocks
    crows = Ho2 + 4

    # advisory cost estimate (MXU flops of all dots + HBM bytes touched)
    d = lambda m, k, n: 2 * m * k * n
    flops = 0
    for i in range(n_blocks):
        k = 2 * (i + 1)
        flops += (d(Ho1, k * K1, KC) + d(Ho2, k * KC, KC)
                  + 2 * d(Ho2, 3 * KC, KC) + d(Ho2, KC, KC))
    cost = pl.CostEstimate(
        flops=int(flops) * N, transcendentals=0,
        bytes_accessed=int((wall.size + ball.size) * 4
                           + x2d.size * 4 + N * Ho2 * KC * 4))

    grid_spec = pltpu.PrefetchScalarGridSpec(
        num_scalar_prefetch=0,
        grid=(N,),                                    # batch only
        in_specs=[
            pl.BlockSpec((1, H, K1), lambda n: (n, 0, 0)),
            # Constant index_map => the packed weight / bias slabs stay
            # VMEM-resident and are fetched from HBM exactly once.
            pl.BlockSpec((total_rows, KC), lambda n: (0, 0)),
            pl.BlockSpec((ball.shape[0], KC), lambda n: (0, 0)),
        ],
        out_specs=pl.BlockSpec((1, Ho2, KC), lambda n: (n, 0, 0)),
        scratch_shapes=[
            pltpu.VMEM((xrows, K1), jnp.float32),     # zero-padded input
            pltpu.VMEM((brows, KC), jnp.float32),     # zero-padded conv-a out
            pltpu.VMEM((crows, KC), jnp.float32),     # zero-padded 3x3 input
        ])

    out = pl.pallas_call(
        _make_kernel(n_blocks, Ho1, Ho2, w_offs),
        out_shape=jax.ShapeDtypeStruct((N, Ho2, KC), jnp.float32),
        grid_spec=grid_spec,
        compiler_params=pltpu.CompilerParams(
            dimension_semantics=("parallel",),        # megacore batch shard
            vmem_limit_bytes=32 * 1024 * 1024),
        cost_estimate=cost,
    )(x2d, wall, ball)

    out = out.reshape(N, Ho2, Ho2, channel)           # (N, H', W', C)
    return jnp.transpose(out, (0, 3, 1, 2))           # -> NCHW


# ------------------------------- parameters ---------------------------------

def init_params(key, channel=32, in_channel=1, n_res_block=4, n_res_channel=32):
    sf = 2

    def conv_init(k, kh, kw, cin, cout):
        k1, k2 = jax.random.split(k)
        scale = 1.0 / np.sqrt(kh * kw * cin)
        w = jax.random.uniform(k1, (kh, kw, cin, cout), jnp.float32, -scale, scale)
        b = jax.random.uniform(k2, (cout,), jnp.float32, -scale, scale)
        return w, b

    params = []
    for i in range(n_res_block):
        ksz = 2 * (i + 1)
        keys = jax.random.split(jax.random.fold_in(key, i), 5)
        wa, ba = conv_init(keys[0], ksz, ksz, in_channel, channel // sf)
        wb, bb = conv_init(keys[1], ksz, ksz, channel // sf, channel)
        wc, bc = conv_init(keys[2], 3, 3, channel, channel)
        wr1, br1 = conv_init(keys[3], 3, 3, channel, n_res_channel)
        wr2, br2 = conv_init(keys[4], 1, 1, n_res_channel, channel)
        params.append(dict(wa=wa, ba=ba, wb=wb, bb=bb, wc=wc, bc=bc,
                           wr1=wr1, br1=br1, wr2=wr2, br2=br2))
    return params


# ----------------------------- pure-JAX reference ---------------------------

def spec_encoder_ref(x_nchw, params):
    def conv(x, w, b, stride, pad):
        y = jax.lax.conv_general_dilated(
            x, w, (stride, stride), [(pad, pad), (pad, pad)],
            dimension_numbers=("NHWC", "HWIO", "NHWC"))
        return y + b

    x = jnp.transpose(x_nchw, (0, 2, 3, 1))
    total = None
    for i, p in enumerate(params):
        h = jax.nn.relu(conv(x, p["wa"], p["ba"], 2, i))
        h = jax.nn.relu(conv(h, p["wb"], p["bb"], 2, i))
        h3 = conv(h, p["wc"], p["bc"], 1, 1)
        t = jax.nn.relu(conv(jax.nn.relu(h3), p["wr1"], p["br1"], 1, 1))
        t = conv(t, p["wr2"], p["br2"], 1, 0)
        o = jax.nn.relu(t + h3)
        total = o if total is None else total + o
    return jnp.transpose(total, (0, 3, 1, 2))


# ---------------------------------- main -------------------------------------

if __name__ == "__main__":
    key = jax.random.PRNGKey(0)
    kx, kp = jax.random.split(key)

    channel, in_channel = 32, 1
    x = jax.random.normal(kx, (2, in_channel, 16, 16), jnp.float32)   # NCHW
    params = init_params(kp, channel=channel, in_channel=in_channel)
    wall, ball = prepare_params(params, H=16)

    fwd = jax.jit(spec_encoder_forward)
    out = jax.block_until_ready(fwd(x, wall, ball))

    ref = spec_encoder_ref(x, params)
    np.testing.assert_allclose(np.asarray(out), np.asarray(ref),
                               rtol=2e-3, atol=2e-3)
    assert out.shape == (2, channel, 4, 4), out.shape
    print("KERNEL_OK")
</pallas_src>

<mosaic_0001>
module attributes {stable_mosaic.version = 11 : i64} {
  func.func @kernel(%arg0: i32, %arg1: memref<1x16x16xf32, #tpu.memory_space<vmem>>, %arg2: memref<6464x128xf32, #tpu.memory_space<vmem>>, %arg3: memref<32x128xf32, #tpu.memory_space<vmem>>, %arg4: memref<1x4x128xf32, #tpu.memory_space<vmem>>, %arg5: memref<32x16xf32, #tpu.memory_space<vmem>>, %arg6: memref<24x128xf32, #tpu.memory_space<vmem>>, %arg7: memref<8x128xf32, #tpu.memory_space<vmem>>) attributes {dimension_semantics = [#tpu.dimension_semantics<parallel>], iteration_bounds = array<i64: 2>, scalar_prefetch = 0 : i64, scratch_operands = 3 : i64, tpu.core_type = #tpu.core_type<tc>, window_params = [{transform_indices = @transform_0, window_bounds = array<i64: 1, 16, 16>}, {pipeline_mode = #tpu.pipeline_mode<synchronous>, transform_indices = @transform_1, window_bounds = array<i64: 6464, 128>}, {pipeline_mode = #tpu.pipeline_mode<synchronous>, transform_indices = @transform_2, window_bounds = array<i64: 32, 128>}, {transform_indices = @transform_3, window_bounds = array<i64: 1, 4, 128>}]} {
    %cst = arith.constant 0.000000e+00 : f32
    %0 = vector.broadcast %cst : f32 to vector<32x16xf32>
    %c0 = arith.constant 0 : index
    %c0_0 = arith.constant 0 : index
    %1 = vector.load %arg5[%c0, %c0_0] : memref<32x16xf32, #tpu.memory_space<vmem>>, vector<32x16xf32>
    tpu.vector_store %arg5[%c0, %c0_0], %0 {strides = array<i32>} : memref<32x16xf32, #tpu.memory_space<vmem>>, vector<32x16xf32>,
    %cst_1 = arith.constant 0.000000e+00 : f32
    %2 = vector.broadcast %cst_1 : f32 to vector<24x128xf32>
    %c0_2 = arith.constant 0 : index
    %c0_3 = arith.constant 0 : index
    %3 = vector.load %arg6[%c0_2, %c0_3] : memref<24x128xf32, #tpu.memory_space<vmem>>, vector<24x128xf32>
    tpu.vector_store %arg6[%c0_2, %c0_3], %2 {strides = array<i32>} : memref<24x128xf32, #tpu.memory_space<vmem>>, vector<24x128xf32>,
    %cst_4 = arith.constant 0.000000e+00 : f32
    %4 = vector.broadcast %cst_4 : f32 to vector<8x128xf32>
    %c0_5 = arith.constant 0 : index
    %c0_6 = arith.constant 0 : index
    %5 = vector.load %arg7[%c0_5, %c0_6] : memref<8x128xf32, #tpu.memory_space<vmem>>, vector<8x128xf32>
    tpu.vector_store %arg7[%c0_5, %c0_6], %4 {strides = array<i32>} : memref<8x128xf32, #tpu.memory_space<vmem>>, vector<8x128xf32>,
    %c0_7 = arith.constant 0 : index
    %c0_8 = arith.constant 0 : index
    %c0_9 = arith.constant 0 : index
    %6 = vector.load %arg1[%c0_7, %c0_8, %c0_9] : memref<1x16x16xf32, #tpu.memory_space<vmem>>, vector<1x16x16xf32>
    %7 = vector.shape_cast %6 : vector<1x16x16xf32> to vector<16x16xf32>
    %c8 = arith.constant 8 : index
    %c0_10 = arith.constant 0 : index
    %8 = vector.load %arg5[%c8, %c0_10] : memref<32x16xf32, #tpu.memory_space<vmem>>, vector<16x16xf32>
    tpu.vector_store %arg5[%c8, %c0_10], %7 {strides = array<i32>} : memref<32x16xf32, #tpu.memory_space<vmem>>, vector<16x16xf32>,
    %cst_11 = arith.constant 0.000000e+00 : f32
    %9 = vector.broadcast %cst_11 : f32 to vector<4x128xf32>
    %c8_12 = arith.constant 8 : index
    %c0_13 = arith.constant 0 : index
    %10 = tpu.strided_load %arg5[%c8_12, %c0_13] {strides = array<i32: 2, 1>} : memref<32x16xf32, #tpu.memory_space<vmem>>, vector<8x16xf32>
    %c9 = arith.constant 9 : index
    %c0_14 = arith.constant 0 : index
    %11 = tpu.strided_load %arg5[%c9, %c0_14] {strides = array<i32: 2, 1>} : memref<32x16xf32, #tpu.memory_space<vmem>>, vector<8x16xf32>
    %12 = tpu.concatenate %10, %11 in 1 : vector<8x16xf32>, vector<8x16xf32> -> vector<8x32xf32>
    %c0_15 = arith.constant 0 : index
    %c0_16 = arith.constant 0 : index
    %13 = vector.load %arg2[%c0_15, %c0_16] : memref<6464x128xf32, #tpu.memory_space<vmem>>, vector<32x128xf32>
    %cst_17 = arith.constant dense<0.000000e+00> : vector<8x128xf32>
    %14 = tpu.matmul %12, %13, %cst_17 {dimension_numbers = #tpu.dot_dimension_numbers<[1], [0], [0], [1], [0, 0, 1, 1], [], []>} : vector<8x32xf32>, vector<32x128xf32>, vector<8x128xf32> -> vector<8x128xf32>
    %c0_18 = arith.constant 0 : index
    %c0_19 = arith.constant 0 : index
    %15 = vector.load %arg3[%c0_18, %c0_19] : memref<32x128xf32, #tpu.memory_space<vmem>>, vector<1x128xf32>
    %16 = vector.broadcast %15 : vector<1x128xf32> to vector<8x128xf32>
    %17 = arith.addf %14, %16 : vector<8x128xf32>
    %cst_20 = arith.constant 0.000000e+00 : f32
    %18 = vector.broadcast %cst_20 : f32 to vector<8x128xf32>
    %19 = arith.maximumf %17, %18 : vector<8x128xf32>
    %c8_21 = arith.constant 8 : index
    %c0_22 = arith.constant 0 : index
    %20 = vector.load %arg6[%c8_21, %c0_22] : memref<24x128xf32, #tpu.memory_space<vmem>>, vector<8x128xf32>
    tpu.vector_store %arg6[%c8_21, %c0_22], %19 {strides = array<i32>} : memref<24x128xf32, #tpu.memory_space<vmem>>, vector<8x128xf32>,
    %c8_23 = arith.constant 8 : index
    %c0_24 = arith.constant 0 : index
    %21 = tpu.strided_load %arg6[%c8_23, %c0_24] {strides = array<i32: 2, 1>} : memref<24x128xf32, #tpu.memory_space<vmem>>, vector<4x128xf32>
    %c9_25 = arith.constant 9 : index
    %c0_26 = arith.constant 0 : index
    %22 = tpu.strided_load %arg6[%c9_25, %c0_26] {strides = array<i32: 2, 1>} : memref<24x128xf32, #tpu.memory_space<vmem>>, vector<4x128xf32>
    %23 = tpu.concatenate %21, %22 in 1 : vector<4x128xf32>, vector<4x128xf32> -> vector<4x256xf32>
    %c32 = arith.constant 32 : index
    %c0_27 = arith.constant 0 : index
    %24 = vector.load %arg2[%c32, %c0_27] : memref<6464x128xf32, #tpu.memory_space<vmem>>, vector<256x128xf32>
    %cst_28 = arith.constant dense<0.000000e+00> : vector<4x128xf32>
    %25 = tpu.matmul %23, %24, %cst_28 {dimension_numbers = #tpu.dot_dimension_numbers<[1], [0], [0], [1], [0, 0, 1, 1], [], []>} : vector<4x256xf32>, vector<256x128xf32>, vector<4x128xf32> -> vector<4x128xf32>
    %c1 = arith.constant 1 : index
    %c0_29 = arith.constant 0 : index
    %26 = vector.load %arg3[%c1, %c0_29] : memref<32x128xf32, #tpu.memory_space<vmem>>, vector<1x128xf32>
    %27 = vector.broadcast %26 : vector<1x128xf32> to vector<4x128xf32>
    %28 = arith.addf %25, %27 : vector<4x128xf32>
    %cst_30 = arith.constant 0.000000e+00 : f32
    %29 = vector.broadcast %cst_30 : f32 to vector<4x128xf32>
    %30 = arith.maximumf %28, %29 : vector<4x128xf32>
    %c1_31 = arith.constant 1 : index
    %c0_32 = arith.constant 0 : index
    %31 = vector.load %arg7[%c1_31, %c0_32] : memref<8x128xf32, #tpu.memory_space<vmem>>, vector<4x128xf32>
    tpu.vector_store %arg7[%c1_31, %c0_32], %30 {strides = array<i32>} : memref<8x128xf32, #tpu.memory_space<vmem>>, vector<4x128xf32>,
    %c0_33 = arith.constant 0 : index
    %c0_34 = arith.constant 0 : index
    %32 = vector.load %arg7[%c0_33, %c0_34] : memref<8x128xf32, #tpu.memory_space<vmem>>, vector<4x128xf32>
    %c1_35 = arith.constant 1 : index
    %c0_36 = arith.constant 0 : index
    %33 = vector.load %arg7[%c1_35, %c0_36] : memref<8x128xf32, #tpu.memory_space<vmem>>, vector<4x128xf32>
    %c2 = arith.constant 2 : index
    %c0_37 = arith.constant 0 : index
    %34 = vector.load %arg7[%c2, %c0_37] : memref<8x128xf32, #tpu.memory_space<vmem>>, vector<4x128xf32>
    %35 = tpu.concatenate %32, %33, %34 in 1 : vector<4x128xf32>, vector<4x128xf32>, vector<4x128xf32> -> vector<4x384xf32>
    %c288 = arith.constant 288 : index
    %c0_38 = arith.constant 0 : index
    %36 = vector.load %arg2[%c288, %c0_38] : memref<6464x128xf32, #tpu.memory_space<vmem>>, vector<384x128xf32>
    %cst_39 = arith.constant dense<0.000000e+00> : vector<4x128xf32>
    %37 = tpu.matmul %35, %36, %cst_39 {dimension_numbers = #tpu.dot_dimension_numbers<[1], [0], [0], [1], [0, 0, 1, 1], [], []>} : vector<4x384xf32>, vector<384x128xf32>, vector<4x128xf32> -> vector<4x128xf32>
    %c2_40 = arith.constant 2 : index
    %c0_41 = arith.constant 0 : index
    %38 = vector.load %arg3[%c2_40, %c0_41] : memref<32x128xf32, #tpu.memory_space<vmem>>, vector<1x128xf32>
    %39 = vector.broadcast %38 : vector<1x128xf32> to vector<4x128xf32>
    %40 = arith.addf %37, %39 : vector<4x128xf32>
    %cst_42 = arith.constant 0.000000e+00 : f32
    %41 = vector.broadcast %cst_42 : f32 to vector<4x128xf32>
    %42 = arith.maximumf %40, %41 : vector<4x128xf32>
    %c1_43 = arith.constant 1 : index
    %c0_44 = arith.constant 0 : index
    %43 = vector.load %arg7[%c1_43, %c0_44] : memref<8x128xf32, #tpu.memory_space<vmem>>, vector<4x128xf32>
    tpu.vector_store %arg7[%c1_43, %c0_44], %42 {strides = array<i32>} : memref<8x128xf32, #tpu.memory_space<vmem>>, vector<4x128xf32>,
    %c0_45 = arith.constant 0 : index
    %c0_46 = arith.constant 0 : index
    %44 = vector.load %arg7[%c0_45, %c0_46] : memref<8x128xf32, #tpu.memory_space<vmem>>, vector<4x128xf32>
    %c1_47 = arith.constant 1 : index
    %c0_48 = arith.constant 0 : index
    %45 = vector.load %arg7[%c1_47, %c0_48] : memref<8x128xf32, #tpu.memory_space<vmem>>, vector<4x128xf32>
    %c2_49 = arith.constant 2 : index
    %c0_50 = arith.constant 0 : index
    %46 = vector.load %arg7[%c2_49, %c0_50] : memref<8x128xf32, #tpu.memory_space<vmem>>, vector<4x128xf32>
    %47 = tpu.concatenate %44, %45, %46 in 1 : vector<4x128xf32>, vector<4x128xf32>, vector<4x128xf32> -> vector<4x384xf32>
    %c672 = arith.constant 672 : index
    %c0_51 = arith.constant 0 : index
    %48 = vector.load %arg2[%c672, %c0_51] : memref<6464x128xf32, #tpu.memory_space<vmem>>, vector<384x128xf32>
    %cst_52 = arith.constant dense<0.000000e+00> : vector<4x128xf32>
    %49 = tpu.matmul %47, %48, %cst_52 {dimension_numbers = #tpu.dot_dimension_numbers<[1], [0], [0], [1], [0, 0, 1, 1], [], []>} : vector<4x384xf32>, vector<384x128xf32>, vector<4x128xf32> -> vector<4x128xf32>
    %c3 = arith.constant 3 : index
    %c0_53 = arith.constant 0 : index
    %50 = vector.load %arg3[%c3, %c0_53] : memref<32x128xf32, #tpu.memory_space<vmem>>, vector<1x128xf32>
    %51 = vector.broadcast %50 : vector<1x128xf32> to vector<4x128xf32>
    %52 = arith.addf %49, %51 : vector<4x128xf32>
    %cst_54 = arith.constant 0.000000e+00 : f32
    %53 = vector.broadcast %cst_54 : f32 to vector<4x128xf32>
    %54 = arith.maximumf %52, %53 : vector<4x128xf32>
    %c1056 = arith.constant 1056 : index
    %c0_55 = arith.constant 0 : index
    %55 = vector.load %arg2[%c1056, %c0_55] : memref<6464x128xf32, #tpu.memory_space<vmem>>, vector<128x128xf32>
    %cst_56 = arith.constant dense<0.000000e+00> : vector<4x128xf32>
    %56 = tpu.matmul %54, %55, %cst_56 {dimension_numbers = #tpu.dot_dimension_numbers<[1], [0], [0], [1], [0, 0, 1, 1], [], []>} : vector<4x128xf32>, vector<128x128xf32>, vector<4x128xf32> -> vector<4x128xf32>
    %c4 = arith.constant 4 : index
    %c0_57 = arith.constant 0 : index
    %57 = vector.load %arg3[%c4, %c0_57] : memref<32x128xf32, #tpu.memory_space<vmem>>, vector<1x128xf32>
    %58 = vector.broadcast %57 : vector<1x128xf32> to vector<4x128xf32>
    %59 = arith.addf %56, %58 : vector<4x128xf32>
    %60 = arith.addf %59, %40 : vector<4x128xf32>
    %cst_58 = arith.constant 0.000000e+00 : f32
    %61 = vector.broadcast %cst_58 : f32 to vector<4x128xf32>
    %62 = arith.maximumf %60, %61 : vector<4x128xf32>
    %63 = arith.addf %9, %62 : vector<4x128xf32>
    %c7 = arith.constant 7 : index
    %c0_59 = arith.constant 0 : index
    %64 = tpu.strided_load %arg5[%c7, %c0_59] {strides = array<i32: 2, 1>} : memref<32x16xf32, #tpu.memory_space<vmem>>, vector<8x16xf32>
    %c8_60 = arith.constant 8 : index
    %c0_61 = arith.constant 0 : index
    %65 = tpu.strided_load %arg5[%c8_60, %c0_61] {strides = array<i32: 2, 1>} : memref<32x16xf32, #tpu.memory_space<vmem>>, vector<8x16xf32>
    %c9_62 = arith.constant 9 : index
    %c0_63 = arith.constant 0 : index
    %66 = tpu.strided_load %arg5[%c9_62, %c0_63] {strides = array<i32: 2, 1>} : memref<32x16xf32, #tpu.memory_space<vmem>>, vector<8x16xf32>
    %c10 = arith.constant 10 : index
    %c0_64 = arith.constant 0 : index
    %67 = tpu.strided_load %arg5[%c10, %c0_64] {strides = array<i32: 2, 1>} : memref<32x16xf32, #tpu.memory_space<vmem>>, vector<8x16xf32>
    %68 = tpu.concatenate %64, %65, %66, %67 in 1 : vector<8x16xf32>, vector<8x16xf32>, vector<8x16xf32>, vector<8x16xf32> -> vector<8x64xf32>
    %c1184 = arith.constant 1184 : index
    %c0_65 = arith.constant 0 : index
    %69 = vector.load %arg2[%c1184, %c0_65] : memref<6464x128xf32, #tpu.memory_space<vmem>>, vector<64x128xf32>
    %cst_66 = arith.constant dense<0.000000e+00> : vector<8x128xf32>
    %70 = tpu.matmul %68, %69, %cst_66 {dimension_numbers = #tpu.dot_dimension_numbers<[1], [0], [0], [1], [0, 0, 1, 1], [], []>} : vector<8x64xf32>, vector<64x128xf32>, vector<8x128xf32> -> vector<8x128xf32>
    %c8_67 = arith.constant 8 : index
    %c0_68 = arith.constant 0 : index
    %71 = vector.load %arg3[%c8_67, %c0_68] : memref<32x128xf32, #tpu.memory_space<vmem>>, vector<1x128xf32>
    %72 = vector.broadcast %71 : vector<1x128xf32> to vector<8x128xf32>
    %73 = arith.addf %70, %72 : vector<8x128xf32>
    %cst_69 = arith.constant 0.000000e+00 : f32
    %74 = vector.broadcast %cst_69 : f32 to vector<8x128xf32>
    %75 = arith.maximumf %73, %74 : vector<8x128xf32>
    %c8_70 = arith.constant 8 : index
    %c0_71 = arith.constant 0 : index
    %76 = vector.load %arg6[%c8_70, %c0_71] : memref<24x128xf32, #tpu.memory_space<vmem>>, vector<8x128xf32>
    tpu.vector_store %arg6[%c8_70, %c0_71], %75 {strides = array<i32>} : memref<24x128xf32, #tpu.memory_space<vmem>>, vector<8x128xf32>,
    %c7_72 = arith.constant 7 : index
    %c0_73 = arith.constant 0 : index
    %77 = tpu.strided_load %arg6[%c7_72, %c0_73] {strides = array<i32: 2, 1>} : memref<24x128xf32, #tpu.memory_space<vmem>>, vector<4x128xf32>
    %c8_74 = arith.constant 8 : index
    %c0_75 = arith.constant 0 : index
    %78 = tpu.strided_load %arg6[%c8_74, %c0_75] {strides = array<i32: 2, 1>} : memref<24x128xf32, #tpu.memory_space<vmem>>, vector<4x128xf32>
    %c9_76 = arith.constant 9 : index
    %c0_77 = arith.constant 0 : index
    %79 = tpu.strided_load %arg6[%c9_76, %c0_77] {strides = array<i32: 2, 1>} : memref<24x128xf32, #tpu.memory_space<vmem>>, vector<4x128xf32>
    %c10_78 = arith.constant 10 : index
    %c0_79 = arith.constant 0 : index
    %80 = tpu.strided_load %arg6[%c10_78, %c0_79] {strides = array<i32: 2, 1>} : memref<24x128xf32, #tpu.memory_space<vmem>>, vector<4x128xf32>
    %81 = tpu.concatenate %77, %78, %79, %80 in 1 : vector<4x128xf32>, vector<4x128xf32>, vector<4x128xf32>, vector<4x128xf32> -> vector<4x512xf32>
    %c1248 = arith.constant 1248 : index
    %c0_80 = arith.constant 0 : index
    %82 = vector.load %arg2[%c1248, %c0_80] : memref<6464x128xf32, #tpu.memory_space<vmem>>, vector<512x128xf32>
    %cst_81 = arith.constant dense<0.000000e+00> : vector<4x128xf32>
    %83 = tpu.matmul %81, %82, %cst_81 {dimension_numbers = #tpu.dot_dimension_numbers<[1], [0], [0], [1], [0, 0, 1, 1], [], []>} : vector<4x512xf32>, vector<512x128xf32>, vector<4x128xf32> -> vector<4x128xf32>
    %c9_82 = arith.constant 9 : index
    %c0_83 = arith.constant 0 : index
    %84 = vector.load %arg3[%c9_82, %c0_83] : memref<32x128xf32, #tpu.memory_space<vmem>>, vector<1x128xf32>
    %85 = vector.broadcast %84 : vector<1x128xf32> to vector<4x128xf32>
    %86 = arith.addf %83, %85 : vector<4x128xf32>
    %cst_84 = arith.constant 0.000000e+00 : f32
    %87 = vector.broadcast %cst_84 : f32 to vector<4x128xf32>
    %88 = arith.maximumf %86, %87 : vector<4x128xf32>
    %c1_85 = arith.constant 1 : index
    %c0_86 = arith.constant 0 : index
    %89 = vector.load %arg7[%c1_85, %c0_86] : memref<8x128xf32, #tpu.memory_space<vmem>>, vector<4x128xf32>
    tpu.vector_store %arg7[%c1_85, %c0_86], %88 {strides = array<i32>} : memref<8x128xf32, #tpu.memory_space<vmem>>, vector<4x128xf32>,
    %c0_87 = arith.constant 0 : index
    %c0_88 = arith.constant 0 : index
    %90 = vector.load %arg7[%c0_87, %c0_88] : memref<8x128xf32, #tpu.memory_space<vmem>>, vector<4x128xf32>
    %c1_89 = arith.constant 1 : index
    %c0_90 = arith.constant 0 : index
    %91 = vector.load %arg7[%c1_89, %c0_90] : memref<8x128xf32, #tpu.memory_space<vmem>>, vector<4x128xf32>
    %c2_91 = arith.constant 2 : index
    %c0_92 = arith.constant 0 : index
    %92 = vector.load %arg7[%c2_91, %c0_92] : memref<8x128xf32, #tpu.memory_space<vmem>>, vector<4x128xf32>
    %93 = tpu.concatenate %90, %91, %92 in 1 : vector<4x128xf32>, vector<4x128xf32>, vector<4x128xf32> -> vector<4x384xf32>
    %c1760 = arith.constant 1760 : index
    %c0_93 = arith.constant 0 : index
    %94 = vector.load %arg2[%c1760, %c0_93] : memref<6464x128xf32, #tpu.memory_space<vmem>>, vector<384x128xf32>
    %cst_94 = arith.constant dense<0.000000e+00> : vector<4x128xf32>
    %95 = tpu.matmul %93, %94, %cst_94 {dimension_numbers = #tpu.dot_dimension_numbers<[1], [0], [0], [1], [0, 0, 1, 1], [], []>} : vector<4x384xf32>, vector<384x128xf32>, vector<4x128xf32> -> vector<4x128xf32>
    %c10_95 = arith.constant 10 : index
    %c0_96 = arith.constant 0 : index
    %96 = vector.load %arg3[%c10_95, %c0_96] : memref<32x128xf32, #tpu.memory_space<vmem>>, vector<1x128xf32>
    %97 = vector.broadcast %96 : vector<1x128xf32> to vector<4x128xf32>
    %98 = arith.addf %95, %97 : vector<4x128xf32>
    %cst_97 = arith.constant 0.000000e+00 : f32
    %99 = vector.broadcast %cst_97 : f32 to vector<4x128xf32>
    %100 = arith.maximumf %98, %99 : vector<4x128xf32>
    %c1_98 = arith.constant 1 : index
    %c0_99 = arith.constant 0 : index
    %101 = vector.load %arg7[%c1_98, %c0_99] : memref<8x128xf32, #tpu.memory_space<vmem>>, vector<4x128xf32>
    tpu.vector_store %arg7[%c1_98, %c0_99], %100 {strides = array<i32>} : memref<8x128xf32, #tpu.memory_space<vmem>>, vector<4x128xf32>,
    %c0_100 = arith.constant 0 : index
    %c0_101 = arith.constant 0 : index
    %102 = vector.load %arg7[%c0_100, %c0_101] : memref<8x128xf32, #tpu.memory_space<vmem>>, vector<4x128xf32>
    %c1_102 = arith.constant 1 : index
    %c0_103 = arith.constant 0 : index
    %103 = vector.load %arg7[%c1_102, %c0_103] : memref<8x128xf32, #tpu.memory_space<vmem>>, vector<4x128xf32>
    %c2_104 = arith.constant 2 : index
    %c0_105 = arith.constant 0 : index
    %104 = vector.load %arg7[%c2_104, %c0_105] : memref<8x128xf32, #tpu.memory_space<vmem>>, vector<4x128xf32>
    %105 = tpu.concatenate %102, %103, %104 in 1 : vector<4x128xf32>, vector<4x128xf32>, vector<4x128xf32> -> vector<4x384xf32>
    %c2144 = arith.constant 2144 : index
    %c0_106 = arith.constant 0 : index
    %106 = vector.load %arg2[%c2144, %c0_106] : memref<6464x128xf32, #tpu.memory_space<vmem>>, vector<384x128xf32>
    %cst_107 = arith.constant dense<0.000000e+00> : vector<4x128xf32>
    %107 = tpu.matmul %105, %106, %cst_107 {dimension_numbers = #tpu.dot_dimension_numbers<[1], [0], [0], [1], [0, 0, 1, 1], [], []>} : vector<4x384xf32>, vector<384x128xf32>, vector<4x128xf32> -> vector<4x128xf32>
    %c11 = arith.constant 11 : index
    %c0_108 = arith.constant 0 : index
    %108 = vector.load %arg3[%c11, %c0_108] : memref<32x128xf32, #tpu.memory_space<vmem>>, vector<1x128xf32>
    %109 = vector.broadcast %108 : vector<1x128xf32> to vector<4x128xf32>
    %110 = arith.addf %107, %109 : vector<4x128xf32>
    %cst_109 = arith.constant 0.000000e+00 : f32
    %111 = vector.broadcast %cst_109 : f32 to vector<4x128xf32>
    %112 = arith.maximumf %110, %111 : vector<4x128xf32>
    %c2528 = arith.constant 2528 : index
    %c0_110 = arith.constant 0 : index
    %113 = vector.load %arg2[%c2528, %c0_110] : memref<6464x128xf32, #tpu.memory_space<vmem>>, vector<128x128xf32>
    %cst_111 = arith.constant dense<0.000000e+00> : vector<4x128xf32>
    %114 = tpu.matmul %112, %113, %cst_111 {dimension_numbers = #tpu.dot_dimension_numbers<[1], [0], [0], [1], [0, 0, 1, 1], [], []>} : vector<4x128xf32>, vector<128x128xf32>, vector<4x128xf32> -> vector<4x128xf32>
    %c12 = arith.constant 12 : index
    %c0_112 = arith.constant 0 : index
    %115 = vector.load %arg3[%c12, %c0_112] : memref<32x128xf32, #tpu.memory_space<vmem>>, vector<1x128xf32>
    %116 = vector.broadcast %115 : vector<1x128xf32> to vector<4x128xf32>
    %117 = arith.addf %114, %116 : vector<4x128xf32>
    %118 = arith.addf %117, %98 : vector<4x128xf32>
    %cst_113 = arith.constant 0.000000e+00 : f32
    %119 = vector.broadcast %cst_113 : f32 to vector<4x128xf32>
    %120 = arith.maximumf %118, %119 : vector<4x128xf32>
    %121 = arith.addf %63, %120 : vector<4x128xf32>
    %c6 = arith.constant 6 : index
    %c0_114 = arith.constant 0 : index
    %122 = tpu.strided_load %arg5[%c6, %c0_114] {strides = array<i32: 2, 1>} : memref<32x16xf32, #tpu.memory_space<vmem>>, vector<8x16xf32>
    %c7_115 = arith.constant 7 : index
    %c0_116 = arith.constant 0 : index
    %123 = tpu.strided_load %arg5[%c7_115, %c0_116] {strides = array<i32: 2, 1>} : memref<32x16xf32, #tpu.memory_space<vmem>>, vector<8x16xf32>
    %c8_117 = arith.constant 8 : index
    %c0_118 = arith.constant 0 : index
    %124 = tpu.strided_load %arg5[%c8_117, %c0_118] {strides = array<i32: 2, 1>} : memref<32x16xf32, #tpu.memory_space<vmem>>, vector<8x16xf32>
    %c9_119 = arith.constant 9 : index
    %c0_120 = arith.constant 0 : index
    %125 = tpu.strided_load %arg5[%c9_119, %c0_120] {strides = array<i32: 2, 1>} : memref<32x16xf32, #tpu.memory_space<vmem>>, vector<8x16xf32>
    %c10_121 = arith.constant 10 : index
    %c0_122 = arith.constant 0 : index
    %126 = tpu.strided_load %arg5[%c10_121, %c0_122] {strides = array<i32: 2, 1>} : memref<32x16xf32, #tpu.memory_space<vmem>>, vector<8x16xf32>
    %c11_123 = arith.constant 11 : index
    %c0_124 = arith.constant 0 : index
    %127 = tpu.strided_load %arg5[%c11_123, %c0_124] {strides = array<i32: 2, 1>} : memref<32x16xf32, #tpu.memory_space<vmem>>, vector<8x16xf32>
    %128 = tpu.concatenate %122, %123, %124, %125, %126, %127 in 1 : vector<8x16xf32>, vector<8x16xf32>, vector<8x16xf32>, vector<8x16xf32>, vector<8x16xf32>, vector<8x16xf32> -> vector<8x96xf32>
    %c2656 = arith.constant 2656 : index
    %c0_125 = arith.constant 0 : index
    %129 = vector.load %arg2[%c2656, %c0_125] : memref<6464x128xf32, #tpu.memory_space<vmem>>, vector<96x128xf32>
    %cst_126 = arith.constant dense<0.000000e+00> : vector<8x128xf32>
    %130 = tpu.matmul %128, %129, %cst_126 {dimension_numbers = #tpu.dot_dimension_numbers<[1], [0], [0], [1], [0, 0, 1, 1], [], []>} : vector<8x96xf32>, vector<96x128xf32>, vector<8x128xf32> -> vector<8x128xf32>
    %c16 = arith.constant 16 : index
    %c0_127 = arith.constant 0 : index
    %131 = vector.load %arg3[%c16, %c0_127] : memref<32x128xf32, #tpu.memory_space<vmem>>, vector<1x128xf32>
    %132 = vector.broadcast %131 : vector<1x128xf32> to vector<8x128xf32>
    %133 = arith.addf %130, %132 : vector<8x128xf32>
    %cst_128 = arith.constant 0.000000e+00 : f32
    %134 = vector.broadcast %cst_128 : f32 to vector<8x128xf32>
    %135 = arith.maximumf %133, %134 : vector<8x128xf32>
    %c8_129 = arith.constant 8 : index
    %c0_130 = arith.constant 0 : index
    %136 = vector.load %arg6[%c8_129, %c0_130] : memref<24x128xf32, #tpu.memory_space<vmem>>, vector<8x128xf32>
    tpu.vector_store %arg6[%c8_129, %c0_130], %135 {strides = array<i32>} : memref<24x128xf32, #tpu.memory_space<vmem>>, vector<8x128xf32>,
    %c6_131 = arith.constant 6 : index
    %c0_132 = arith.constant 0 : index
    %137 = tpu.strided_load %arg6[%c6_131, %c0_132] {strides = array<i32: 2, 1>} : memref<24x128xf32, #tpu.memory_space<vmem>>, vector<4x128xf32>
    %c7_133 = arith.constant 7 : index
    %c0_134 = arith.constant 0 : index
    %138 = tpu.strided_load %arg6[%c7_133, %c0_134] {strides = array<i32: 2, 1>} : memref<24x128xf32, #tpu.memory_space<vmem>>, vector<4x128xf32>
    %c8_135 = arith.constant 8 : index
    %c0_136 = arith.constant 0 : index
    %139 = tpu.strided_load %arg6[%c8_135, %c0_136] {strides = array<i32: 2, 1>} : memref<24x128xf32, #tpu.memory_space<vmem>>, vector<4x128xf32>
    %c9_137 = arith.constant 9 : index
    %c0_138 = arith.constant 0 : index
    %140 = tpu.strided_load %arg6[%c9_137, %c0_138] {strides = array<i32: 2, 1>} : memref<24x128xf32, #tpu.memory_space<vmem>>, vector<4x128xf32>
    %c10_139 = arith.constant 10 : index
    %c0_140 = arith.constant 0 : index
    %141 = tpu.strided_load %arg6[%c10_139, %c0_140] {strides = array<i32: 2, 1>} : memref<24x128xf32, #tpu.memory_space<vmem>>, vector<4x128xf32>
    %c11_141 = arith.constant 11 : index
    %c0_142 = arith.constant 0 : index
    %142 = tpu.strided_load %arg6[%c11_141, %c0_142] {strides = array<i32: 2, 1>} : memref<24x128xf32, #tpu.memory_space<vmem>>, vector<4x128xf32>
    %143 = tpu.concatenate %137, %138, %139, %140, %141, %142 in 1 : vector<4x128xf32>, vector<4x128xf32>, vector<4x128xf32>, vector<4x128xf32>, vector<4x128xf32>, vector<4x128xf32> -> vector<4x768xf32>
    %c2752 = arith.constant 2752 : index
    %c0_143 = arith.constant 0 : index
    %144 = vector.load %arg2[%c2752, %c0_143] : memref<6464x128xf32, #tpu.memory_space<vmem>>, vector<768x128xf32>
    %cst_144 = arith.constant dense<0.000000e+00> : vector<4x128xf32>
    %145 = tpu.matmul %143, %144, %cst_144 {dimension_numbers = #tpu.dot_dimension_numbers<[1], [0], [0], [1], [0, 0, 1, 1], [], []>} : vector<4x768xf32>, vector<768x128xf32>, vector<4x128xf32> -> vector<4x128xf32>
    %c17 = arith.constant 17 : index
    %c0_145 = arith.constant 0 : index
    %146 = vector.load %arg3[%c17, %c0_145] : memref<32x128xf32, #tpu.memory_space<vmem>>, vector<1x128xf32>
    %147 = vector.broadcast %146 : vector<1x128xf32> to vector<4x128xf32>
    %148 = arith.addf %145, %147 : vector<4x128xf32>
    %cst_146 = arith.constant 0.000000e+00 : f32
    %149 = vector.broadcast %cst_146 : f32 to vector<4x128xf32>
    %150 = arith.maximumf %148, %149 : vector<4x128xf32>
    %c1_147 = arith.constant 1 : index
    %c0_148 = arith.constant 0 : index
    %151 = vector.load %arg7[%c1_147, %c0_148] : memref<8x128xf32, #tpu.memory_space<vmem>>, vector<4x128xf32>
    tpu.vector_store %arg7[%c1_147, %c0_148], %150 {strides = array<i32>} : memref<8x128xf32, #tpu.memory_space<vmem>>, vector<4x128xf32>,
    %c0_149 = arith.constant 0 : index
    %c0_150 = arith.constant 0 : index
    %152 = vector.load %arg7[%c0_149, %c0_150] : memref<8x128xf32, #tpu.memory_space<vmem>>, vector<4x128xf32>
    %c1_151 = arith.constant 1 : index
    %c0_152 = arith.constant 0 : index
    %153 = vector.load %arg7[%c1_151, %c0_152] : memref<8x128xf32, #tpu.memory_space<vmem>>, vector<4x128xf32>
    %c2_153 = arith.constant 2 : index
    %c0_154 = arith.constant 0 : index
    %154 = vector.load %arg7[%c2_153, %c0_154] : memref<8x128xf32, #tpu.memory_space<vmem>>, vector<4x128xf32>
    %155 = tpu.concatenate %152, %153, %154 in 1 : vector<4x128xf32>, vector<4x128xf32>, vector<4x128xf32> -> vector<4x384xf32>
    %c3520 = arith.constant 3520 : index
    %c0_155 = arith.constant 0 : index
    %156 = vector.load %arg2[%c3520, %c0_155] : memref<6464x128xf32, #tpu.memory_space<vmem>>, vector<384x128xf32>
    %cst_156 = arith.constant dense<0.000000e+00> : vector<4x128xf32>
    %157 = tpu.matmul %155, %156, %cst_156 {dimension_numbers = #tpu.dot_dimension_numbers<[1], [0], [0], [1], [0, 0, 1, 1], [], []>} : vector<4x384xf32>, vector<384x128xf32>, vector<4x128xf32> -> vector<4x128xf32>
    %c18 = arith.constant 18 : index
    %c0_157 = arith.constant 0 : index
    %158 = vector.load %arg3[%c18, %c0_157] : memref<32x128xf32, #tpu.memory_space<vmem>>, vector<1x128xf32>
    %159 = vector.broadcast %158 : vector<1x128xf32> to vector<4x128xf32>
    %160 = arith.addf %157, %159 : vector<4x128xf32>
    %cst_158 = arith.constant 0.000000e+00 : f32
    %161 = vector.broadcast %cst_158 : f32 to vector<4x128xf32>
    %162 = arith.maximumf %160, %161 : vector<4x128xf32>
    %c1_159 = arith.constant 1 : index
    %c0_160 = arith.constant 0 : index
    %163 = vector.load %arg7[%c1_159, %c0_160] : memref<8x128xf32, #tpu.memory_space<vmem>>, vector<4x128xf32>
    tpu.vector_store %arg7[%c1_159, %c0_160], %162 {strides = array<i32>} : memref<8x128xf32, #tpu.memory_space<vmem>>, vector<4x128xf32>,
    %c0_161 = arith.constant 0 : index
    %c0_162 = arith.constant 0 : index
    %164 = vector.load %arg7[%c0_161, %c0_162] : memref<8x128xf32, #tpu.memory_space<vmem>>, vector<4x128xf32>
    %c1_163 = arith.constant 1 : index
    %c0_164 = arith.constant 0 : index
    %165 = vector.load %arg7[%c1_163, %c0_164] : memref<8x128xf32, #tpu.memory_space<vmem>>, vector<4x128xf32>
    %c2_165 = arith.constant 2 : index
    %c0_166 = arith.constant 0 : index
    %166 = vector.load %arg7[%c2_165, %c0_166] : memref<8x128xf32, #tpu.memory_space<vmem>>, vector<4x128xf32>
    %167 = tpu.concatenate %164, %165, %166 in 1 : vector<4x128xf32>, vector<4x128xf32>, vector<4x128xf32> -> vector<4x384xf32>
    %c3904 = arith.constant 3904 : index
    %c0_167 = arith.constant 0 : index
    %168 = vector.load %arg2[%c3904, %c0_167] : memref<6464x128xf32, #tpu.memory_space<vmem>>, vector<384x128xf32>
    %cst_168 = arith.constant dense<0.000000e+00> : vector<4x128xf32>
    %169 = tpu.matmul %167, %168, %cst_168 {dimension_numbers = #tpu.dot_dimension_numbers<[1], [0], [0], [1], [0, 0, 1, 1], [], []>} : vector<4x384xf32>, vector<384x128xf32>, vector<4x128xf32> -> vector<4x128xf32>
    %c19 = arith.constant 19 : index
    %c0_169 = arith.constant 0 : index
    %170 = vector.load %arg3[%c19, %c0_169] : memref<32x128xf32, #tpu.memory_space<vmem>>, vector<1x128xf32>
    %171 = vector.broadcast %170 : vector<1x128xf32> to vector<4x128xf32>
    %172 = arith.addf %169, %171 : vector<4x128xf32>
    %cst_170 = arith.constant 0.000000e+00 : f32
    %173 = vector.broadcast %cst_170 : f32 to vector<4x128xf32>
    %174 = arith.maximumf %172, %173 : vector<4x128xf32>
    %c4288 = arith.constant 4288 : index
    %c0_171 = arith.constant 0 : index
    %175 = vector.load %arg2[%c4288, %c0_171] : memref<6464x128xf32, #tpu.memory_space<vmem>>, vector<128x128xf32>
    %cst_172 = arith.constant dense<0.000000e+00> : vector<4x128xf32>
    %176 = tpu.matmul %174, %175, %cst_172 {dimension_numbers = #tpu.dot_dimension_numbers<[1], [0], [0], [1], [0, 0, 1, 1], [], []>} : vector<4x128xf32>, vector<128x128xf32>, vector<4x128xf32> -> vector<4x128xf32>
    %c20 = arith.constant 20 : index
    %c0_173 = arith.constant 0 : index
    %177 = vector.load %arg3[%c20, %c0_173] : memref<32x128xf32, #tpu.memory_space<vmem>>, vector<1x128xf32>
    %178 = vector.broadcast %177 : vector<1x128xf32> to vector<4x128xf32>
    %179 = arith.addf %176, %178 : vector<4x128xf32>
    %180 = arith.addf %179, %160 : vector<4x128xf32>
    %cst_174 = arith.constant 0.000000e+00 : f32
    %181 = vector.broadcast %cst_174 : f32 to vector<4x128xf32>
    %182 = arith.maximumf %180, %181 : vector<4x128xf32>
    %183 = arith.addf %121, %182 : vector<4x128xf32>
    %c5 = arith.constant 5 : index
    %c0_175 = arith.constant 0 : index
    %184 = tpu.strided_load %arg5[%c5, %c0_175] {strides = array<i32: 2, 1>} : memref<32x16xf32, #tpu.memory_space<vmem>>, vector<8x16xf32>
    %c6_176 = arith.constant 6 : index
    %c0_177 = arith.constant 0 : index
    %185 = tpu.strided_load %arg5[%c6_176, %c0_177] {strides = array<i32: 2, 1>} : memref<32x16xf32, #tpu.memory_space<vmem>>, vector<8x16xf32>
    %c7_178 = arith.constant 7 : index
    %c0_179 = arith.constant 0 : index
    %186 = tpu.strided_load %arg5[%c7_178, %c0_179] {strides = array<i32: 2, 1>} : memref<32x16xf32, #tpu.memory_space<vmem>>, vector<8x16xf32>
    %c8_180 = arith.constant 8 : index
    %c0_181 = arith.constant 0 : index
    %187 = tpu.strided_load %arg5[%c8_180, %c0_181] {strides = array<i32: 2, 1>} : memref<32x16xf32, #tpu.memory_space<vmem>>, vector<8x16xf32>
    %c9_182 = arith.constant 9 : index
    %c0_183 = arith.constant 0 : index
    %188 = tpu.strided_load %arg5[%c9_182, %c0_183] {strides = array<i32: 2, 1>} : memref<32x16xf32, #tpu.memory_space<vmem>>, vector<8x16xf32>
    %c10_184 = arith.constant 10 : index
    %c0_185 = arith.constant 0 : index
    %189 = tpu.strided_load %arg5[%c10_184, %c0_185] {strides = array<i32: 2, 1>} : memref<32x16xf32, #tpu.memory_space<vmem>>, vector<8x16xf32>
    %c11_186 = arith.constant 11 : index
    %c0_187 = arith.constant 0 : index
    %190 = tpu.strided_load %arg5[%c11_186, %c0_187] {strides = array<i32: 2, 1>} : memref<32x16xf32, #tpu.memory_space<vmem>>, vector<8x16xf32>
    %c12_188 = arith.constant 12 : index
    %c0_189 = arith.constant 0 : index
    %191 = tpu.strided_load %arg5[%c12_188, %c0_189] {strides = array<i32: 2, 1>} : memref<32x16xf32, #tpu.memory_space<vmem>>, vector<8x16xf32>
    %192 = tpu.concatenate %184, %185, %186, %187, %188, %189, %190, %191 in 1 : vector<8x16xf32>, vector<8x16xf32>, vector<8x16xf32>, vector<8x16xf32>, vector<8x16xf32>, vector<8x16xf32>, vector<8x16xf32>, vector<8x16xf32> -> vector<8x128xf32>
    %c4416 = arith.constant 4416 : index
    %c0_190 = arith.constant 0 : index
    %193 = vector.load %arg2[%c4416, %c0_190] : memref<6464x128xf32, #tpu.memory_space<vmem>>, vector<128x128xf32>
    %cst_191 = arith.constant dense<0.000000e+00> : vector<8x128xf32>
    %194 = tpu.matmul %192, %193, %cst_191 {dimension_numbers = #tpu.dot_dimension_numbers<[1], [0], [0], [1], [0, 0, 1, 1], [], []>} : vector<8x128xf32>, vector<128x128xf32>, vector<8x128xf32> -> vector<8x128xf32>
    %c24 = arith.constant 24 : index
    %c0_192 = arith.constant 0 : index
    %195 = vector.load %arg3[%c24, %c0_192] : memref<32x128xf32, #tpu.memory_space<vmem>>, vector<1x128xf32>
    %196 = vector.broadcast %195 : vector<1x128xf32> to vector<8x128xf32>
    %197 = arith.addf %194, %196 : vector<8x128xf32>
    %cst_193 = arith.constant 0.000000e+00 : f32
    %198 = vector.broadcast %cst_193 : f32 to vector<8x128xf32>
    %199 = arith.maximumf %197, %198 : vector<8x128xf32>
    %c8_194 = arith.constant 8 : index
    %c0_195 = arith.constant 0 : index
    %200 = vector.load %arg6[%c8_194, %c0_195] : memref<24x128xf32, #tpu.memory_space<vmem>>, vector<8x128xf32>
    tpu.vector_store %arg6[%c8_194, %c0_195], %199 {strides = array<i32>} : memref<24x128xf32, #tpu.memory_space<vmem>>, vector<8x128xf32>,
    %c5_196 = arith.constant 5 : index
    %c0_197 = arith.constant 0 : index
    %201 = tpu.strided_load %arg6[%c5_196, %c0_197] {strides = array<i32: 2, 1>} : memref<24x128xf32, #tpu.memory_space<vmem>>, vector<4x128xf32>
    %c6_198 = arith.constant 6 : index
    %c0_199 = arith.constant 0 : index
    %202 = tpu.strided_load %arg6[%c6_198, %c0_199] {strides = array<i32: 2, 1>} : memref<24x128xf32, #tpu.memory_space<vmem>>, vector<4x128xf32>
    %c7_200 = arith.constant 7 : index
    %c0_201 = arith.constant 0 : index
    %203 = tpu.strided_load %arg6[%c7_200, %c0_201] {strides = array<i32: 2, 1>} : memref<24x128xf32, #tpu.memory_space<vmem>>, vector<4x128xf32>
    %c8_202 = arith.constant 8 : index
    %c0_203 = arith.constant 0 : index
    %204 = tpu.strided_load %arg6[%c8_202, %c0_203] {strides = array<i32: 2, 1>} : memref<24x128xf32, #tpu.memory_space<vmem>>, vector<4x128xf32>
    %c9_204 = arith.constant 9 : index
    %c0_205 = arith.constant 0 : index
    %205 = tpu.strided_load %arg6[%c9_204, %c0_205] {strides = array<i32: 2, 1>} : memref<24x128xf32, #tpu.memory_space<vmem>>, vector<4x128xf32>
    %c10_206 = arith.constant 10 : index
    %c0_207 = arith.constant 0 : index
    %206 = tpu.strided_load %arg6[%c10_206, %c0_207] {strides = array<i32: 2, 1>} : memref<24x128xf32, #tpu.memory_space<vmem>>, vector<4x128xf32>
    %c11_208 = arith.constant 11 : index
    %c0_209 = arith.constant 0 : index
    %207 = tpu.strided_load %arg6[%c11_208, %c0_209] {strides = array<i32: 2, 1>} : memref<24x128xf32, #tpu.memory_space<vmem>>, vector<4x128xf32>
    %c12_210 = arith.constant 12 : index
    %c0_211 = arith.constant 0 : index
    %208 = tpu.strided_load %arg6[%c12_210, %c0_211] {strides = array<i32: 2, 1>} : memref<24x128xf32, #tpu.memory_space<vmem>>, vector<4x128xf32>
    %209 = tpu.concatenate %201, %202, %203, %204, %205, %206, %207, %208 in 1 : vector<4x128xf32>, vector<4x128xf32>, vector<4x128xf32>, vector<4x128xf32>, vector<4x128xf32>, vector<4x128xf32>, vector<4x128xf32>, vector<4x128xf32> -> vector<4x1024xf32>
    %c4544 = arith.constant 4544 : index
    %c0_212 = arith.constant 0 : index
    %210 = vector.load %arg2[%c4544, %c0_212] : memref<6464x128xf32, #tpu.memory_space<vmem>>, vector<1024x128xf32>
    %cst_213 = arith.constant dense<0.000000e+00> : vector<4x128xf32>
    %211 = tpu.matmul %209, %210, %cst_213 {dimension_numbers = #tpu.dot_dimension_numbers<[1], [0], [0], [1], [0, 0, 1, 1], [], []>} : vector<4x1024xf32>, vector<1024x128xf32>, vector<4x128xf32> -> vector<4x128xf32>
    %c25 = arith.constant 25 : index
    %c0_214 = arith.constant 0 : index
    %212 = vector.load %arg3[%c25, %c0_214] : memref<32x128xf32, #tpu.memory_space<vmem>>, vector<1x128xf32>
    %213 = vector.broadcast %212 : vector<1x128xf32> to vector<4x128xf32>
    %214 = arith.addf %211, %213 : vector<4x128xf32>
    %cst_215 = arith.constant 0.000000e+00 : f32
    %215 = vector.broadcast %cst_215 : f32 to vector<4x128xf32>
    %216 = arith.maximumf %214, %215 : vector<4x128xf32>
    %c1_216 = arith.constant 1 : index
    %c0_217 = arith.constant 0 : index
    %217 = vector.load %arg7[%c1_216, %c0_217] : memref<8x128xf32, #tpu.memory_space<vmem>>, vector<4x128xf32>
    tpu.vector_store %arg7[%c1_216, %c0_217], %216 {strides = array<i32>} : memref<8x128xf32, #tpu.memory_space<vmem>>, vector<4x128xf32>,
    %c0_218 = arith.constant 0 : index
    %c0_219 = arith.constant 0 : index
    %218 = vector.load %arg7[%c0_218, %c0_219] : memref<8x128xf32, #tpu.memory_space<vmem>>, vector<4x128xf32>
    %c1_220 = arith.constant 1 : index
    %c0_221 = arith.constant 0 : index
    %219 = vector.load %arg7[%c1_220, %c0_221] : memref<8x128xf32, #tpu.memory_space<vmem>>, vector<4x128xf32>
    %c2_222 = arith.constant 2 : index
    %c0_223 = arith.constant 0 : index
    %220 = vector.load %arg7[%c2_222, %c0_223] : memref<8x128xf32, #tpu.memory_space<vmem>>, vector<4x128xf32>
    %221 = tpu.concatenate %218, %219, %220 in 1 : vector<4x128xf32>, vector<4x128xf32>, vector<4x128xf32> -> vector<4x384xf32>
    %c5568 = arith.constant 5568 : index
    %c0_224 = arith.constant 0 : index
    %222 = vector.load %arg2[%c5568, %c0_224] : memref<6464x128xf32, #tpu.memory_space<vmem>>, vector<384x128xf32>
    %cst_225 = arith.constant dense<0.000000e+00> : vector<4x128xf32>
    %223 = tpu.matmul %221, %222, %cst_225 {dimension_numbers = #tpu.dot_dimension_numbers<[1], [0], [0], [1], [0, 0, 1, 1], [], []>} : vector<4x384xf32>, vector<384x128xf32>, vector<4x128xf32> -> vector<4x128xf32>
    %c26 = arith.constant 26 : index
    %c0_226 = arith.constant 0 : index
    %224 = vector.load %arg3[%c26, %c0_226] : memref<32x128xf32, #tpu.memory_space<vmem>>, vector<1x128xf32>
    %225 = vector.broadcast %224 : vector<1x128xf32> to vector<4x128xf32>
    %226 = arith.addf %223, %225 : vector<4x128xf32>
    %cst_227 = arith.constant 0.000000e+00 : f32
    %227 = vector.broadcast %cst_227 : f32 to vector<4x128xf32>
    %228 = arith.maximumf %226, %227 : vector<4x128xf32>
    %c1_228 = arith.constant 1 : index
    %c0_229 = arith.constant 0 : index
    %229 = vector.load %arg7[%c1_228, %c0_229] : memref<8x128xf32, #tpu.memory_space<vmem>>, vector<4x128xf32>
    tpu.vector_store %arg7[%c1_228, %c0_229], %228 {strides = array<i32>} : memref<8x128xf32, #tpu.memory_space<vmem>>, vector<4x128xf32>,
    %c0_230 = arith.constant 0 : index
    %c0_231 = arith.constant 0 : index
    %230 = vector.load %arg7[%c0_230, %c0_231] : memref<8x128xf32, #tpu.memory_space<vmem>>, vector<4x128xf32>
    %c1_232 = arith.constant 1 : index
    %c0_233 = arith.constant 0 : index
    %231 = vector.load %arg7[%c1_232, %c0_233] : memref<8x128xf32, #tpu.memory_space<vmem>>, vector<4x128xf32>
    %c2_234 = arith.constant 2 : index
    %c0_235 = arith.constant 0 : index
    %232 = vector.load %arg7[%c2_234, %c0_235] : memref<8x128xf32, #tpu.memory_space<vmem>>, vector<4x128xf32>
    %233 = tpu.concatenate %230, %231, %232 in 1 : vector<4x128xf32>, vector<4x128xf32>, vector<4x128xf32> -> vector<4x384xf32>
    %c5952 = arith.constant 5952 : index
    %c0_236 = arith.constant 0 : index
    %234 = vector.load %arg2[%c5952, %c0_236] : memref<6464x128xf32, #tpu.memory_space<vmem>>, vector<384x128xf32>
    %cst_237 = arith.constant dense<0.000000e+00> : vector<4x128xf32>
    %235 = tpu.matmul %233, %234, %cst_237 {dimension_numbers = #tpu.dot_dimension_numbers<[1], [0], [0], [1], [0, 0, 1, 1], [], []>} : vector<4x384xf32>, vector<384x128xf32>, vector<4x128xf32> -> vector<4x128xf32>
    %c27 = arith.constant 27 : index
    %c0_238 = arith.constant 0 : index
    %236 = vector.load %arg3[%c27, %c0_238] : memref<32x128xf32, #tpu.memory_space<vmem>>, vector<1x128xf32>
    %237 = vector.broadcast %236 : vector<1x128xf32> to vector<4x128xf32>
    %238 = arith.addf %235, %237 : vector<4x128xf32>
    %cst_239 = arith.constant 0.000000e+00 : f32
    %239 = vector.broadcast %cst_239 : f32 to vector<4x128xf32>
    %240 = arith.maximumf %238, %239 : vector<4x128xf32>
    %c6336 = arith.constant 6336 : index
    %c0_240 = arith.constant 0 : index
    %241 = vector.load %arg2[%c6336, %c0_240] : memref<6464x128xf32, #tpu.memory_space<vmem>>, vector<128x128xf32>
    %cst_241 = arith.constant dense<0.000000e+00> : vector<4x128xf32>
    %242 = tpu.matmul %240, %241, %cst_241 {dimension_numbers = #tpu.dot_dimension_numbers<[1], [0], [0], [1], [0, 0, 1, 1], [], []>} : vector<4x128xf32>, vector<128x128xf32>, vector<4x128xf32> -> vector<4x128xf32>
    %c28 = arith.constant 28 : index
    %c0_242 = arith.constant 0 : index
    %243 = vector.load %arg3[%c28, %c0_242] : memref<32x128xf32, #tpu.memory_space<vmem>>, vector<1x128xf32>
    %244 = vector.broadcast %243 : vector<1x128xf32> to vector<4x128xf32>
    %245 = arith.addf %242, %244 : vector<4x128xf32>
    %246 = arith.addf %245, %226 : vector<4x128xf32>
    %cst_243 = arith.constant 0.000000e+00 : f32
    %247 = vector.broadcast %cst_243 : f32 to vector<4x128xf32>
    %248 = arith.maximumf %246, %247 : vector<4x128xf32>
    %249 = arith.addf %183, %248 : vector<4x128xf32>
    %c0_244 = arith.constant 0 : index
    %c0_245 = arith.constant 0 : index
    %c0_246 = arith.constant 0 : index
    %250 = vector.load %arg4[%c0_244, %c0_245, %c0_246] : memref<1x4x128xf32, #tpu.memory_space<vmem>>, vector<1x4x128xf32>
    %251 = vector.shape_cast %250 : vector<1x4x128xf32> to vector<4x128xf32>
    %252 = vector.shape_cast %249 : vector<4x128xf32> to vector<1x4x128xf32>
    tpu.vector_store %arg4[%c0_244, %c0_245, %c0_246], %252 {strides = array<i32>} : memref<1x4x128xf32, #tpu.memory_space<vmem>>, vector<1x4x128xf32>,
    return
  }
  func.func @transform_0(%arg0: i32) -> (i32, i32, i32) {
    %c0_i32 = arith.constant 0 : i32
    %c0_i32_0 = arith.constant 0 : i32
    %c0_i32_1 = arith.constant 0 : i32
    return %arg0, %c0_i32, %c0_i32_0 : i32, i32, i32
  }
  func.func @transform_1(%arg0: i32) -> (i32, i32) {
    %c0_i32 = arith.constant 0 : i32
    %c0_i32_0 = arith.constant 0 : i32
    %c0_i32_1 = arith.constant 0 : i32
    return %c0_i32, %c0_i32_0 : i32, i32
  }
  func.func @transform_2(%arg0: i32) -> (i32, i32) {
    %c0_i32 = arith.constant 0 : i32
    %c0_i32_0 = arith.constant 0 : i32
    %c0_i32_1 = arith.constant 0 : i32
    return %c0_i32, %c0_i32_0 : i32, i32
  }
  func.func @transform_3(%arg0: i32) -> (i32, i32, i32) {
    %c0_i32 = arith.constant 0 : i32
    %c0_i32_0 = arith.constant 0 : i32
    %c0_i32_1 = arith.constant 0 : i32
    return %arg0, %c0_i32, %c0_i32_0 : i32, i32, i32
  }
}

</mosaic_0001>

<bundles_post_ra>
// kernel: spec_encoder_forward.1
= control target key start
LH: loop header
LB: loop body
LE: loop exit
PB: predicated region body
PF: predicated region fallthrough
CT: control target
= control target key end

     0   :  { %8 = vsyncpa [#allocation6], 0  ;;  %s6816_s0 = inlined_call_operand.hbm [shape: f32[2,16,16], index: 0, kind: input, shape index: {}]   ;;  %s6817_s1 = inlined_call_operand.hbm [shape: f32[6464,128], index: 1, kind: input, shape index: {}]   ;;  %s6818_s2 = inlined_call_operand.hbm [shape: f32[32,128], index: 2, kind: input, shape index: {}]   ;;  %s6819_s3 = inlined_call_operand.vmem [shape: f32[2,4,128], index: 3, kind: output, shape index: {}]  }
   0x1   :  { %10 = vsyncpa [#allocation6 + $0x1], 0 }
   0x2   :  { %11 = vsyncpa [#allocation8], 0  ;;  %s6408_s12 = smov 0   ;;  %s6410_s13 = smov 0  }
   0x3   :  { %s6412_s14 = smov 0   ;;  %s6414_s15 = smov 0  }
   0x4 LB: > { %s6427_s16 = sadd.s32 4294967295, %s6371_s15   ;;  %p37_p0 = scmp.ne.s32.totalorder %s6363_s13, %s6359_s12  ;;  %s6371_s15 = sphi %s6414_s15, %s6834_s15   ;;  %s6367_s14 = sphi %s6412_s14, %s6833_s14   ;;  %s6363_s13 = sphi %s6410_s13, %s6832_s13   ;;  %s6359_s12 = sphi %s6408_s12, %s6831_s12  }
   0x5   : > { %p6820_p1 = scmp.eq.s32.totalorder %s6427_s16, 0  ;;  %p3820_p2 = scmp.ge.s32.totalorder %s6371_s15, 1 }
   0x6   : > { %p116_p3 = scmp.lt.s32.totalorder %s6371_s15, 3  ;;  %s6373_s19 = smov [#allocation7]  }
   0x7   : > { %p6435_p4 = por %p6820_p1, %p37_p0  ;;  %s128_s20 = sshll.u32 %s6373_s19, 4  ;;  %s129_s20 = int_to_ptr.vmem [resolvable:$true] %s128_s20 }
   0x8   : > { %p6439_p5 = pnand %p3820_p2, %p116_p3  ;;  %s6374_s22 = smov [#allocation9]  }
   0x9   : > { %s6823_s17 = scalar_select %p6435_p4, 1, 0 }
   0xa   : > { %s6824_s18 = scalar_select %p6439_p5, 1, 0 }
   0xb   : > { %p6182_p6 = pneg %p6439_p5  ;;  %s141_s23 = sshll.u32 %s6374_s22, 4  ;;  %s6451_s23 = int_to_ptr.vmem [resolvable:$true] %s141_s23 }
   0xc   : > { %s6247_s26 = scalar_lea.hbm %s6817_s1, 103424 }
   0xd   : > { %p6447_p7 = pnand %p6182_p6, %p6820_p1  ;;  %p6248_p8 = scmp.ne.s32.totalorder %s6817_s1, %s6247_s26 }
   0xe   : > { %p6254_p12 = scmp.lt.u32.totalorder %s6247_s26, %s6817_s1 }
   0xf   : > { %p6249_p9 = pneg %p6447_p7 }
  0x11   : > { %p6250_p10 = pnand %p6249_p9, %p6248_p8 }
  0x13   : > { %p6251_p11 = pneg %p6250_p10 }
  0x15   : > { %p6256_p13 = pnand %p6254_p12, %p6251_p11 }
  0x17   : > { %6259 = shalt.err (!%p6256_p13)
}
  0x18   : > { %s6260_s4 = scalar_lea.vmem %s129_s20, 103424  ;;  %p6268_p6 = scmp.lt.s32.totalorder %s129_s20, %s129_s20 }
  0x19   : > { %p6261_p0 = scmp.ne.s32.totalorder %s129_s20, %s6260_s4  ;;  %p6269_p1 = scmp.lt.s32.totalorder %s6260_s4, %s6260_s4 }
  0x1b   : > { %p6263_p2 = pnand %p6261_p0, %p6249_p9  ;;  %p6270_p4 = por %p6269_p1, %p6268_p6 }
  0x1d   : > { %p6264_p3 = pneg %p6263_p2 }
  0x1f   : > { %p6271_p5 = pnand %p6270_p4, %p6264_p3 }
  0x21   : > { %6274 = shalt.err (!%p6271_p5)
}
  0x22   : > { %s6375_s5 = smov 128   ;;  %s6376_s6 = smov 8  }
  0x23   : > { %6185 = dma.hbm_to_vmem [thread:$0]  (!%p6447_p7), %s6817_s1, 103424, %s129_s20, [#allocation8], %s6375_s5, %s6375_s5, %s6376_s6  }
  0x24   : > { %s6275_s11 = scalar_lea.hbm %s6818_s2, 512 }
  0x25   : > { %p6276_p1 = scmp.ne.s32.totalorder %s6818_s2, %s6275_s11  ;;  %p6282_p8 = scmp.lt.u32.totalorder %s6275_s11, %s6818_s2 }
  0x27   : > { %p6278_p4 = pnand %p6276_p1, %p6249_p9 }
  0x29   : > { %p6279_p5 = pneg %p6278_p4 }
  0x2b   : > { %p6284_p10 = pnand %p6282_p8, %p6279_p5 }
  0x2d   : > { %6287 = shalt.err (!%p6284_p10)
}
  0x2e   : > { %s6288_s20 = scalar_lea.vmem %s6451_s23, 512  ;;  %p6296_p0 = scmp.lt.s32.totalorder %s6451_s23, %s6451_s23 }
  0x2f   : > { %p6289_p11 = scmp.ne.s32.totalorder %s6451_s23, %s6288_s20  ;;  %p6297_p2 = scmp.lt.s32.totalorder %s6288_s20, %s6288_s20 }
  0x31   : > { %p6291_p12 = pnand %p6289_p11, %p6249_p9  ;;  %p6298_p3 = por %p6297_p2, %p6296_p0 }
  0x33   : > { %p6292_p13 = pneg %p6291_p12 }
  0x35   : > { %p6299_p6 = pnand %p6298_p3, %p6292_p13 }
  0x37   : > { %6302 = shalt.err (!%p6299_p6)
}
  0x38   : > { %6188 = dma.hbm_to_vmem [thread:$0]  (!%p6447_p7), %s6818_s2, 512, %s6451_s23, [#allocation8], %s6375_s5, %s6375_s5, %s6376_s6  }
  0x39   : > { %s6507_s27 = sadd.s32 1, %s6371_s15   ;;  %s24_s21 = sadd.s32 1, %s6367_s14 }
  0x3a   : > { %s21_s28 = ssub.s32 %s6371_s15, %s6507_s27  ;;  %p31_p9 = scmp.ne.s32.totalorder %s6367_s14, %s6363_s13 }
  0x3b   : > { %p22_p1 = scmp.eq.s32.totalorder %s21_s28, 0  ;;  %p32_p4 = scmp.eq.s32.totalorder %s6371_s15, 0 }
  0x3c   : > { %p6195_p5 = scmp.lt.s32.totalorder %s6371_s15, 2  ;;  %s155_s29 = sand.u32 1, %s6367_s14  }
  0x3d   : > { %s6518_s30 = scalar_select %p22_p1, %s6367_s14, %s24_s21  }
  0x3e   : > { %p33_p8 = por %p32_p4, %p31_p9  ;;  %s3824_s4 = sshll.u32 %s155_s29, 4 }
  0x3f   : > { %s3857_s7 = sshll.u32 %s6371_s15, 8  ;;  %s159_s23 = scalar_lea.vmem [#allocation5], %s3824_s4 }
  0x40   : > { %s6524_s10 = scalar_lea.hbm %s6816_s0, %s3857_s7  ;;  %s166_s11 = sshll.u32 %s159_s23, 4  ;;  %s6530_s11 = int_to_ptr.vmem [resolvable:$true] %s166_s11 }
  0x41   : > { %p6526_p7 = pnand %p6195_p5, %p33_p8  ;;  %s6532_s15 = scalar_lea.sflag [#allocation6], %s155_s29 }
  0x42   : > { %s6303_s19 = scalar_lea.hbm %s6524_s10, 256  ;;  %s6308_s20 = scalar_lea.hbm %s6816_s0, 512 }
  0x43   : > { %p6304_p10 = scmp.ne.s32.totalorder %s6524_s10, %s6303_s19  ;;  %p6305_p11 = pneg %p6526_p7 }
  0x44   : > { %p6309_p0 = scmp.lt.u32.totalorder %s6524_s10, %s6816_s0  ;;  %p6310_p2 = scmp.lt.u32.totalorder %s6308_s20, %s6303_s19 }
  0x45   : > { %p6306_p12 = pnand %p6305_p11, %p6304_p10  ;;  %p6312_p6 = scmp.lt.u32.totalorder %s6303_s19, %s6524_s10 }
  0x46   : > { %p6311_p3 = por %p6310_p2, %p6309_p0 }
  0x47   : > { %p6307_p13 = pneg %p6306_p12 }
  0x48   : > { %p6313_p9 = por %p6312_p6, %p6311_p3 }
  0x4a   : > { %p6314_p1 = pnand %p6313_p9, %p6307_p13 }
  0x4c   : > { %6317 = shalt.err (!%p6314_p1)
}
  0x4d   : > { %s6318_s21 = scalar_lea.vmem %s6530_s11, 256  ;;  %s6377_s28 = smov [#allocation5]  }
  0x4e   : > { %p6319_p4 = scmp.ne.s32.totalorder %s6530_s11, %s6318_s21  ;;  %s6323_s29 = sshll.u32 %s6377_s28, 4  ;;  %s6324_s29 = int_to_ptr.vmem [resolvable:$false] %s6323_s29 }
  0x4f   : > { %s6325_s4 = scalar_lea.vmem %s6324_s29, 512  ;;  %p6326_p10 = scmp.lt.s32.totalorder %s6530_s11, %s6324_s29 }
  0x50   : > { %p6321_p5 = pnand %p6319_p4, %p6305_p11  ;;  %p6327_p12 = scmp.lt.s32.totalorder %s6325_s4, %s6318_s21 }
  0x52   : > { %p6322_p8 = pneg %p6321_p5  ;;  %p6328_p0 = por %p6327_p12, %p6326_p10 }
  0x54   : > { %p6329_p2 = pnand %p6328_p0, %p6322_p8 }
  0x56   : > { %6332 = shalt.err (!%p6329_p2)
}
  0x57   : > { %6192 = dma.hbm_to_vmem [thread:$0]  (!%p6526_p7), %s6524_s10, 256, %s6530_s11, %s6532_s15, %s6375_s5, %s6375_s5, %s6376_s6  }
  0x58   : > { %p6827_p11 = scmp.ne.s32.totalorder %s6824_s18, 0 }
  0x59   : > { %s180_s7 = sand.u32 (!%p6827_p11), 1, %s6363_s13   ;;  %p6828_p13 = scmp.ne.s32.totalorder (!%p6827_p11), %s6823_s17, 0 }
  0x5a   : > { %178 = sbr.rel (%p6827_p11) target bundleno = 3567 (0xdef), region = 32  ;;  %s3828_s8 = sshll.u32 (!%p6827_p11), %s180_s7, 4 }
  0x5b   : > { %s181_s9 = scalar_lea.sflag (!%p6827_p11), [#allocation6], %s180_s7  ;;  %s184_s23 = scalar_lea.vmem (!%p6827_p11), [#allocation5], %s3828_s8 }
  0x61   : > { %6350 = dma.done.wait (%p6828_p13), %s181_s9, 256  }
  0x62   : > { %6352 = vsyncadd (%p6828_p13), %s181_s9, 4294967040  ;;  %p6829_p3 = scmp.eq.s32.totalorder %s6427_s16, 0 }
  0x64   : > { %6354 = dma.done.wait (%p6829_p3), [#allocation8], 103936   ;;  %p6830_p6 = pmov %p6829_p3 }
  0x65   : > { %vm218_vm0 = vcmask 130048   ;;  %v6378_v0 = vmov 0.0   ;;  %v6379_v1 = vmov 0.0|0.0   ;;  %vm6380_vm1 = vmmov 0   ;;  %v227_v2 = vld [vmem:[%s184_s23] sm:$0xff]  ;;  %v228_v3 = vld [vmem:[%s184_s23 + $0x8] sm:$0xff] }
  0x66   : > { %6356 = vsyncadd (%p6830_p6), [#allocation8], 4294863360  ;;  %220 = vst.msk [vmem:[#allocation2 + $0x8] sm:$0xff] %vm218_vm0, %v6378_v0  ;;  %5248 = vmatprep.subr.bf16.mxu0 %v6379_v1  ;;  %4744 = vmatprep.mubr.msk.f32.mxu0 %vm6380_vm1, %v6378_v0  ;;  %v240_v4 = vld [vmem:[#allocation7] sm:$0xff]  ;;  %v241_v5 = vld [vmem:[#allocation7 + $0x8] sm:$0xff]  ;;  %s6381_s17 = smov 16  }
  0x67   : > { %221 = vst.msk [vmem:[#allocation2 + $0x10] sm:$0xff] %vm218_vm0, %v6378_v0  ;;  %219 = vst.msk [vmem:[#allocation2] sm:$0xff] %vm218_vm0, %v6378_v0  ;;  %v242_v6 = vld [vmem:[#allocation7 + $0x10] sm:$0xff]  ;;  %v243_v7 = vld [vmem:[#allocation7 + $0x18] sm:$0xff]  ;;  %v5249_v8 = vpack.c.bf16 %v241_v5, %v240_v4  ;;  %vm249_vm2 = vcmask 261120   ;;  %s6382_s18 = smov 32  }
  0x68   : > { %222 = vst.msk [vmem:[#allocation2 + $0x18] sm:$0xff] %vm218_vm0, %v6378_v0  ;;  %223 = vst [vmem:[#allocation3] sm:$0xff] %v6378_v0  ;;  %v345_v9 = vld [vmem:[#allocation7 + $0xa0] sm:$0xff]  ;;  %v346_v10 = vld [vmem:[#allocation7 + $0xa8] sm:$0xff]  ;;  %v5252_v16 = vpack.c.bf16 %v243_v7, %v242_v6  ;;  %s6383_s5 = smov 48   ;;  %vm947_vm3 = vcmask 392192  }
  0x69   : > { %225 = vst [vmem:[#allocation3 + $0x10] sm:$0xff] %v6378_v0  ;;  %226 = vst [vmem:[#allocation4] sm:$0xff] %v6378_v0  ;;  %v329_v11 = vld [vmem:[#allocation7 + $0x20] sm:$0xff]  ;;  %v5254_v12 = vpack.c.bf16 %v346_v10, %v345_v9  ;;  %v330_v13 = vld [vmem:[#allocation7 + $0x28] sm:$0xff]  ;;  %5250 = vmatpush3.bf16.msra.mxu0 %v5249_v8  ;;  %vm962_vm4 = vcmask 523264   ;;  %s6384_s6 = smov 64  }
  0x6a   : > { %229 = vst.msk [vmem:[#allocation2 + $0x8] sm:$0xff] %vm218_vm0, %v227_v2  ;;  %230 = vst.msk [vmem:[#allocation2 + $0x10] sm:$0xff] %vm218_vm0, %v228_v3  ;;  %v347_v14 = vld [vmem:[#allocation7 + $0xb0] sm:$0xff]  ;;  %v348_v15 = vld [vmem:[#allocation7 + $0xb8] sm:$0xff]  ;;  %v5256_v17 = vpack.c.bf16 %v330_v13, %v329_v11  ;;  %5251 = vmatprep.subr.bf16.mxu0 %v6379_v1  ;;  %s6385_s10 = smov 80   ;;  %vm1776_vm5 = vcmask 654336  }
  0x6b   : > { %v5258_v18 = vpack.c.bf16 %v348_v15, %v347_v14  ;;  %v331_v19 = vld [vmem:[#allocation7 + $0x30] sm:$0xff]  ;;  %v332_v20 = vld [vmem:[#allocation7 + $0x38] sm:$0xff]  ;;  %v349_v21 = vld [vmem:[#allocation7 + $0xc0] sm:$0xff]  ;;  %5255 = vmatprep.subr.bf16.mxu1 %v5254_v12  ;;  %vm1795_vm6 = vcmask 785408   ;;  %s6386_s11 = smov 96   ;;  %s6387_s12 = smov 112  }
  0x6c   : > { %v350_v22 = vld [vmem:[#allocation7 + $0xc8] sm:$0xff]  ;;  %5257 = vmatpush3.bf16.msra.mxu1 %v5256_v17  ;;  %v5260_v23 = vpack.c.bf16 %v332_v20, %v331_v19  ;;  %v333_v25 = vld [vmem:[#allocation7 + $0x40] sm:$0xff]  ;;  %v351_v28 = vld [vmem:[#allocation7 + $0xd0] sm:$0xff]  ;;  %vm2725_vm7 = vcmask 916480   ;;  %p214_p7 = scmp.lt.s32.totalorder %s6427_s16, 1 }
  0x6d   : > { %5259 = vmatprep.subr.bf16.mxu1 %v5258_v18  ;;  %v5262_v24 = vpack.c.bf16 %v350_v22, %v349_v21  ;;  %v334_v26 = vld [vmem:[#allocation7 + $0x48] sm:$0xff]  ;;  %5253 = vmatpush3.bf16.msra.mxu0 %v5252_v16  ;;  %v352_v29 = vld [vmem:[#allocation7 + $0xd8] sm:$0xff]  ;;  %v335_v32 = vld [vmem:[#allocation7 + $0x50] sm:$0xff] }
  0x6e   : > { %v5264_v30 = vpack.c.bf16 %v334_v26, %v333_v25  ;;  %v5266_v31 = vpack.c.bf16 %v352_v29, %v351_v28  ;;  %v336_v33 = vld [vmem:[#allocation7 + $0x58] sm:$0xff]  ;;  %v353_v34 = vld [vmem:[#allocation7 + $0xe0] sm:$0xff]  ;;  %v354_v35 = vld [vmem:[#allocation7 + $0xe8] sm:$0xff]  ;;  %s6836_s16 = smov (!%p214_p7, %s6427_s16), 1 }
  0x6f   : > { %v5268_v36 = vpack.c.bf16 %v336_v33, %v335_v32  ;;  %v5270_v37 = vpack.c.bf16 %v354_v35, %v353_v34  ;;  %v337_v38 = vld [vmem:[#allocation7 + $0x60] sm:$0xff]  ;;  %v338_v39 = vld [vmem:[#allocation7 + $0x68] sm:$0xff]  ;;  %v355_v44 = vld [vmem:[#allocation7 + $0xf0] sm:$0xff]  ;;  %s3831_s15 = sshll.u32 %s6836_s16, 2 }
  0x70   : > { %5261 = vmatpush3.bf16.msra.mxu1 %v5260_v23  ;;  %v5272_v40 = vpack.c.bf16 %v338_v39, %v337_v38  ;;  %v356_v45 = vld [vmem:[#allocation7 + $0xf8] sm:$0xff]  ;;  %v339_v47 = vld [vmem:[#allocation7 + $0x70] sm:$0xff]  ;;  %v357_v50 = vld [vmem:[#allocation7 + $0x100] sm:$0xff]  ;;  %s217_s24 = scalar_lea.vmem %s6819_s3, %s3831_s15 }
  0x71   : > { %v234_v27 = vld [vmem:[#allocation2 + $0x9] ss:$2 sm:$0xff]  ;;  %5263 = vmatprep.subr.bf16.mxu1 %v5262_v24  ;;  %v232_v41 = vld [vmem:[#allocation2 + $0x8] ss:$2 sm:$0xff]  ;;  %v5274_v46 = vpack.c.bf16 %v356_v45, %v355_v44  ;;  %v340_v48 = vld [vmem:[#allocation7 + $0x78] sm:$0xff] }
  0x72   : > { %236 = vrot.lane.b32.xlu0 %v234_v27, %s6381_s17  ;;  %v5276_v49 = vpack.c.bf16 %v340_v48, %v339_v47  ;;  %v358_v51 = vld [vmem:[#allocation7 + $0x108] sm:$0xff]  ;;  %v341_v53 = vld [vmem:[#allocation7 + $0x80] sm:$0xff]  ;;  %v359_v56 = vld [vmem:[#allocation7 + $0x110] sm:$0xff] }
  0x73   : > { %v5278_v52 = vpack.c.bf16 %v358_v51, %v357_v50  ;;  %v342_v54 = vld [vmem:[#allocation7 + $0x88] sm:$0xff]  ;;  %v360_v57 = vld [vmem:[#allocation7 + $0x118] sm:$0xff]  ;;  %v343_v58 = vld [vmem:[#allocation7 + $0x90] sm:$0xff] }
  0x74   : > { %5265 = vmatpush3.bf16.msra.mxu1 %v5264_v30  ;;  %v5280_v55 = vpack.c.bf16 %v342_v54, %v341_v53  ;;  %v5282_v59 = vpack.c.bf16 %v360_v57, %v359_v56  ;;  %v344_v60 = vld [vmem:[#allocation7 + $0x98] sm:$0xff]  ;;  %v457_v62 = vld [vmem:[#allocation7 + $0x1a0] sm:$0xff]  ;;  %v458_v63 = vld [vmem:[#allocation7 + $0x1a8] sm:$0xff] }
  0x75   : > { %5267 = vmatprep.subr.bf16.mxu1 %v5266_v31  ;;  %v5284_v61 = vpack.c.bf16 %v344_v60, %v343_v58  ;;  %v5286_v2 = vpack.c.bf16 %v458_v63, %v457_v62  ;;  %v441_v3 = vld [vmem:[#allocation7 + $0x120] sm:$0xff]  ;;  %v442_v4 = vld [vmem:[#allocation7 + $0x128] sm:$0xff]  ;;  %v459_v6 = vld [vmem:[#allocation7 + $0x1b0] sm:$0xff] }
  0x76   : > { %v5288_v5 = vpack.c.bf16 %v442_v4, %v441_v3  ;;  %v460_v7 = vld [vmem:[#allocation7 + $0x1b8] sm:$0xff]  ;;  %v443_v9 = vld [vmem:[#allocation7 + $0x130] sm:$0xff]  ;;  %v461_v12 = vld [vmem:[#allocation7 + $0x1c0] sm:$0xff] }
  0x77   : > { %5287 = vmatprep.subr.bf16.mxu0 %v5286_v2  ;;  %v5290_v8 = vpack.c.bf16 %v460_v7, %v459_v6  ;;  %v444_v10 = vld [vmem:[#allocation7 + $0x138] sm:$0xff]  ;;  %v462_v13 = vld [vmem:[#allocation7 + $0x1c8] sm:$0xff]  ;;  %v445_v15 = vld [vmem:[#allocation7 + $0x140] sm:$0xff] }
  0x78   : > { %5269 = vmatpush3.bf16.msra.mxu1 %v5268_v36  ;;  %v5292_v11 = vpack.c.bf16 %v444_v10, %v443_v9  ;;  %v5294_v14 = vpack.c.bf16 %v462_v13, %v461_v12  ;;  %v446_v16 = vld [vmem:[#allocation7 + $0x148] sm:$0xff]  ;;  %v463_v18 = vld [vmem:[#allocation7 + $0x1d0] sm:$0xff]  ;;  %v464_v19 = vld [vmem:[#allocation7 + $0x1d8] sm:$0xff] }
  0x79   : > { %5271 = vmatprep.subr.bf16.mxu1 %v5270_v37  ;;  %v5296_v17 = vpack.c.bf16 %v446_v16, %v445_v15  ;;  %v5298_v20 = vpack.c.bf16 %v464_v19, %v463_v18  ;;  %v447_v21 = vld [vmem:[#allocation7 + $0x150] sm:$0xff]  ;;  %v448_v22 = vld [vmem:[#allocation7 + $0x158] sm:$0xff]  ;;  %v3832_v24 = vld [vmem:[#allocation9] ss:$0 sm:$0xff] }
  0x7a   : > { %v5300_v23 = vpack.c.bf16 %v448_v22, %v447_v21  ;;  %v473_v29 = vld [vmem:[#allocation7 + $0x220] sm:$0xff]  ;;  %v474_v30 = vld [vmem:[#allocation7 + $0x228] sm:$0xff]  ;;  %v475_v32 = vld [vmem:[#allocation7 + $0x230] sm:$0xff] }
  0x7b   : > { %v5319_v31 = vpack.c.bf16 %v474_v30, %v473_v29  ;;  %v476_v33 = vld [vmem:[#allocation7 + $0x238] sm:$0xff]  ;;  %v477_v37 = vld [vmem:[#allocation7 + $0x240] sm:$0xff]  ;;  %v478_v38 = vld [vmem:[#allocation7 + $0x248] sm:$0xff] }
  0x7c   : > { %5273 = vmatpush3.bf16.msra.mxu1 %v5272_v40  ;;  %v5322_v36 = vpack.c.bf16 %v476_v33, %v475_v32  ;;  %v5325_v39 = vpack.c.bf16 %v478_v38, %v477_v37  ;;  %v479_v40 = vld [vmem:[#allocation7 + $0x250] sm:$0xff]  ;;  %v466_v44 = vld [vmem:[#allocation7 + $0x1e8] sm:$0xff]  ;;  %v481_v45 = vld [vmem:[#allocation7 + $0x260] sm:$0xff] }
  0x7d   : > { %5275 = vmatprep.subr.bf16.mxu1 %v5274_v46  ;;  %v482_v47 = vld [vmem:[#allocation7 + $0x268] sm:$0xff]  ;;  %v449_v48 = vld [vmem:[#allocation7 + $0x160] sm:$0xff]  ;;  %v468_v53 = vld [vmem:[#allocation7 + $0x1f8] sm:$0xff] }
  0x7e   : > { %v5331_v50 = vpack.c.bf16 %v482_v47, %v481_v45  ;;  %v483_v54 = vld [vmem:[#allocation7 + $0x270] sm:$0xff]  ;;  %v484_v56 = vld [vmem:[#allocation7 + $0x278] sm:$0xff]  ;;  %v470_v62 = vld [vmem:[#allocation7 + $0x208] sm:$0xff] }
  0x7f   : > { %v451_v57 = vld [vmem:[#allocation7 + $0x170] sm:$0xff]  ;;  %v452_v58 = vld [vmem:[#allocation7 + $0x178] sm:$0xff]  ;;  %v485_v63 = vld [vmem:[#allocation7 + $0x280] sm:$0xff] }
  0x80   : > { %5277 = vmatpush3.bf16.msra.mxu1 %v5276_v49  ;;  %v450_v49 = vld [vmem:[#allocation7 + $0x168] sm:$0xff]  ;;  %v5308_v60 = vpack.c.bf16 %v452_v58, %v451_v57  ;;  %v453_v4 = vld [vmem:[#allocation7 + $0x180] sm:$0xff]  ;;  %v472_v9 = vld [vmem:[#allocation7 + $0x218] sm:$0xff] }
  0x81   : > { %5279 = vmatprep.subr.bf16.mxu1 %v5278_v52  ;;  %v5304_v51 = vpack.c.bf16 %v450_v49, %v449_v48  ;;  %v467_v52 = vld [vmem:[#allocation7 + $0x1f0] sm:$0xff]  ;;  %v486_v3 = vld [vmem:[#allocation7 + $0x288] sm:$0xff]  ;;  %v488_v12 = vld [vmem:[#allocation7 + $0x298] sm:$0xff] }
  0x82   : > { %v5337_v6 = vpack.c.bf16 %v486_v3, %v485_v63  ;;  %v487_v10 = vld [vmem:[#allocation7 + $0x290] sm:$0xff]  ;;  %v655_v19 = vld [vmem:[#allocation7 + $0x320] sm:$0xff]  ;;  %v672_v30 = vld [vmem:[#allocation7 + $0x3a8] sm:$0xff] }
  0x83   : > { %v455_v13 = vld [vmem:[#allocation7 + $0x190] sm:$0xff]  ;;  %v5340_v15 = vpack.c.bf16 %v488_v12, %v487_v10  ;;  %v671_v29 = vld [vmem:[#allocation7 + $0x3a0] sm:$0xff]  ;;  %v640_v32 = vld [vmem:[#allocation7 + $0x2a8] sm:$0xff] }
  0x84   : > { %5281 = vmatpush3.bf16.msra.mxu1 %v5280_v55  ;;  %v5306_v55 = vpack.c.bf16 %v468_v53, %v467_v52  ;;  %v929_v18 = vld [vmem:[#allocation2 + $0x8] ss:$2 sm:$0xff]  ;;  %v674_v38 = vld [vmem:[#allocation7 + $0x3b8] sm:$0xff]  ;;  %v659_v45 = vld [vmem:[#allocation7 + $0x340] sm:$0xff] }
  0x85   : > { %5283 = vmatprep.subr.bf16.mxu1 %v5282_v59  ;;  %v5334_v59 = vpack.c.bf16 %v484_v56, %v483_v54  ;;  %934 = vrot.lane.b32.xlu0 %v929_v18, %s6381_s17  ;;  %v932_v21 = vld [vmem:[#allocation2 + $0xa] ss:$2 sm:$0xff]  ;;  %v675_v49 = vld [vmem:[#allocation7 + $0x3c0] sm:$0xff] }
  0x86   : > { %v657_v33 = vld [vmem:[#allocation7 + $0x330] sm:$0xff]  ;;  %v643_v52 = vld [vmem:[#allocation7 + $0x2c0] sm:$0xff]  ;;  %v644_v53 = vld [vmem:[#allocation7 + $0x2c8] sm:$0xff] }
  0x87   : > { %v661_v56 = vld [vmem:[#allocation7 + $0x350] sm:$0xff]  ;;  %v662_v57 = vld [vmem:[#allocation7 + $0x358] sm:$0xff]  ;;  %v663_v3 = vld [vmem:[#allocation7 + $0x360] sm:$0xff] }
  0x88   : > { %5285 = vmatpush3.bf16.msra.mxu1 %v5284_v61  ;;  %v469_v61 = vld [vmem:[#allocation7 + $0x200] sm:$0xff]  ;;  %v677_v58 = vld [vmem:[#allocation7 + $0x3d0] sm:$0xff]  ;;  %v648_v10 = vld [vmem:[#allocation7 + $0x2e8] sm:$0xff] }
  0x89   : > { %5318 = vmatprep.subr.bf16.mxu1 %v6379_v1  ;;  %v5310_v2 = vpack.c.bf16 %v470_v62, %v469_v61  ;;  %v645_v61 = vld [vmem:[#allocation7 + $0x2d0] sm:$0xff]  ;;  %v646_v62 = vld [vmem:[#allocation7 + $0x2d8] sm:$0xff] }
  0x8a   : > { %v665_v12 = vld [vmem:[#allocation7 + $0x370] sm:$0xff]  ;;  %v650_v18 = vld [vmem:[#allocation7 + $0x2f8] sm:$0xff] }
  0xe4   : > { %v237_v42 = vpop.permute.xlu0 %236 }
  0xe5   : > { %v239_v43 = vsel %vm218_vm0, %v232_v41, %v237_v42  ;;  %v480_v41 = vld [vmem:[#allocation7 + $0x258] sm:$0xff] }
  0xe6   : > { %4745 = vmatmul.mubr.msk.f32.vlgmr.msra.gmra.mrb[0].mxu0 %vm249_vm2, %v239_v43  ;;  %v5328_v42 = vpack.c.bf16 %v480_v41, %v479_v40  ;;  %v465_v43 = vld [vmem:[#allocation7 + $0x1e0] sm:$0xff]  ;;  %v642_v40 = vld [vmem:[#allocation7 + $0x2b8] sm:$0xff] }
  0xe7   : > { %5289 = vmatpush3.bf16.msra.mxu0 %v5288_v5  ;;  %v5302_v46 = vpack.c.bf16 %v466_v44, %v465_v43  ;;  %v454_v5 = vld [vmem:[#allocation7 + $0x188] sm:$0xff] }
  0xe8   : > { %5291 = vmatprep.subr.bf16.mxu0 %v5290_v8  ;;  %v5312_v7 = vpack.c.bf16 %v454_v5, %v453_v4  ;;  %v471_v8 = vld [vmem:[#allocation7 + $0x210] sm:$0xff]  ;;  %v664_v4 = vld [vmem:[#allocation7 + $0x368] sm:$0xff] }
  0xe9   : > { %v5358_v5 = vpack.c.bf16 %v664_v4, %v663_v3 }
  0xeb   : > { %5293 = vmatpush3.bf16.msra.mxu0 %v5292_v11  ;;  %v5314_v11 = vpack.c.bf16 %v472_v9, %v471_v8  ;;  %v647_v8 = vld [vmem:[#allocation7 + $0x2e0] sm:$0xff] }
  0xec   : > { %5295 = vmatprep.subr.bf16.mxu0 %v5294_v14  ;;  %v456_v14 = vld [vmem:[#allocation7 + $0x198] sm:$0xff] }
  0xed   : > { %v5316_v16 = vpack.c.bf16 %v456_v14, %v455_v13  ;;  %v666_v13 = vld [vmem:[#allocation7 + $0x378] sm:$0xff]  ;;  %v681_v14 = vld [vmem:[#allocation7 + $0x3f0] sm:$0xff] }
  0xef   : > { %5297 = vmatpush3.bf16.msra.mxu0 %v5296_v17  ;;  %v930_v17 = vld [vmem:[#allocation2 + $0x9] ss:$2 sm:$0xff] }
  0xf0   : > { %5299 = vmatprep.subr.bf16.mxu0 %v5298_v20  ;;  %938 = vrot.lane.b32.xlu1 %v930_v17, %s6382_s18  ;;  %v656_v20 = vld [vmem:[#allocation7 + $0x328] sm:$0xff]  ;;  %v649_v17 = vld [vmem:[#allocation7 + $0x2f0] sm:$0xff] }
  0xf1   : > { %v5342_v22 = vpack.c.bf16 %v656_v20, %v655_v19  ;;  %v5364_v20 = vpack.c.bf16 %v650_v18, %v649_v17  ;;  %v841_v18 = vld [vmem:[#allocation7 + $0x460] sm:$0xff] }
  0xf3   : > { %5301 = vmatpush3.bf16.msra.mxu0 %v5300_v23 }
  0xf4   : > { %5303 = vmatprep.subr.bf16.mxu0 %v5302_v46  ;;  %942 = vrot.lane.b32.xlu1 %v932_v21, %s6383_s5  ;;  %v660_v46 = vld [vmem:[#allocation7 + $0x348] sm:$0xff]  ;;  %v667_v21 = vld [vmem:[#allocation7 + $0x380] sm:$0xff] }
  0xf7   : > { %5305 = vmatpush3.bf16.msra.mxu0 %v5304_v51  ;;  %v5350_v51 = vpack.c.bf16 %v660_v46, %v659_v45  ;;  %v935_v4 = vpop.permute.xlu0 %934 }
  0xf8   : > { %5307 = vmatprep.subr.bf16.mxu0 %v5306_v55  ;;  %v5352_v55 = vpack.c.bf16 %v644_v53, %v643_v52  ;;  %v951_v53 = vld [vmem:[#allocation7 + $0x4b0] sm:$0xff] }
  0xfb   : > { %5309 = vmatpush3.bf16.msra.mxu0 %v5308_v60  ;;  %v678_v60 = vld [vmem:[#allocation7 + $0x3d8] sm:$0xff] }
  0xfc   : > { %5311 = vmatprep.subr.bf16.mxu0 %v5310_v2  ;;  %v5384_v63 = vpack.c.bf16 %v678_v60, %v677_v58  ;;  %v5356_v2 = vpack.c.bf16 %v646_v62, %v645_v61  ;;  %v836_v60 = vld [vmem:[#allocation7 + $0x438] sm:$0xff]  ;;  %v953_v62 = vld [vmem:[#allocation7 + $0x4c0] sm:$0xff] }
  0xff   : > { %5313 = vmatpush3.bf16.msra.mxu0 %v5312_v7  ;;  %v680_v7 = vld [vmem:[#allocation7 + $0x3e8] sm:$0xff] }
 0x100   : > { %5315 = vmatprep.subr.bf16.mxu0 %v5314_v11  ;;  %v5360_v11 = vpack.c.bf16 %v648_v10, %v647_v8  ;;  %v956_v10 = vld [vmem:[#allocation7 + $0x4d8] sm:$0xff] }
 0x103   : > { %5317 = vmatpush3.bf16.msra.mxu0 %v5316_v16  ;;  %v682_v16 = vld [vmem:[#allocation7 + $0x3f8] sm:$0xff] }
 0x104   : > { %5343 = vmatprep.subr.bf16.mxu0 %v5342_v22  ;;  %v5390_v19 = vpack.c.bf16 %v682_v16, %v681_v14  ;;  %v668_v22 = vld [vmem:[#allocation7 + $0x388] sm:$0xff] }
 0x162   : > { %v939_v3 = vpop.permute.xlu1 %938 }
 0x1b9   : > { %v319_v25 = vpop.f32.mrb[0].mxu0 }
 0x1ba   : > { %v320_v26 = vadd.f32 %v3832_v24, %v319_v25  ;;  %v4746_v27 = vpop.f32.mrb[1].mxu0  ;;  %v3834_v24 = vld [vmem:[#allocation9 + $0x1] ss:$0 sm:$0xff] }
 0x1bc   : > { %v323_v28 = vmax.f32 %v320_v26, 0.0 }
 0x1be   : > { %324 = vst [vmem:[#allocation3 + $0x8] sm:$0xff] %v323_v28 }
 0x1c5   : > { %v328_v34 = vld [vmem:[#allocation3 + $0x9] ss:$2 sm:$0xf]  ;;  %v326_v35 = vld [vmem:[#allocation3 + $0x8] ss:$2 sm:$0xf] }
 0x1c6   : > { %430 = vmatprep.mubr.f32.mxu1 %v328_v34  ;;  %v658_v34 = vld [vmem:[#allocation7 + $0x338] sm:$0xff] }
 0x1c7   : > { %431 = vmatmul.mubr.f32.vlgmr.msra.gmra.mrb[0].mxu1 %v326_v35  ;;  %v5375_v35 = vpack.c.bf16 %v672_v30, %v671_v29  ;;  %v5346_v44 = vpack.c.bf16 %v658_v34, %v657_v33  ;;  %v669_v30 = vld [vmem:[#allocation7 + $0x390] sm:$0xff]  ;;  %v686_v34 = vld [vmem:[#allocation7 + $0x418] sm:$0xff] }
 0x1c8   : > { %5320 = vmatpush3.bf16.msra.mxu1 %v5319_v31  ;;  %4779 = vmatprep.mubr.msk.f32.mxu1 %vm6380_vm1, %v6378_v0  ;;  %v639_v31 = vld [vmem:[#allocation7 + $0x2a0] sm:$0xff] }
 0x1c9   : > { %5321 = vmatprep.subr.bf16.mxu1 %v6379_v1  ;;  %v5344_v37 = vpack.c.bf16 %v640_v32, %v639_v31  ;;  %v670_v31 = vld [vmem:[#allocation7 + $0x398] sm:$0xff]  ;;  %v685_v32 = vld [vmem:[#allocation7 + $0x410] sm:$0xff] }
 0x1ca   : > { %v5370_v33 = vpack.c.bf16 %v670_v31, %v669_v30  ;;  %v1076_v31 = vld [vmem:[#allocation7 + $0x5e0] sm:$0xff] }
 0x1cc   : > { %5323 = vmatpush3.bf16.msra.mxu1 %v5322_v36  ;;  %v673_v36 = vld [vmem:[#allocation7 + $0x3b0] sm:$0xff] }
 0x1cd   : > { %5324 = vmatprep.subr.bf16.mxu1 %v6379_v1  ;;  %v5378_v47 = vpack.c.bf16 %v674_v38, %v673_v36  ;;  %v654_v36 = vld [vmem:[#allocation7 + $0x318] sm:$0xff] }
 0x1d0   : > { %5326 = vmatpush3.bf16.msra.mxu1 %v5325_v39  ;;  %v641_v39 = vld [vmem:[#allocation7 + $0x2b0] sm:$0xff] }
 0x1d1   : > { %5327 = vmatprep.subr.bf16.mxu1 %v6379_v1  ;;  %v5348_v48 = vpack.c.bf16 %v642_v40, %v641_v39 }
 0x1d4   : > { %5329 = vmatpush3.bf16.msra.mxu1 %v5328_v42 }
 0x1d5   : > { %5330 = vmatprep.subr.bf16.mxu1 %v6379_v1 }
 0x1d8   : > { %5332 = vmatpush3.bf16.msra.mxu1 %v5331_v50  ;;  %v676_v50 = vld [vmem:[#allocation7 + $0x3c8] sm:$0xff] }
 0x1d9   : > { %5333 = vmatprep.subr.bf16.mxu1 %v6379_v1  ;;  %v5381_v54 = vpack.c.bf16 %v676_v50, %v675_v49  ;;  %v950_v49 = vld [vmem:[#allocation7 + $0x4a8] sm:$0xff]  ;;  %v833_v50 = vld [vmem:[#allocation7 + $0x420] sm:$0xff] }
 0x1dc   : > { %5335 = vmatpush3.bf16.msra.mxu1 %v5334_v59  ;;  %v5354_v59 = vpack.c.bf16 %v662_v57, %v661_v56 }
 0x1dd   : > { %5336 = vmatprep.subr.bf16.mxu1 %v6379_v1 }
 0x1e0   : > { %5338 = vmatpush3.bf16.msra.mxu1 %v5337_v6  ;;  %v679_v6 = vld [vmem:[#allocation7 + $0x3e0] sm:$0xff] }
 0x1e1   : > { %5339 = vmatprep.subr.bf16.mxu1 %v6379_v1  ;;  %v5387_v9 = vpack.c.bf16 %v680_v7, %v679_v6  ;;  %v837_v6 = vld [vmem:[#allocation7 + $0x440] sm:$0xff]  ;;  %v838_v7 = vld [vmem:[#allocation7 + $0x448] sm:$0xff] }
 0x1e4   : > { %5341 = vmatpush3.bf16.msra.mxu1 %v5340_v15  ;;  %v5362_v15 = vpack.c.bf16 %v666_v13, %v665_v12  ;;  %v5405_v12 = vpack.c.bf16 %v838_v7, %v837_v6  ;;  %v840_v13 = vld [vmem:[#allocation7 + $0x458] sm:$0xff]  ;;  %v1086_v6 = vld [vmem:[#allocation7 + $0x630] sm:$0xff] }
 0x1e5   : > { %5374 = vmatprep.subr.bf16.mxu1 %v6379_v1  ;;  %v1087_v7 = vld [vmem:[#allocation7 + $0x638] sm:$0xff] }
 0x29a   : > { %v3895_v23 = vpop.f32.mrb[0].mxu1 }
 0x29b   : > { %v3896_v25 = vpop.f32.mrb[1].mxu1 }
 0x29c   : > { %v3897_v26 = vadd.f32 %v3896_v25, %v3895_v23  ;;  %v683_v23 = vld [vmem:[#allocation7 + $0x400] sm:$0xff]  ;;  %v684_v25 = vld [vmem:[#allocation7 + $0x408] sm:$0xff] }
 0x29e   : > { %v433_v27 = vadd.f32 %v3897_v26, %v3834_v24  ;;  %v5366_v24 = vpack.c.bf16 %v668_v22, %v667_v21  ;;  %v651_v26 = vld [vmem:[#allocation7 + $0x300] sm:$0xff]  ;;  %v843_v22 = vld [vmem:[#allocation7 + $0x470] sm:$0xff] }
 0x2a0   : > { %v436_v28 = vmax.f32 %v433_v27, 0.0  ;;  %v652_v27 = vld [vmem:[#allocation7 + $0x308] sm:$0xff] }
 0x2a1   : > { %v5368_v29 = vpack.c.bf16 %v652_v27, %v651_v26  ;;  %v846_v26 = vld [vmem:[#allocation7 + $0x488] sm:$0xff] }
 0x2a2   : > { %437 = vst [vmem:[#allocation4 + $0x1] sm:$0xf] %v436_v28  ;;  %v5393_v28 = vpack.c.bf16 %v684_v25, %v683_v23  ;;  %v844_v23 = vld [vmem:[#allocation7 + $0x478] sm:$0xff]  ;;  %v845_v25 = vld [vmem:[#allocation7 + $0x480] sm:$0xff] }
 0x2a3   : > { %v5417_v27 = vpack.c.bf16 %v846_v26, %v845_v25 }
 0x2a9   : > { %v439_v41 = vld [vmem:[#allocation4 + $0x1] sm:$0xf] }
 0x2aa   : > { %v440_v42 = vld [vmem:[#allocation4 + $0x2] sm:$0xf]  ;;  %558 = vmatprep.mubr.f32.mxu0 %v439_v41 }
 0x2ab   : > { %v438_v43 = vld [vmem:[#allocation4] sm:$0xf]  ;;  %4780 = vmatmul.mubr.f32.vlgmr.msra.gmra.mrb[2].mxu1 %v440_v42  ;;  %v3835_v42 = vld [vmem:[#allocation9 + $0x2] ss:$0 sm:$0xff] }
 0x2ac   : > { %559 = vmatmul.mubr.f32.vlgmr.msra.gmra.mrb[2].mxu0 %v438_v43  ;;  %5376 = vmatpush3.bf16.msra.mxu1 %v5375_v35  ;;  %v653_v35 = vld [vmem:[#allocation7 + $0x310] sm:$0xff] }
 0x2ad   : > { %5345 = vmatpush3.bf16.msra.mxu0 %v5344_v37  ;;  %5377 = vmatprep.subr.bf16.mxu1 %v6379_v1  ;;  %v5396_v37 = vpack.c.bf16 %v686_v34, %v685_v32  ;;  %v5372_v38 = vpack.c.bf16 %v654_v36, %v653_v35  ;;  %v1077_v32 = vld [vmem:[#allocation7 + $0x5e8] sm:$0xff]  ;;  %v847_v34 = vld [vmem:[#allocation7 + $0x490] sm:$0xff]  ;;  %v848_v35 = vld [vmem:[#allocation7 + $0x498] sm:$0xff] }
 0x2ae   : > { %5347 = vmatprep.subr.bf16.mxu0 %v5346_v44  ;;  %4814 = vmatprep.mubr.msk.f32.mxu1 %vm6380_vm1, %v6378_v0  ;;  %v5420_v36 = vpack.c.bf16 %v848_v35, %v847_v34  ;;  %v1046_v35 = vld [vmem:[#allocation7 + $0x4f0] sm:$0xff] }
 0x2b0   : > { %5379 = vmatpush3.bf16.msra.mxu1 %v5378_v47 }
 0x2b1   : > { %5349 = vmatpush3.bf16.msra.mxu0 %v5348_v48  ;;  %5380 = vmatprep.subr.bf16.mxu1 %v6379_v1  ;;  %v949_v48 = vld [vmem:[#allocation7 + $0x4a0] sm:$0xff] }
 0x2b2   : > { %5351 = vmatprep.subr.bf16.mxu0 %v5350_v51  ;;  %v834_v51 = vld [vmem:[#allocation7 + $0x428] sm:$0xff]  ;;  %v5423_v52 = vpack.c.bf16 %v950_v49, %v949_v48 }
 0x2b3   : > { %v5399_v58 = vpack.c.bf16 %v834_v51, %v833_v50  ;;  %v1097_v48 = vld [vmem:[#allocation7 + $0x688] sm:$0xff]  ;;  %v1080_v50 = vld [vmem:[#allocation7 + $0x600] sm:$0xff] }
 0x2b4   : > { %5382 = vmatpush3.bf16.msra.mxu1 %v5381_v54  ;;  %v952_v54 = vld [vmem:[#allocation7 + $0x4b8] sm:$0xff]  ;;  %v1081_v51 = vld [vmem:[#allocation7 + $0x608] sm:$0xff] }
 0x2b5   : > { %5353 = vmatpush3.bf16.msra.mxu0 %v5352_v55  ;;  %5383 = vmatprep.subr.bf16.mxu1 %v6379_v1  ;;  %v5426_v61 = vpack.c.bf16 %v952_v54, %v951_v53  ;;  %v1098_v53 = vld [vmem:[#allocation7 + $0x690] sm:$0xff]  ;;  %v1099_v54 = vld [vmem:[#allocation7 + $0x698] sm:$0xff] }
 0x2b6   : > { %5355 = vmatprep.subr.bf16.mxu0 %v5354_v59  ;;  %v835_v59 = vld [vmem:[#allocation7 + $0x430] sm:$0xff] }
 0x2b8   : > { %5385 = vmatpush3.bf16.msra.mxu1 %v5384_v63  ;;  %v954_v63 = vld [vmem:[#allocation7 + $0x4c8] sm:$0xff] }
 0x2b9   : > { %5357 = vmatpush3.bf16.msra.mxu0 %v5356_v2  ;;  %5386 = vmatprep.subr.bf16.mxu1 %v6379_v1  ;;  %v5402_v2 = vpack.c.bf16 %v836_v60, %v835_v59  ;;  %v5429_v8 = vpack.c.bf16 %v954_v63, %v953_v62  ;;  %v1100_v59 = vld [vmem:[#allocation7 + $0x6a0] sm:$0xff]  ;;  %v1101_v60 = vld [vmem:[#allocation7 + $0x6a8] sm:$0xff] }
 0x2ba   : > { %5359 = vmatprep.subr.bf16.mxu0 %v5358_v5  ;;  %v928_v5 = vld [vmem:[#allocation2 + $0x7] ss:$2 sm:$0xff] }
 0x2bb   : > { %v1084_v62 = vld [vmem:[#allocation7 + $0x620] sm:$0xff]  ;;  %v1085_v63 = vld [vmem:[#allocation7 + $0x628] sm:$0xff] }
 0x2bc   : > { %5388 = vmatpush3.bf16.msra.mxu1 %v5387_v9  ;;  %v955_v9 = vld [vmem:[#allocation7 + $0x4d0] sm:$0xff] }
 0x2bd   : > { %5361 = vmatpush3.bf16.msra.mxu0 %v5360_v11  ;;  %5389 = vmatprep.subr.bf16.mxu1 %v6379_v1  ;;  %v945_v11 = vsel %vm218_vm0, %v928_v5, %v935_v4  ;;  %v5432_v14 = vpack.c.bf16 %v956_v10, %v955_v9  ;;  %v1103_v4 = vld [vmem:[#allocation7 + $0x6b8] sm:$0xff]  ;;  %v1104_v9 = vld [vmem:[#allocation7 + $0x6c0] sm:$0xff]  ;;  %v1105_v10 = vld [vmem:[#allocation7 + $0x6c8] sm:$0xff] }
 0x2be   : > { %5363 = vmatprep.subr.bf16.mxu0 %v5362_v15  ;;  %v943_v15 = vpop.permute.xlu1 %942  ;;  %v946_v16 = vsel %vm249_vm2, %v945_v11, %v939_v3  ;;  %v1102_v3 = vld [vmem:[#allocation7 + $0x6b0] sm:$0xff]  ;;  %v5490_v11 = vpack.c.bf16 %v1105_v10, %v1104_v9 }
 0x2bf   : > { %v5486_v5 = vpack.c.bf16 %v1103_v4, %v1102_v3  ;;  %v1054_v3 = vld [vmem:[#allocation7 + $0x530] sm:$0xff]  ;;  %v1055_v4 = vld [vmem:[#allocation7 + $0x538] sm:$0xff] }
 0x2c0   : > { %5391 = vmatpush3.bf16.msra.mxu1 %v5390_v19  ;;  %v842_v19 = vld [vmem:[#allocation7 + $0x468] sm:$0xff] }
 0x2c1   : > { %5365 = vmatpush3.bf16.msra.mxu0 %v5364_v20  ;;  %5392 = vmatprep.subr.bf16.mxu1 %v6379_v1  ;;  %v948_v20 = vsel %vm947_vm3, %v946_v16, %v943_v15  ;;  %v5411_v21 = vpack.c.bf16 %v842_v19, %v841_v18  ;;  %v1107_v15 = vld [vmem:[#allocation7 + $0x6d8] sm:$0xff] }
 0x2c2   : > { %5367 = vmatprep.subr.bf16.mxu0 %v5366_v24  ;;  %v5414_v24 = vpack.c.bf16 %v844_v23, %v843_v22  ;;  %v1091_v18 = vld [vmem:[#allocation7 + $0x658] sm:$0xff]  ;;  %v3836_v23 = vld [vmem:[#allocation9 + $0x3] ss:$0 sm:$0xff] }
 0x2c4   : > { %5394 = vmatpush3.bf16.msra.mxu1 %v5393_v28  ;;  %v1092_v28 = vld [vmem:[#allocation7 + $0x660] sm:$0xff] }
 0x2c5   : > { %5369 = vmatpush3.bf16.msra.mxu0 %v5368_v29  ;;  %5395 = vmatprep.subr.bf16.mxu1 %v6379_v1  ;;  %v1093_v29 = vld [vmem:[#allocation7 + $0x668] sm:$0xff] }
 0x2c6   : > { %5371 = vmatprep.subr.bf16.mxu0 %v5370_v33  ;;  %v5466_v30 = vpack.c.bf16 %v1093_v29, %v1092_v28  ;;  %v5468_v33 = vpack.c.bf16 %v1077_v32, %v1076_v31  ;;  %v1045_v28 = vld [vmem:[#allocation7 + $0x4e8] sm:$0xff]  ;;  %v1062_v29 = vld [vmem:[#allocation7 + $0x570] sm:$0xff] }
 0x2c8   : > { %5397 = vmatpush3.bf16.msra.mxu1 %v5396_v37  ;;  %v1094_v37 = vld [vmem:[#allocation7 + $0x670] sm:$0xff] }
 0x2c9   : > { %5373 = vmatpush3.bf16.msra.mxu0 %v5372_v38  ;;  %5422 = vmatprep.subr.bf16.mxu1 %v6379_v1  ;;  %v1095_v38 = vld [vmem:[#allocation7 + $0x678] sm:$0xff] }
 0x2ca   : > { %5398 = vmatprep.subr.bf16.mxu0 %v6379_v1 }
 0x37e   : > { %v630_v39 = vpop.f32.mrb[2].mxu1 }
 0x37f   : > { %v3930_v40 = vpop.f32.mrb[2].mxu0  ;;  %v4781_v41 = vpop.f32.mrb[3].mxu1 }
 0x380   : > { %v3931_v43 = vpop.f32.mrb[3].mxu0  ;;  %v1061_v41 = vld [vmem:[#allocation7 + $0x568] sm:$0xff] }
 0x381   : > { %v3932_v44 = vadd.f32 %v3931_v43, %v3930_v40  ;;  %v1060_v40 = vld [vmem:[#allocation7 + $0x560] sm:$0xff] }
 0x382   : > { %v5434_v43 = vpack.c.bf16 %v1061_v41, %v1060_v40  ;;  %v1048_v41 = vld [vmem:[#allocation7 + $0x500] sm:$0xff] }
 0x383   : > { %v561_v45 = vadd.f32 %v3932_v44, %v3835_v42  ;;  %v1078_v42 = vld [vmem:[#allocation7 + $0x5f0] sm:$0xff]  ;;  %v1079_v44 = vld [vmem:[#allocation7 + $0x5f8] sm:$0xff] }
 0x385   : > { %v6619_v46 = vadd.f32 %v630_v39, %v561_v45  ;;  %v5470_v39 = vpack.c.bf16 %v1095_v38, %v1094_v37  ;;  %v5472_v45 = vpack.c.bf16 %v1079_v44, %v1078_v42  ;;  %v1064_v37 = vld [vmem:[#allocation7 + $0x580] sm:$0xff]  ;;  %v1065_v38 = vld [vmem:[#allocation7 + $0x588] sm:$0xff]  ;;  %v1067_v44 = vld [vmem:[#allocation7 + $0x598] sm:$0xff] }
 0x386   : > { %v5442_v40 = vpack.c.bf16 %v1065_v38, %v1064_v37  ;;  %v1049_v42 = vld [vmem:[#allocation7 + $0x508] sm:$0xff]  ;;  %v1261_v37 = vld [vmem:[#allocation7 + $0x6f8] sm:$0xff] }
 0x387   : > { %v634_v47 = vmax.f32 %v6619_v46, 0.0 }
 0x389   : > { %635 = vst [vmem:[#allocation4 + $0x1] sm:$0xf] %v634_v47  ;;  %v1096_v47 = vld [vmem:[#allocation7 + $0x680] sm:$0xff] }
 0x38a   : > { %v5474_v49 = vpack.c.bf16 %v1097_v48, %v1096_v47  ;;  %v5444_v47 = vpack.c.bf16 %v1049_v42, %v1048_v41  ;;  %v1279_v41 = vld [vmem:[#allocation7 + $0x788] sm:$0xff]  ;;  %v1294_v42 = vld [vmem:[#allocation7 + $0x800] sm:$0xff] }
 0x390   : > { %v637_v55 = vld [vmem:[#allocation4 + $0x1] sm:$0xf] }
 0x391   : > { %v638_v56 = vld [vmem:[#allocation4 + $0x2] sm:$0xf]  ;;  %756 = vmatprep.mubr.f32.mxu0 %v637_v55  ;;  %v5478_v55 = vpack.c.bf16 %v1099_v54, %v1098_v53  ;;  %v1068_v54 = vld [vmem:[#allocation7 + $0x5a0] sm:$0xff] }
 0x392   : > { %v636_v57 = vld [vmem:[#allocation4] sm:$0xf]  ;;  %4815 = vmatmul.mubr.f32.vlgmr.msra.gmra.mrb[4].mxu1 %v638_v56  ;;  %v1082_v56 = vld [vmem:[#allocation7 + $0x610] sm:$0xff] }
 0x393   : > { %757 = vmatmul.mubr.f32.vlgmr.msra.gmra.mrb[4].mxu0 %v636_v57  ;;  %5424 = vmatpush3.bf16.msra.mxu1 %v5423_v52  ;;  %v5476_v52 = vpack.c.bf16 %v1081_v51, %v1080_v50  ;;  %v1083_v57 = vld [vmem:[#allocation7 + $0x618] sm:$0xff]  ;;  %v1050_v51 = vld [vmem:[#allocation7 + $0x510] sm:$0xff] }
 0x394   : > { %5425 = vmatprep.subr.bf16.mxu1 %v6379_v1  ;;  %4868 = vmatprep.mubr.msk.f32.mxu1 %vm6380_vm1, %v6378_v0 }
 0x395   : > { %5400 = vmatpush3.bf16.msra.mxu0 %v5399_v58  ;;  %4849 = vmatprep.mubr.msk.f32.mxu0 %vm6380_vm1, %v6378_v0  ;;  %v839_v0 = vld [vmem:[#allocation7 + $0x450] sm:$0xff]  ;;  %v5480_v58 = vpack.c.bf16 %v1083_v57, %v1082_v56 }
 0x396   : > { %5401 = vmatprep.subr.bf16.mxu0 %v6379_v1  ;;  %v5408_v17 = vpack.c.bf16 %v840_v13, %v839_v0  ;;  %v1089_v0 = vld [vmem:[#allocation7 + $0x648] sm:$0xff] }
 0x397   : > { %5427 = vmatpush3.bf16.msra.mxu1 %v5426_v61  ;;  %v5482_v61 = vpack.c.bf16 %v1101_v60, %v1100_v59  ;;  %v1052_v59 = vld [vmem:[#allocation7 + $0x520] sm:$0xff]  ;;  %v1053_v60 = vld [vmem:[#allocation7 + $0x528] sm:$0xff] }
 0x398   : > { %5428 = vmatprep.subr.bf16.mxu1 %v6379_v1 }
 0x399   : > { %5403 = vmatpush3.bf16.msra.mxu0 %v5402_v2  ;;  %v5484_v2 = vpack.c.bf16 %v1085_v63, %v1084_v62  ;;  %v1071_v62 = vld [vmem:[#allocation7 + $0x5b8] sm:$0xff]  ;;  %v5452_v63 = vpack.c.bf16 %v1053_v60, %v1052_v59  ;;  %v1282_v59 = vld [vmem:[#allocation7 + $0x7a0] sm:$0xff]  ;;  %v1283_v60 = vld [vmem:[#allocation7 + $0x7a8] sm:$0xff] }
 0x39a   : > { %5404 = vmatprep.subr.bf16.mxu0 %v6379_v1 }
 0x39b   : > { %5430 = vmatpush3.bf16.msra.mxu1 %v5429_v8  ;;  %v5488_v8 = vpack.c.bf16 %v1087_v7, %v1086_v6  ;;  %v1073_v6 = vld [vmem:[#allocation7 + $0x5c8] sm:$0xff]  ;;  %v5456_v7 = vpack.c.bf16 %v1055_v4, %v1054_v3 }
 0x39c   : > { %5431 = vmatprep.subr.bf16.mxu1 %v6379_v1  ;;  %v1267_v4 = vld [vmem:[#allocation7 + $0x728] sm:$0xff] }
 0x39d   : > { %5406 = vmatpush3.bf16.msra.mxu0 %v5405_v12  ;;  %v1088_v12 = vld [vmem:[#allocation7 + $0x640] sm:$0xff] }
 0x39e   : > { %5407 = vmatprep.subr.bf16.mxu0 %v6379_v1  ;;  %v5492_v13 = vpack.c.bf16 %v1089_v0, %v1088_v12  ;;  %v1057_v12 = vld [vmem:[#allocation7 + $0x548] sm:$0xff] }
 0x39f   : > { %5433 = vmatpush3.bf16.msra.mxu1 %v5432_v14  ;;  %v1106_v14 = vld [vmem:[#allocation7 + $0x6d0] sm:$0xff] }
 0x3a0   : > { %5467 = vmatprep.subr.bf16.mxu1 %v5466_v30  ;;  %v5494_v16 = vpack.c.bf16 %v1107_v15, %v1106_v14  ;;  %v1063_v30 = vld [vmem:[#allocation7 + $0x578] sm:$0xff]  ;;  %v6641_v15 = vld [vmem:[#allocation3] sm:$0xff] }
 0x3a1   : > { %5409 = vmatpush3.bf16.msra.mxu0 %v5408_v17  ;;  %v1090_v17 = vld [vmem:[#allocation7 + $0x650] sm:$0xff]  ;;  %v5438_v34 = vpack.c.bf16 %v1063_v30, %v1062_v29  ;;  %v1075_v14 = vld [vmem:[#allocation7 + $0x5d8] sm:$0xff] }
 0x3a2   : > { %4869 = vmatmul.mubr.msk.f32.vlgmr.msra.gmra.mrb[6].mxu1 %vm962_vm4, %v948_v20  ;;  %5410 = vmatprep.subr.bf16.mxu0 %v6379_v1  ;;  %v5496_v19 = vpack.c.bf16 %v1091_v18, %v1090_v17  ;;  %v1058_v18 = vld [vmem:[#allocation7 + $0x550] sm:$0xff] }
 0x3a3   : > { %5469 = vmatpush3.bf16.msra.mxu1 %v5468_v33 }
 0x3a4   : > { %5471 = vmatprep.subr.bf16.mxu1 %v5470_v39 }
 0x3a5   : > { %5412 = vmatpush3.bf16.msra.mxu0 %v5411_v21 }
 0x3a6   : > { %5413 = vmatprep.subr.bf16.mxu0 %v6379_v1 }
 0x3a7   : > { %5473 = vmatpush3.bf16.msra.mxu1 %v5472_v45  ;;  %v3838_v45 = vld [vmem:[#allocation9 + $0x8] ss:$0 sm:$0xff] }
 0x3a8   : > { %5475 = vmatprep.subr.bf16.mxu1 %v5474_v49 }
 0x3a9   : > { %5415 = vmatpush3.bf16.msra.mxu0 %v5414_v24 }
 0x3aa   : > { %5416 = vmatprep.subr.bf16.mxu0 %v6379_v1 }
 0x3ab   : > { %5477 = vmatpush3.bf16.msra.mxu1 %v5476_v52  ;;  %v1051_v52 = vld [vmem:[#allocation7 + $0x518] sm:$0xff] }
 0x3ac   : > { %5479 = vmatprep.subr.bf16.mxu1 %v5478_v55  ;;  %v1069_v55 = vld [vmem:[#allocation7 + $0x5a8] sm:$0xff]  ;;  %v5448_v57 = vpack.c.bf16 %v1051_v52, %v1050_v51  ;;  %v1281_v51 = vld [vmem:[#allocation7 + $0x798] sm:$0xff]  ;;  %v1296_v52 = vld [vmem:[#allocation7 + $0x810] sm:$0xff] }
 0x3ad   : > { %5418 = vmatpush3.bf16.msra.mxu0 %v5417_v27  ;;  %v1044_v27 = vld [vmem:[#allocation7 + $0x4e0] sm:$0xff] }
 0x3ae   : > { %5419 = vmatprep.subr.bf16.mxu0 %v6379_v1  ;;  %v5436_v32 = vpack.c.bf16 %v1045_v28, %v1044_v27  ;;  %v1258_v27 = vld [vmem:[#allocation7 + $0x6e0] sm:$0xff]  ;;  %v1259_v28 = vld [vmem:[#allocation7 + $0x6e8] sm:$0xff] }
 0x3af   : > { %5481 = vmatpush3.bf16.msra.mxu1 %v5480_v58  ;;  %v5450_v58 = vpack.c.bf16 %v1069_v55, %v1068_v54  ;;  %v5500_v30 = vpack.c.bf16 %v1259_v28, %v1258_v27  ;;  %v1305_v28 = vld [vmem:[#allocation7 + $0x858] sm:$0xff] }
 0x3b0   : > { %5483 = vmatprep.subr.bf16.mxu1 %v5482_v61  ;;  %v1070_v61 = vld [vmem:[#allocation7 + $0x5b0] sm:$0xff] }
 0x3b1   : > { %5421 = vmatpush3.bf16.msra.mxu0 %v5420_v36  ;;  %v1047_v36 = vld [vmem:[#allocation7 + $0x4f8] sm:$0xff] }
 0x3b2   : > { %5435 = vmatprep.subr.bf16.mxu0 %v5434_v43  ;;  %v5440_v39 = vpack.c.bf16 %v1047_v36, %v1046_v35  ;;  %v1066_v43 = vld [vmem:[#allocation7 + $0x590] sm:$0xff]  ;;  %v1293_v35 = vld [vmem:[#allocation7 + $0x7f8] sm:$0xff] }
 0x3b3   : > { %5485 = vmatpush3.bf16.msra.mxu1 %v5484_v2  ;;  %v5446_v49 = vpack.c.bf16 %v1067_v44, %v1066_v43  ;;  %v5454_v2 = vpack.c.bf16 %v1071_v62, %v1070_v61  ;;  %v1260_v36 = vld [vmem:[#allocation7 + $0x6f0] sm:$0xff]  ;;  %v1295_v44 = vld [vmem:[#allocation7 + $0x808] sm:$0xff]  ;;  %v5514_v61 = vpack.c.bf16 %v1283_v60, %v1282_v59  ;;  %v1298_v62 = vld [vmem:[#allocation7 + $0x820] sm:$0xff] }
 0x3b4   : > { %5487 = vmatprep.subr.bf16.mxu1 %v5486_v5  ;;  %v1072_v5 = vld [vmem:[#allocation7 + $0x5c0] sm:$0xff]  ;;  %v1475_v59 = vld [vmem:[#allocation7 + $0x8f8] sm:$0xff] }
 0x3b5   : > { %v5458_v10 = vpack.c.bf16 %v1073_v6, %v1072_v5  ;;  %v1284_v6 = vld [vmem:[#allocation7 + $0x7b0] sm:$0xff] }
 0x3b7   : > { %5489 = vmatpush3.bf16.msra.mxu1 %v5488_v8 }
 0x3b8   : > { %5491 = vmatprep.subr.bf16.mxu1 %v5490_v11  ;;  %v1056_v11 = vld [vmem:[#allocation7 + $0x540] sm:$0xff] }
 0x3bb   : > { %5493 = vmatpush3.bf16.msra.mxu1 %v5492_v13  ;;  %v1074_v13 = vld [vmem:[#allocation7 + $0x5d0] sm:$0xff] }
 0x3bc   : > { %5495 = vmatprep.subr.bf16.mxu1 %v5494_v16  ;;  %v5460_v16 = vpack.c.bf16 %v1057_v12, %v1056_v11  ;;  %v5462_v17 = vpack.c.bf16 %v1075_v14, %v1074_v13  ;;  %v1268_v11 = vld [vmem:[#allocation7 + $0x730] sm:$0xff]  ;;  %v1269_v12 = vld [vmem:[#allocation7 + $0x738] sm:$0xff]  ;;  %v1286_v14 = vld [vmem:[#allocation7 + $0x7c0] sm:$0xff] }
 0x3bd   : > { %v5520_v13 = vpack.c.bf16 %v1269_v12, %v1268_v11  ;;  %v1492_v12 = vld [vmem:[#allocation7 + $0x980] sm:$0xff] }
 0x3bf   : > { %5497 = vmatpush3.bf16.msra.mxu1 %v5496_v19  ;;  %v1059_v19 = vld [vmem:[#allocation7 + $0x558] sm:$0xff] }
 0x3c0   : > { %5530 = vmatprep.subr.bf16.mxu1 %v6379_v1 }
 0x465   : > { %v828_v20 = vpop.f32.mrb[4].mxu1 }
 0x466   : > { %v3982_v21 = vpop.f32.mrb[4].mxu0  ;;  %v4816_v22 = vpop.f32.mrb[5].mxu1 }
 0x467   : > { %v3983_v24 = vpop.f32.mrb[5].mxu0  ;;  %v1274_v22 = vld [vmem:[#allocation7 + $0x760] sm:$0xff] }
 0x468   : > { %v3984_v25 = vadd.f32 %v3983_v24, %v3982_v21  ;;  %v1290_v24 = vld [vmem:[#allocation7 + $0x7e0] sm:$0xff] }
 0x46a   : > { %v759_v26 = vadd.f32 %v3984_v25, %v3836_v23  ;;  %v1275_v23 = vld [vmem:[#allocation7 + $0x768] sm:$0xff] }
 0x46b   : > { %v5498_v25 = vpack.c.bf16 %v1275_v23, %v1274_v22 }
 0x46c   : > { %v829_v31 = vadd.f32 %v828_v20, %v759_v26  ;;  %v5464_v20 = vpack.c.bf16 %v1059_v19, %v1058_v18  ;;  %v1291_v26 = vld [vmem:[#allocation7 + $0x7e8] sm:$0xff] }
 0x46d   : > { %v5531_v29 = vpack.c.bf16 %v1291_v26, %v1290_v24  ;;  %v1303_v19 = vld [vmem:[#allocation7 + $0x848] sm:$0xff]  ;;  %v1288_v24 = vld [vmem:[#allocation7 + $0x7d0] sm:$0xff] }
 0x46e   : > { %v832_v33 = vmax.f32 %v829_v31, 0.0  ;;  %v1276_v31 = vld [vmem:[#allocation7 + $0x770] sm:$0xff] }
 0x46f   : > { %v1304_v26 = vld [vmem:[#allocation7 + $0x850] sm:$0xff] }
 0x470   : > { %4850 = vmatmul.mubr.f32.vlgmr.msra.gmra.mrb[6].mxu0 %v832_v33  ;;  %v1292_v33 = vld [vmem:[#allocation7 + $0x7f0] sm:$0xff] }
 0x471   : > { %5437 = vmatpush3.bf16.msra.mxu0 %v5436_v32  ;;  %v1277_v32 = vld [vmem:[#allocation7 + $0x778] sm:$0xff]  ;;  %v5534_v38 = vpack.c.bf16 %v1293_v35, %v1292_v33  ;;  %v1746_v33 = vld [vmem:[#allocation2 + $0x7] ss:$2 sm:$0xff] }
 0x472   : > { %5439 = vmatprep.subr.bf16.mxu0 %v5438_v34  ;;  %v5502_v34 = vpack.c.bf16 %v1277_v32, %v1276_v31  ;;  %v5552_v31 = vpack.c.bf16 %v1305_v28, %v1304_v26  ;;  %1753 = vrot.lane.b32.xlu0 %v1746_v33, %s6381_s17  ;;  %v1748_v35 = vld [vmem:[#allocation2 + $0x9] ss:$2 sm:$0xff]  ;;  %v1463_v26 = vld [vmem:[#allocation7 + $0x898] sm:$0xff]  ;;  %v1496_v28 = vld [vmem:[#allocation7 + $0x9a0] sm:$0xff] }
 0x475   : > { %5441 = vmatpush3.bf16.msra.mxu0 %v5440_v39  ;;  %v1032_v48 = vpop.f32.mrb[6].mxu1  ;;  %v5504_v39 = vpack.c.bf16 %v1261_v37, %v1260_v36  ;;  %v1749_v36 = vld [vmem:[#allocation2 + $0xa] ss:$2 sm:$0xff]  ;;  %v1472_v37 = vld [vmem:[#allocation7 + $0x8e0] sm:$0xff] }
 0x476   : > { %5443 = vmatprep.subr.bf16.mxu0 %v5442_v40  ;;  %v1033_v50 = vadd.f32 %v3838_v45, %v1032_v48  ;;  %v4870_v53 = vpop.f32.mrb[7].mxu1  ;;  %v1278_v40 = vld [vmem:[#allocation7 + $0x780] sm:$0xff]  ;;  %v5537_v45 = vpack.c.bf16 %v1295_v44, %v1294_v42  ;;  %v1263_v48 = vld [vmem:[#allocation7 + $0x708] sm:$0xff]  ;;  %1761 = vrot.lane.b32.xlu0 %v1748_v35, %s6383_s5 }
 0x477   : > { %v5506_v43 = vpack.c.bf16 %v1279_v41, %v1278_v40  ;;  %v1297_v53 = vld [vmem:[#allocation7 + $0x818] sm:$0xff]  ;;  %v1465_v35 = vld [vmem:[#allocation7 + $0x8a8] sm:$0xff] }
 0x478   : > { %v1036_v56 = vmax.f32 %v1033_v50, 0.0  ;;  %v5540_v55 = vpack.c.bf16 %v1297_v53, %v1296_v52  ;;  %v1751_v40 = vld [vmem:[#allocation2 + $0xb] ss:$2 sm:$0xff] }
 0x479   : > { %5445 = vmatpush3.bf16.msra.mxu0 %v5444_v47  ;;  %v1262_v47 = vld [vmem:[#allocation7 + $0x700] sm:$0xff] }
 0x47a   : > { %5447 = vmatprep.subr.bf16.mxu0 %v5446_v49  ;;  %1037 = vst [vmem:[#allocation3 + $0x8] sm:$0xff] %v1036_v56  ;;  %v1280_v49 = vld [vmem:[#allocation7 + $0x790] sm:$0xff]  ;;  %v5508_v50 = vpack.c.bf16 %v1263_v48, %v1262_v47  ;;  %1769 = vrot.lane.b32.xlu0 %v1751_v40, %s6385_s10  ;;  %v3840_v48 = vld [vmem:[#allocation9 + $0x9] ss:$0 sm:$0xff] }
 0x47b   : > { %v5510_v54 = vpack.c.bf16 %v1281_v51, %v1280_v49  ;;  %v1264_v56 = vld [vmem:[#allocation7 + $0x710] sm:$0xff] }
 0x47c   : > { %v1482_v40 = vld [vmem:[#allocation7 + $0x930] sm:$0xff] }
 0x47d   : > { %5449 = vmatpush3.bf16.msra.mxu0 %v5448_v57  ;;  %v1265_v57 = vld [vmem:[#allocation7 + $0x718] sm:$0xff] }
 0x47e   : > { %5451 = vmatprep.subr.bf16.mxu0 %v5450_v58  ;;  %v5512_v58 = vpack.c.bf16 %v1265_v57, %v1264_v56  ;;  %v1456_v56 = vld [vmem:[#allocation7 + $0x860] sm:$0xff]  ;;  %v1457_v57 = vld [vmem:[#allocation7 + $0x868] sm:$0xff] }
 0x481   : > { %5453 = vmatpush3.bf16.msra.mxu0 %v5452_v63  ;;  %v1043_v8 = vld [vmem:[#allocation3 + $0xa] ss:$2 sm:$0xf]  ;;  %v1041_v9 = vld [vmem:[#allocation3 + $0x9] ss:$2 sm:$0xf] }
 0x482   : > { %5455 = vmatprep.subr.bf16.mxu0 %v5454_v2  ;;  %1247 = vmatprep.mubr.f32.mxu1 %v1043_v8  ;;  %v1040_v0 = vld [vmem:[#allocation3 + $0x8] ss:$2 sm:$0xf]  ;;  %v1039_v21 = vld [vmem:[#allocation3 + $0x7] ss:$2 sm:$0xf] }
 0x483   : > { %1248 = vmatmul.mubr.f32.vlgmr.msra.gmra.mrb[8].mxu1 %v1041_v9  ;;  %1177 = vmatprep.mubr.f32.mxu0 %v1040_v0  ;;  %v1299_v63 = vld [vmem:[#allocation7 + $0x828] sm:$0xff]  ;;  %v1266_v2 = vld [vmem:[#allocation7 + $0x720] sm:$0xff]  ;;  %v1300_v8 = vld [vmem:[#allocation7 + $0x830] sm:$0xff] }
 0x484   : > { %4903 = vmatprep.mubr.msk.f32.mxu1 %vm6380_vm1, %v6641_v15  ;;  %5532 = vmatpush3.bf16.msra.mxu1 %v5531_v29  ;;  %v5543_v3 = vpack.c.bf16 %v1299_v63, %v1298_v62  ;;  %v5516_v5 = vpack.c.bf16 %v1267_v4, %v1266_v2  ;;  %v1272_v29 = vld [vmem:[#allocation7 + $0x750] sm:$0xff]  ;;  %v5556_v62 = vpack.c.bf16 %v1457_v57, %v1456_v56  ;;  %v1491_v63 = vld [vmem:[#allocation7 + $0x978] sm:$0xff] }
 0x485   : > { %5457 = vmatpush3.bf16.msra.mxu0 %v5456_v7  ;;  %5533 = vmatprep.subr.bf16.mxu1 %v6379_v1  ;;  %v1285_v7 = vld [vmem:[#allocation7 + $0x7b8] sm:$0xff]  ;;  %v1458_v2 = vld [vmem:[#allocation7 + $0x870] sm:$0xff] }
 0x486   : > { %5459 = vmatprep.subr.bf16.mxu0 %v5458_v10  ;;  %v5518_v9 = vpack.c.bf16 %v1285_v7, %v1284_v6  ;;  %v1301_v10 = vld [vmem:[#allocation7 + $0x838] sm:$0xff]  ;;  %v1502_v57 = vld [vmem:[#allocation7 + $0x9d0] sm:$0xff] }
 0x487   : > { %v5546_v0 = vpack.c.bf16 %v1301_v10, %v1300_v8  ;;  %v1476_v8 = vld [vmem:[#allocation7 + $0x900] sm:$0xff] }
 0x488   : > { %5535 = vmatpush3.bf16.msra.mxu1 %v5534_v38  ;;  %v1473_v38 = vld [vmem:[#allocation7 + $0x8e8] sm:$0xff] }
 0x489   : > { %5461 = vmatpush3.bf16.msra.mxu0 %v5460_v16  ;;  %5536 = vmatprep.subr.bf16.mxu1 %v6379_v1  ;;  %v1287_v16 = vld [vmem:[#allocation7 + $0x7c8] sm:$0xff] }
 0x48a   : > { %5463 = vmatprep.subr.bf16.mxu0 %v5462_v17  ;;  %v1302_v17 = vld [vmem:[#allocation7 + $0x840] sm:$0xff]  ;;  %v5522_v18 = vpack.c.bf16 %v1287_v16, %v1286_v14  ;;  %v1461_v16 = vld [vmem:[#allocation7 + $0x888] sm:$0xff] }
 0x48b   : > { %v5549_v22 = vpack.c.bf16 %v1303_v19, %v1302_v17  ;;  %v1460_v14 = vld [vmem:[#allocation7 + $0x880] sm:$0xff]  ;;  %v1494_v19 = vld [vmem:[#allocation7 + $0x990] sm:$0xff] }
 0x48c   : > { %5538 = vmatpush3.bf16.msra.mxu1 %v5537_v45 }
 0x48d   : > { %5465 = vmatpush3.bf16.msra.mxu0 %v5464_v20  ;;  %5539 = vmatprep.subr.bf16.mxu1 %v6379_v1  ;;  %v1270_v20 = vld [vmem:[#allocation7 + $0x740] sm:$0xff] }
 0x48e   : > { %5499 = vmatprep.subr.bf16.mxu0 %v5498_v25  ;;  %v1289_v25 = vld [vmem:[#allocation7 + $0x7d8] sm:$0xff] }
 0x48f   : > { %v5526_v27 = vpack.c.bf16 %v1289_v25, %v1288_v24  ;;  %v1462_v25 = vld [vmem:[#allocation7 + $0x890] sm:$0xff] }
 0x490   : > { %1178 = vmatmul.mubr.f32.vlgmr.msra.gmra.mrb[8].mxu0 %v1039_v21  ;;  %5541 = vmatpush3.bf16.msra.mxu1 %v5540_v55  ;;  %v1271_v21 = vld [vmem:[#allocation7 + $0x748] sm:$0xff] }
 0x491   : > { %5501 = vmatpush3.bf16.msra.mxu0 %v5500_v30  ;;  %5542 = vmatprep.subr.bf16.mxu1 %v6379_v1  ;;  %v5524_v23 = vpack.c.bf16 %v1271_v21, %v1270_v20  ;;  %v1273_v30 = vld [vmem:[#allocation7 + $0x758] sm:$0xff]  ;;  %v1489_v55 = vld [vmem:[#allocation7 + $0x968] sm:$0xff] }
 0x492   : > { %5503 = vmatprep.subr.bf16.mxu0 %v5502_v34  ;;  %v5528_v32 = vpack.c.bf16 %v1273_v30, %v1272_v29  ;;  %v1747_v34 = vld [vmem:[#allocation2 + $0x8] ss:$2 sm:$0xff]  ;;  %v1495_v20 = vld [vmem:[#allocation7 + $0x998] sm:$0xff] }
 0x493   : > { %1757 = vrot.lane.b32.xlu1 %v1747_v34, %s6382_s18  ;;  %v5596_v21 = vpack.c.bf16 %v1495_v20, %v1494_v19  ;;  %v1497_v29 = vld [vmem:[#allocation7 + $0x9a8] sm:$0xff]  ;;  %v1464_v34 = vld [vmem:[#allocation7 + $0x8a0] sm:$0xff]  ;;  %v1781_v19 = vld [vmem:[#allocation7 + $0xa78] sm:$0xff] }
 0x494   : > { %5544 = vmatpush3.bf16.msra.mxu1 %v5543_v3  ;;  %v1459_v3 = vld [vmem:[#allocation7 + $0x878] sm:$0xff]  ;;  %v5599_v30 = vpack.c.bf16 %v1497_v29, %v1496_v28  ;;  %v1783_v28 = vld [vmem:[#allocation7 + $0xa88] sm:$0xff] }
 0x495   : > { %5505 = vmatpush3.bf16.msra.mxu0 %v5504_v39  ;;  %5545 = vmatprep.subr.bf16.mxu1 %v6379_v1  ;;  %v5554_v39 = vpack.c.bf16 %v1473_v38, %v1472_v37  ;;  %v5560_v11 = vpack.c.bf16 %v1459_v3, %v1458_v2  ;;  %v1498_v37 = vld [vmem:[#allocation7 + $0x9b0] sm:$0xff]  ;;  %v1499_v38 = vld [vmem:[#allocation7 + $0x9b8] sm:$0xff] }
 0x496   : > { %5507 = vmatprep.subr.bf16.mxu0 %v5506_v43 }
 0x497   : > { %1765 = vrot.lane.b32.xlu1 %v1749_v36, %s6384_s6  ;;  %v5572_v36 = vpack.c.bf16 %v1465_v35, %v1464_v34  ;;  %v1785_v34 = vld [vmem:[#allocation7 + $0xa98] sm:$0xff] }
 0x498   : > { %5547 = vmatpush3.bf16.msra.mxu1 %v5546_v0  ;;  %v1493_v0 = vld [vmem:[#allocation7 + $0x988] sm:$0xff] }
 0x499   : > { %5509 = vmatpush3.bf16.msra.mxu0 %v5508_v50  ;;  %5548 = vmatprep.subr.bf16.mxu1 %v6379_v1  ;;  %v5593_v17 = vpack.c.bf16 %v1493_v0, %v1492_v12  ;;  %v1778_v0 = vld [vmem:[#allocation7 + $0xa60] sm:$0xff] }
 0x49a   : > { %5511 = vmatprep.subr.bf16.mxu0 %v5510_v54  ;;  %v1488_v54 = vld [vmem:[#allocation7 + $0x960] sm:$0xff] }
 0x49b   : > { %v5587_v60 = vpack.c.bf16 %v1489_v55, %v1488_v54  ;;  %v1468_v54 = vld [vmem:[#allocation7 + $0x8c0] sm:$0xff]  ;;  %v1469_v55 = vld [vmem:[#allocation7 + $0x8c8] sm:$0xff] }
 0x49c   : > { %5550 = vmatpush3.bf16.msra.mxu1 %v5549_v22  ;;  %v1478_v22 = vld [vmem:[#allocation7 + $0x910] sm:$0xff]  ;;  %v5580_v56 = vpack.c.bf16 %v1469_v55, %v1468_v54 }
 0x49d   : > { %5513 = vmatpush3.bf16.msra.mxu0 %v5512_v58  ;;  %5551 = vmatprep.subr.bf16.mxu1 %v6379_v1  ;;  %v1474_v58 = vld [vmem:[#allocation7 + $0x8f0] sm:$0xff] }
 0x49e   : > { %5515 = vmatprep.subr.bf16.mxu0 %v5514_v61  ;;  %v1490_v61 = vld [vmem:[#allocation7 + $0x970] sm:$0xff]  ;;  %v5558_v7 = vpack.c.bf16 %v1475_v59, %v1474_v58  ;;  %v1503_v58 = vld [vmem:[#allocation7 + $0x9d8] sm:$0xff] }
 0x49f   : > { %v5590_v10 = vpack.c.bf16 %v1491_v63, %v1490_v61  ;;  %v1486_v59 = vld [vmem:[#allocation7 + $0x950] sm:$0xff]  ;;  %v1487_v61 = vld [vmem:[#allocation7 + $0x958] sm:$0xff] }
 0x4a0   : > { %5553 = vmatpush3.bf16.msra.mxu1 %v5552_v31  ;;  %v1480_v31 = vld [vmem:[#allocation7 + $0x920] sm:$0xff]  ;;  %v1471_v63 = vld [vmem:[#allocation7 + $0x8d8] sm:$0xff]  ;;  %v5582_v2 = vpack.c.bf16 %v1487_v61, %v1486_v59 }
 0x4a1   : > { %5517 = vmatpush3.bf16.msra.mxu0 %v5516_v5  ;;  %5586 = vmatprep.subr.bf16.mxu1 %v6379_v1 }
 0x4a2   : > { %5519 = vmatprep.subr.bf16.mxu0 %v5518_v9  ;;  %v1477_v9 = vld [vmem:[#allocation7 + $0x908] sm:$0xff] }
 0x4a5   : > { %5521 = vmatpush3.bf16.msra.mxu0 %v5520_v13  ;;  %v5562_v13 = vpack.c.bf16 %v1477_v9, %v1476_v8 }
 0x4a6   : > { %5523 = vmatprep.subr.bf16.mxu0 %v5522_v18  ;;  %v5564_v18 = vpack.c.bf16 %v1461_v16, %v1460_v14  ;;  %v1650_v14 = vld [vmem:[#allocation7 + $0x9e0] sm:$0xff]  ;;  %v1651_v16 = vld [vmem:[#allocation7 + $0x9e8] sm:$0xff] }
 0x4a9   : > { %5525 = vmatpush3.bf16.msra.mxu0 %v5524_v23  ;;  %v1479_v23 = vld [vmem:[#allocation7 + $0x918] sm:$0xff] }
 0x4aa   : > { %5527 = vmatprep.subr.bf16.mxu0 %v5526_v27  ;;  %v5566_v24 = vpack.c.bf16 %v1479_v23, %v1478_v22  ;;  %v5568_v27 = vpack.c.bf16 %v1463_v26, %v1462_v25  ;;  %v5611_v23 = vpack.c.bf16 %v1651_v16, %v1650_v14  ;;  %v1653_v25 = vld [vmem:[#allocation7 + $0x9f8] sm:$0xff]  ;;  %v1929_v14 = vld [vmem:[#allocation7 + $0xc50] sm:$0xff] }
 0x4ab   : > { %v1930_v16 = vld [vmem:[#allocation7 + $0xc58] sm:$0xff] }
 0x4ad   : > { %5529 = vmatpush3.bf16.msra.mxu0 %v5528_v32  ;;  %v1481_v32 = vld [vmem:[#allocation7 + $0x928] sm:$0xff] }
 0x4ae   : > { %5555 = vmatprep.subr.bf16.mxu0 %v5554_v39  ;;  %v5570_v33 = vpack.c.bf16 %v1481_v32, %v1480_v31  ;;  %v5602_v39 = vpack.c.bf16 %v1499_v38, %v1498_v37  ;;  %v1655_v31 = vld [vmem:[#allocation7 + $0xa08] sm:$0xff]  ;;  %v1656_v38 = vld [vmem:[#allocation7 + $0xa10] sm:$0xff] }
 0x4e4   : > { %v1754_v35 = vpop.permute.xlu0 %1753 }
 0x543   : > { %v6658_v41 = vpop.f32.mrb[6].mxu0 }
 0x544   : > { %v4851_v42 = vpop.f32.mrb[7].mxu0 }
 0x545   : > { %v1483_v42 = vld [vmem:[#allocation7 + $0x938] sm:$0xff] }
 0x556   : > { %v4095_v43 = vpop.f32.mrb[8].mxu1 }
 0x557   : > { %v4096_v44 = vpop.f32.mrb[9].mxu1 }
 0x558   : > { %v4097_v45 = vadd.f32 %v4096_v44, %v4095_v43  ;;  %v5574_v43 = vpack.c.bf16 %v1483_v42, %v1482_v40  ;;  %v1466_v44 = vld [vmem:[#allocation7 + $0x8b0] sm:$0xff]  ;;  %v1758_v42 = vpop.permute.xlu1 %1757 }
 0x55c   : > { %v1766_v55 = vpop.permute.xlu1 %1765 }
 0x563   : > { %v4060_v47 = vpop.f32.mrb[8].mxu0 }
 0x564   : > { %v4061_v49 = vpop.f32.mrb[9].mxu0 }
 0x565   : > { %v4062_v50 = vadd.f32 %v4061_v49, %v4060_v47  ;;  %v1501_v49 = vld [vmem:[#allocation7 + $0x9c8] sm:$0xff] }
 0x567   : > { %v1180_v51 = vadd.f32 %v4062_v50, %v3840_v48  ;;  %v1500_v48 = vld [vmem:[#allocation7 + $0x9c0] sm:$0xff] }
 0x568   : > { %v5605_v50 = vpack.c.bf16 %v1501_v49, %v1500_v48  ;;  %v1762_v48 = vpop.permute.xlu0 %1761  ;;  %v1658_v49 = vld [vmem:[#allocation7 + $0xa20] sm:$0xff] }
 0x569   : > { %v1250_v52 = vadd.f32 %v4097_v45, %v1180_v51  ;;  %v1467_v45 = vld [vmem:[#allocation7 + $0x8b8] sm:$0xff]  ;;  %v1484_v51 = vld [vmem:[#allocation7 + $0x940] sm:$0xff] }
 0x56a   : > { %v5576_v47 = vpack.c.bf16 %v1467_v45, %v1466_v44  ;;  %v1787_v44 = vld [vmem:[#allocation7 + $0xaa8] sm:$0xff] }
 0x56b   : > { %v1253_v53 = vmax.f32 %v1250_v52, 0.0  ;;  %v1485_v52 = vld [vmem:[#allocation7 + $0x948] sm:$0xff] }
 0x56c   : > { %v1770_v61 = vpop.permute.xlu0 %1769 }
 0x56d   : > { %1254 = vst [vmem:[#allocation4 + $0x1] sm:$0xf] %v1253_v53  ;;  %v5578_v53 = vpack.c.bf16 %v1485_v52, %v1484_v51  ;;  %v1788_v52 = vld [vmem:[#allocation7 + $0xab0] sm:$0xff] }
 0x574   : > { %v1256_v4 = vld [vmem:[#allocation4 + $0x1] sm:$0xf] }
 0x575   : > { %v1257_v5 = vld [vmem:[#allocation4 + $0x2] sm:$0xf]  ;;  %1375 = vmatprep.mubr.f32.mxu0 %v1256_v4 }
 0x576   : > { %v1255_v6 = vld [vmem:[#allocation4] sm:$0xf]  ;;  %4904 = vmatmul.mubr.f32.vlgmr.msra.gmra.mrb[10].mxu1 %v1257_v5 }
 0x577   : > { %1376 = vmatmul.mubr.f32.vlgmr.msra.gmra.mrb[10].mxu0 %v1255_v6  ;;  %5588 = vmatpush3.bf16.msra.mxu1 %v5587_v60  ;;  %v5608_v60 = vpack.c.bf16 %v1503_v58, %v1502_v57  ;;  %v1660_v57 = vld [vmem:[#allocation7 + $0xa30] sm:$0xff]  ;;  %v1661_v58 = vld [vmem:[#allocation7 + $0xa38] sm:$0xff] }
 0x578   : > { %5557 = vmatpush3.bf16.msra.mxu0 %v5556_v62  ;;  %5589 = vmatprep.subr.bf16.mxu1 %v6379_v1  ;;  %v1470_v62 = vld [vmem:[#allocation7 + $0x8d0] sm:$0xff] }
 0x579   : > { %5559 = vmatprep.subr.bf16.mxu0 %v5558_v7  ;;  %4938 = vmatprep.mubr.msk.f32.mxu1 %vm6380_vm1, %v6641_v15  ;;  %v5584_v3 = vpack.c.bf16 %v1471_v63, %v1470_v62  ;;  %v3841_v7 = vld [vmem:[#allocation9 + $0xa] ss:$0 sm:$0xff]  ;;  %v5626_v62 = vpack.c.bf16 %v1661_v58, %v1660_v57  ;;  %v1925_v58 = vld [vmem:[#allocation7 + $0xc30] sm:$0xff] }
 0x57b   : > { %5591 = vmatpush3.bf16.msra.mxu1 %v5590_v10 }
 0x57c   : > { %5561 = vmatpush3.bf16.msra.mxu0 %v5560_v11  ;;  %5592 = vmatprep.subr.bf16.mxu1 %v6379_v1 }
 0x57d   : > { %5563 = vmatprep.subr.bf16.mxu0 %v5562_v13  ;;  %v1779_v13 = vld [vmem:[#allocation7 + $0xa68] sm:$0xff] }
 0x57f   : > { %5594 = vmatpush3.bf16.msra.mxu1 %v5593_v17  ;;  %v5635_v17 = vpack.c.bf16 %v1779_v13, %v1778_v0  ;;  %v1665_v0 = vld [vmem:[#allocation7 + $0xa58] sm:$0xff] }
 0x580   : > { %5565 = vmatpush3.bf16.msra.mxu0 %v5564_v18  ;;  %5595 = vmatprep.subr.bf16.mxu1 %v6379_v1  ;;  %v1780_v18 = vld [vmem:[#allocation7 + $0xa70] sm:$0xff] }
 0x581   : > { %5567 = vmatprep.subr.bf16.mxu0 %v5566_v24  ;;  %v1652_v24 = vld [vmem:[#allocation7 + $0x9f0] sm:$0xff]  ;;  %v5638_v26 = vpack.c.bf16 %v1781_v19, %v1780_v18  ;;  %v1895_v18 = vld [vmem:[#allocation7 + $0xb40] sm:$0xff]  ;;  %v1896_v19 = vld [vmem:[#allocation7 + $0xb48] sm:$0xff] }
 0x582   : > { %v5614_v29 = vpack.c.bf16 %v1653_v25, %v1652_v24  ;;  %v1931_v24 = vld [vmem:[#allocation7 + $0xc60] sm:$0xff]  ;;  %v1932_v25 = vld [vmem:[#allocation7 + $0xc68] sm:$0xff] }
 0x583   : > { %5597 = vmatpush3.bf16.msra.mxu1 %v5596_v21 }
 0x584   : > { %5598 = vmatprep.subr.bf16.mxu1 %v6379_v1  ;;  %5569 = vmatpush3.bf16.msra.mxu0 %v5568_v27  ;;  %v1782_v27 = vld [vmem:[#allocation7 + $0xa80] sm:$0xff] }
 0x585   : > { %5571 = vmatprep.subr.bf16.mxu0 %v5570_v33  ;;  %v5641_v32 = vpack.c.bf16 %v1783_v28, %v1782_v27  ;;  %v1784_v33 = vld [vmem:[#allocation7 + $0xa90] sm:$0xff]  ;;  %v1915_v27 = vld [vmem:[#allocation7 + $0xbe0] sm:$0xff]  ;;  %v1916_v28 = vld [vmem:[#allocation7 + $0xbe8] sm:$0xff] }
 0x587   : > { %5600 = vmatpush3.bf16.msra.mxu1 %v5599_v30  ;;  %v1654_v30 = vld [vmem:[#allocation7 + $0xa00] sm:$0xff] }
 0x588   : > { %5601 = vmatprep.subr.bf16.mxu1 %v6379_v1  ;;  %5573 = vmatpush3.bf16.msra.mxu0 %v5572_v36  ;;  %v1745_v36 = vld [vmem:[#allocation2 + $0x6] ss:$2 sm:$0xff]  ;;  %v5617_v37 = vpack.c.bf16 %v1655_v31, %v1654_v30  ;;  %v1934_v31 = vld [vmem:[#allocation7 + $0xc78] sm:$0xff] }
 0x589   : > { %5575 = vmatprep.subr.bf16.mxu0 %v5574_v43  ;;  %v1772_v40 = vsel %vm218_vm0, %v1745_v36, %v1754_v35  ;;  %v1786_v43 = vld [vmem:[#allocation7 + $0xaa0] sm:$0xff]  ;;  %v1933_v30 = vld [vmem:[#allocation7 + $0xc70] sm:$0xff] }
 0x58a   : > { %v5647_v51 = vpack.c.bf16 %v1787_v44, %v1786_v43  ;;  %v1935_v36 = vld [vmem:[#allocation7 + $0xc80] sm:$0xff]  ;;  %v1938_v43 = vld [vmem:[#allocation7 + $0xc98] sm:$0xff] }
 0x58b   : > { %5603 = vmatpush3.bf16.msra.mxu1 %v5602_v39  ;;  %v1657_v39 = vld [vmem:[#allocation7 + $0xa18] sm:$0xff] }
 0x58c   : > { %5604 = vmatprep.subr.bf16.mxu1 %v6379_v1  ;;  %5577 = vmatpush3.bf16.msra.mxu0 %v5576_v47  ;;  %v5620_v45 = vpack.c.bf16 %v1657_v39, %v1656_v38  ;;  %v1773_v47 = vsel %vm249_vm2, %v1772_v40, %v1758_v42  ;;  %v1919_v39 = vld [vmem:[#allocation7 + $0xc00] sm:$0xff]  ;;  %v1937_v42 = vld [vmem:[#allocation7 + $0xc90] sm:$0xff] }
 0x58d   : > { %5579 = vmatprep.subr.bf16.mxu0 %v5578_v53  ;;  %v1789_v53 = vld [vmem:[#allocation7 + $0xab8] sm:$0xff]  ;;  %v1774_v54 = vsel %vm947_vm3, %v1773_v47, %v1762_v48  ;;  %v5704_v44 = vpack.c.bf16 %v1938_v43, %v1937_v42  ;;  %v1889_v43 = vld [vmem:[#allocation7 + $0xb10] sm:$0xff] }
 0x58e   : > { %v5650_v59 = vpack.c.bf16 %v1789_v53, %v1788_v52  ;;  %v1922_v47 = vld [vmem:[#allocation7 + $0xc18] sm:$0xff]  ;;  %v1923_v52 = vld [vmem:[#allocation7 + $0xc20] sm:$0xff]  ;;  %v1924_v53 = vld [vmem:[#allocation7 + $0xc28] sm:$0xff] }
 0x58f   : > { %5606 = vmatpush3.bf16.msra.mxu1 %v5605_v50  ;;  %v1659_v50 = vld [vmem:[#allocation7 + $0xa28] sm:$0xff] }
 0x590   : > { %5607 = vmatprep.subr.bf16.mxu1 %v6379_v1  ;;  %5581 = vmatpush3.bf16.msra.mxu0 %v5580_v56  ;;  %v5623_v56 = vpack.c.bf16 %v1659_v50, %v1658_v49  ;;  %v1939_v49 = vld [vmem:[#allocation7 + $0xca0] sm:$0xff]  ;;  %v1940_v50 = vld [vmem:[#allocation7 + $0xca8] sm:$0xff] }
 0x591   : > { %5583 = vmatprep.subr.bf16.mxu0 %v5582_v2  ;;  %v1662_v2 = vld [vmem:[#allocation7 + $0xa40] sm:$0xff] }
 0x593   : > { %5609 = vmatpush3.bf16.msra.mxu1 %v5608_v60  ;;  %v1775_v60 = vsel %vm962_vm4, %v1774_v54, %v1766_v55  ;;  %v5710_v54 = vpack.c.bf16 %v1924_v53, %v1923_v52  ;;  %v1941_v55 = vld [vmem:[#allocation7 + $0xcb0] sm:$0xff]  ;;  %v1892_v52 = vld [vmem:[#allocation7 + $0xb28] sm:$0xff] }
 0x594   : > { %5634 = vmatprep.subr.bf16.mxu1 %v6379_v1  ;;  %5585 = vmatpush3.bf16.msra.mxu0 %v5584_v3  ;;  %v1777_v63 = vsel %vm1776_vm5, %v1775_v60, %v1770_v61  ;;  %v1663_v3 = vld [vmem:[#allocation7 + $0xa48] sm:$0xff]  ;;  %v1909_v53 = vld [vmem:[#allocation7 + $0xbb0] sm:$0xff] }
 0x595   : > { %5610 = vmatprep.subr.bf16.mxu0 %v6379_v1 }
 0x649   : > { %v1447_v4 = vpop.f32.mrb[10].mxu1 }
 0x64a   : > { %v4130_v5 = vpop.f32.mrb[10].mxu0  ;;  %v4905_v6 = vpop.f32.mrb[11].mxu1 }
 0x64b   : > { %v4131_v8 = vpop.f32.mrb[11].mxu0  ;;  %v1928_v6 = vld [vmem:[#allocation7 + $0xc48] sm:$0xff] }
 0x64c   : > { %v4132_v9 = vadd.f32 %v4131_v8, %v4130_v5  ;;  %v1927_v5 = vld [vmem:[#allocation7 + $0xc40] sm:$0xff] }
 0x64d   : > { %v1911_v8 = vld [vmem:[#allocation7 + $0xbc0] sm:$0xff] }
 0x64e   : > { %v1378_v10 = vadd.f32 %v4132_v9, %v3841_v7  ;;  %v5684_v7 = vpack.c.bf16 %v1928_v6, %v1927_v5  ;;  %v1912_v9 = vld [vmem:[#allocation7 + $0xbc8] sm:$0xff]  ;;  %v1879_v6 = vld [vmem:[#allocation7 + $0xac0] sm:$0xff] }
 0x650   : > { %v6671_v11 = vadd.f32 %v1447_v4, %v1378_v10  ;;  %v5629_v4 = vpack.c.bf16 %v1663_v3, %v1662_v2  ;;  %v5686_v10 = vpack.c.bf16 %v1912_v9, %v1911_v8  ;;  %v3842_v2 = vld [vmem:[#allocation9 + $0xb] ss:$0 sm:$0xff]  ;;  %v1897_v8 = vld [vmem:[#allocation7 + $0xb50] sm:$0xff]  ;;  %v1898_v9 = vld [vmem:[#allocation7 + $0xb58] sm:$0xff] }
 0x652   : > { %v1451_v12 = vmax.f32 %v6671_v11, 0.0 }
 0x654   : > { %1452 = vst [vmem:[#allocation4 + $0x1] sm:$0xf] %v1451_v12  ;;  %v1664_v12 = vld [vmem:[#allocation7 + $0xa50] sm:$0xff] }
 0x655   : > { %v5632_v13 = vpack.c.bf16 %v1665_v0, %v1664_v12 }
 0x65b   : > { %v1454_v20 = vld [vmem:[#allocation4 + $0x1] sm:$0xf] }
 0x65c   : > { %v1455_v21 = vld [vmem:[#allocation4 + $0x2] sm:$0xf]  ;;  %1573 = vmatprep.mubr.f32.mxu0 %v1454_v20  ;;  %v1913_v20 = vld [vmem:[#allocation7 + $0xbd0] sm:$0xff] }
 0x65d   : > { %v1453_v22 = vld [vmem:[#allocation4] sm:$0xf]  ;;  %4939 = vmatmul.mubr.f32.vlgmr.msra.gmra.mrb[12].mxu1 %v1455_v21  ;;  %v5652_v21 = vpack.c.bf16 %v1896_v19, %v1895_v18  ;;  %v1900_v18 = vld [vmem:[#allocation7 + $0xb68] sm:$0xff] }
 0x65e   : > { %5636 = vmatpush3.bf16.msra.mxu1 %v5635_v17  ;;  %1574 = vmatmul.mubr.f32.vlgmr.msra.gmra.mrb[12].mxu0 %v1453_v22  ;;  %v5688_v17 = vpack.c.bf16 %v1930_v16, %v1929_v14  ;;  %v1914_v22 = vld [vmem:[#allocation7 + $0xbd8] sm:$0xff]  ;;  %v1881_v14 = vld [vmem:[#allocation7 + $0xad0] sm:$0xff] }
 0x65f   : > { %5637 = vmatprep.subr.bf16.mxu1 %v6379_v1  ;;  %5000 = vmatprep.mubr.msk.f32.mxu1 %vm6380_vm1, %v6641_v15  ;;  %v1882_v16 = vld [vmem:[#allocation7 + $0xad8] sm:$0xff] }
 0x660   : > { %5612 = vmatpush3.bf16.msra.mxu0 %v5611_v23  ;;  %4973 = vmatprep.mubr.msk.f32.mxu0 %vm6380_vm1, %v6641_v15  ;;  %v5644_v15 = vpack.c.bf16 %v1785_v34, %v1784_v33  ;;  %v5690_v23 = vpack.c.bf16 %v1914_v22, %v1913_v20  ;;  %v1917_v33 = vld [vmem:[#allocation7 + $0xbf0] sm:$0xff]  ;;  %v1918_v34 = vld [vmem:[#allocation7 + $0xbf8] sm:$0xff]  ;;  %v5658_v19 = vpack.c.bf16 %v1882_v16, %v1881_v14  ;;  %v1884_v22 = vld [vmem:[#allocation7 + $0xae8] sm:$0xff] }
 0x661   : > { %5613 = vmatprep.subr.bf16.mxu0 %v6379_v1  ;;  %v5698_v35 = vpack.c.bf16 %v1918_v34, %v1917_v33  ;;  %v1887_v33 = vld [vmem:[#allocation7 + $0xb00] sm:$0xff]  ;;  %v1888_v34 = vld [vmem:[#allocation7 + $0xb08] sm:$0xff] }
 0x662   : > { %5639 = vmatpush3.bf16.msra.mxu1 %v5638_v26  ;;  %v5692_v26 = vpack.c.bf16 %v1932_v25, %v1931_v24  ;;  %v1902_v24 = vld [vmem:[#allocation7 + $0xb78] sm:$0xff]  ;;  %v1964_v14 = vld [vmem:[#allocation7 + $0xd68] sm:$0xff] }
 0x663   : > { %5640 = vmatprep.subr.bf16.mxu1 %v6379_v1 }
 0x664   : > { %5615 = vmatpush3.bf16.msra.mxu0 %v5614_v29  ;;  %v5694_v29 = vpack.c.bf16 %v1916_v28, %v1915_v27  ;;  %v1885_v27 = vld [vmem:[#allocation7 + $0xaf0] sm:$0xff]  ;;  %v1886_v28 = vld [vmem:[#allocation7 + $0xaf8] sm:$0xff] }
 0x665   : > { %5616 = vmatprep.subr.bf16.mxu0 %v6379_v1 }
 0x666   : > { %5642 = vmatpush3.bf16.msra.mxu1 %v5641_v32  ;;  %v5696_v32 = vpack.c.bf16 %v1934_v31, %v1933_v30  ;;  %v1904_v30 = vld [vmem:[#allocation7 + $0xb88] sm:$0xff]  ;;  %v5666_v31 = vpack.c.bf16 %v1886_v28, %v1885_v27  ;;  %v1967_v27 = vld [vmem:[#allocation7 + $0xd80] sm:$0xff] }
 0x667   : > { %5643 = vmatprep.subr.bf16.mxu1 %v6379_v1  ;;  %v1968_v28 = vld [vmem:[#allocation7 + $0xd88] sm:$0xff] }
 0x668   : > { %5618 = vmatpush3.bf16.msra.mxu0 %v5617_v37  ;;  %v1936_v37 = vld [vmem:[#allocation7 + $0xc88] sm:$0xff] }
 0x669   : > { %5619 = vmatprep.subr.bf16.mxu0 %v6379_v1  ;;  %v5700_v38 = vpack.c.bf16 %v1936_v37, %v1935_v36  ;;  %v1905_v36 = vld [vmem:[#allocation7 + $0xb90] sm:$0xff]  ;;  %v1906_v37 = vld [vmem:[#allocation7 + $0xb98] sm:$0xff] }
 0x66a   : > { %5645 = vmatpush3.bf16.msra.mxu1 %v5644_v15  ;;  %v1920_v15 = vld [vmem:[#allocation7 + $0xc08] sm:$0xff]  ;;  %v5672_v42 = vpack.c.bf16 %v1906_v37, %v1905_v36  ;;  %v1953_v37 = vld [vmem:[#allocation7 + $0xd10] sm:$0xff] }
 0x66b   : > { %5646 = vmatprep.subr.bf16.mxu1 %v6379_v1  ;;  %v5702_v40 = vpack.c.bf16 %v1920_v15, %v1919_v39  ;;  %v5670_v39 = vpack.c.bf16 %v1888_v34, %v1887_v33  ;;  %v1969_v33 = vld [vmem:[#allocation7 + $0xd90] sm:$0xff]  ;;  %v1970_v34 = vld [vmem:[#allocation7 + $0xd98] sm:$0xff] }
 0x66c   : > { %5621 = vmatpush3.bf16.msra.mxu0 %v5620_v45  ;;  %v1921_v45 = vld [vmem:[#allocation7 + $0xc10] sm:$0xff]  ;;  %v5736_v36 = vpack.c.bf16 %v1970_v34, %v1969_v33  ;;  %v2236_v34 = vld [vmem:[#allocation7 + $0xf08] sm:$0xff] }
 0x66d   : > { %5622 = vmatprep.subr.bf16.mxu0 %v6379_v1  ;;  %v5706_v48 = vpack.c.bf16 %v1922_v47, %v1921_v45  ;;  %v1907_v45 = vld [vmem:[#allocation7 + $0xba0] sm:$0xff]  ;;  %v1908_v47 = vld [vmem:[#allocation7 + $0xba8] sm:$0xff] }
 0x66e   : > { %5648 = vmatpush3.bf16.msra.mxu1 %v5647_v51  ;;  %v5708_v51 = vpack.c.bf16 %v1940_v50, %v1939_v49  ;;  %v5676_v50 = vpack.c.bf16 %v1908_v47, %v1907_v45  ;;  %v1973_v45 = vld [vmem:[#allocation7 + $0xdb0] sm:$0xff]  ;;  %v1974_v47 = vld [vmem:[#allocation7 + $0xdb8] sm:$0xff] }
 0x66f   : > { %5649 = vmatprep.subr.bf16.mxu1 %v6379_v1 }
 0x670   : > { %5624 = vmatpush3.bf16.msra.mxu0 %v5623_v56  ;;  %v1942_v56 = vld [vmem:[#allocation7 + $0xcb8] sm:$0xff] }
 0x671   : > { %5625 = vmatprep.subr.bf16.mxu0 %v6379_v1  ;;  %v5712_v57 = vpack.c.bf16 %v1942_v56, %v1941_v55 }
 0x672   : > { %5651 = vmatpush3.bf16.msra.mxu1 %v5650_v59  ;;  %v1926_v59 = vld [vmem:[#allocation7 + $0xc38] sm:$0xff] }
 0x673   : > { %5685 = vmatprep.subr.bf16.mxu1 %v5684_v7  ;;  %v5714_v60 = vpack.c.bf16 %v1926_v59, %v1925_v58  ;;  %v1880_v7 = vld [vmem:[#allocation7 + $0xac8] sm:$0xff]  ;;  %v1894_v58 = vld [vmem:[#allocation7 + $0xb38] sm:$0xff]  ;;  %v1959_v59 = vld [vmem:[#allocation7 + $0xd40] sm:$0xff] }
 0x674   : > { %5627 = vmatpush3.bf16.msra.mxu0 %v5626_v62  ;;  %v5654_v12 = vpack.c.bf16 %v1880_v7, %v1879_v6  ;;  %v1961_v6 = vld [vmem:[#allocation7 + $0xd50] sm:$0xff]  ;;  %v1962_v7 = vld [vmem:[#allocation7 + $0xd58] sm:$0xff] }
 0x675   : > { %5001 = vmatmul.mubr.msk.f32.vlgmr.msra.gmra.mrb[14].mxu1 %vm1795_vm6, %v1777_v63  ;;  %5628 = vmatprep.subr.bf16.mxu0 %v6379_v1 }
 0x676   : > { %5687 = vmatpush3.bf16.msra.mxu1 %v5686_v10 }
 0x677   : > { %5689 = vmatprep.subr.bf16.mxu1 %v5688_v17  ;;  %v1899_v17 = vld [vmem:[#allocation7 + $0xb60] sm:$0xff] }
 0x678   : > { %5630 = vmatpush3.bf16.msra.mxu0 %v5629_v4  ;;  %v5660_v20 = vpack.c.bf16 %v1900_v18, %v1899_v17 }
 0x679   : > { %5631 = vmatprep.subr.bf16.mxu0 %v6379_v1 }
 0x67a   : > { %5691 = vmatpush3.bf16.msra.mxu1 %v5690_v23  ;;  %v1901_v23 = vld [vmem:[#allocation7 + $0xb70] sm:$0xff] }
 0x67b   : > { %5693 = vmatprep.subr.bf16.mxu1 %v5692_v26  ;;  %v5664_v26 = vpack.c.bf16 %v1902_v24, %v1901_v23 }
 0x67c   : > { %5633 = vmatpush3.bf16.msra.mxu0 %v5632_v13  ;;  %v5656_v13 = vpack.c.bf16 %v1898_v9, %v1897_v8  ;;  %v5720_v9 = vpack.c.bf16 %v1962_v7, %v1961_v6  ;;  %v2230_v6 = vld [vmem:[#allocation7 + $0xed8] sm:$0xff]  ;;  %v2197_v7 = vld [vmem:[#allocation7 + $0xdd0] sm:$0xff] }
 0x67d   : > { %5653 = vmatprep.subr.bf16.mxu0 %v5652_v21  ;;  %v1883_v21 = vld [vmem:[#allocation7 + $0xae0] sm:$0xff] }
 0x67e   : > { %5695 = vmatpush3.bf16.msra.mxu1 %v5694_v29  ;;  %v5662_v25 = vpack.c.bf16 %v1884_v22, %v1883_v21  ;;  %v1903_v29 = vld [vmem:[#allocation7 + $0xb80] sm:$0xff]  ;;  %v1965_v21 = vld [vmem:[#allocation7 + $0xd70] sm:$0xff]  ;;  %v1966_v22 = vld [vmem:[#allocation7 + $0xd78] sm:$0xff] }
 0x67f   : > { %5697 = vmatprep.subr.bf16.mxu1 %v5696_v32  ;;  %v5668_v32 = vpack.c.bf16 %v1904_v30, %v1903_v29  ;;  %v5728_v24 = vpack.c.bf16 %v1966_v22, %v1965_v21  ;;  %v5732_v30 = vpack.c.bf16 %v1968_v28, %v1967_v27  ;;  %v2202_v27 = vld [vmem:[#allocation7 + $0xdf8] sm:$0xff] }
 0x682   : > { %5699 = vmatpush3.bf16.msra.mxu1 %v5698_v35  ;;  %v3844_v35 = vld [vmem:[#allocation9 + $0x10] ss:$0 sm:$0xff] }
 0x683   : > { %5701 = vmatprep.subr.bf16.mxu1 %v5700_v38 }
 0x686   : > { %5703 = vmatpush3.bf16.msra.mxu1 %v5702_v40 }
 0x687   : > { %5705 = vmatprep.subr.bf16.mxu1 %v5704_v44  ;;  %v1890_v44 = vld [vmem:[#allocation7 + $0xb18] sm:$0xff] }
 0x688   : > { %v5674_v49 = vpack.c.bf16 %v1890_v44, %v1889_v43  ;;  %v1955_v43 = vld [vmem:[#allocation7 + $0xd20] sm:$0xff]  ;;  %v1956_v44 = vld [vmem:[#allocation7 + $0xd28] sm:$0xff] }
 0x68a   : > { %5707 = vmatpush3.bf16.msra.mxu1 %v5706_v48 }
 0x68b   : > { %5709 = vmatprep.subr.bf16.mxu1 %v5708_v51  ;;  %v1891_v51 = vld [vmem:[#allocation7 + $0xb20] sm:$0xff] }
 0x68c   : > { %v5678_v55 = vpack.c.bf16 %v1892_v52, %v1891_v51  ;;  %v1958_v51 = vld [vmem:[#allocation7 + $0xd38] sm:$0xff] }
 0x68e   : > { %5711 = vmatpush3.bf16.msra.mxu1 %v5710_v54  ;;  %v1910_v54 = vld [vmem:[#allocation7 + $0xbb8] sm:$0xff] }
 0x68f   : > { %5713 = vmatprep.subr.bf16.mxu1 %v5712_v57  ;;  %v5680_v56 = vpack.c.bf16 %v1910_v54, %v1909_v53  ;;  %v1893_v57 = vld [vmem:[#allocation7 + $0xb30] sm:$0xff]  ;;  %v6697_v54 = vld [vmem:[#allocation3] sm:$0xff] }
 0x692   : > { %5715 = vmatpush3.bf16.msra.mxu1 %v5714_v60  ;;  %v1960_v60 = vld [vmem:[#allocation7 + $0xd48] sm:$0xff] }
 0x730   : > { %v1645_v61 = vpop.f32.mrb[12].mxu1 }
 0x731   : > { %v4182_v62 = vpop.f32.mrb[12].mxu0  ;;  %v4940_v63 = vpop.f32.mrb[13].mxu1 }
 0x732   : > { %v4183_v3 = vpop.f32.mrb[13].mxu0  ;;  %v5682_v63 = vpack.c.bf16 %v1894_v58, %v1893_v57  ;;  %v2227_v57 = vld [vmem:[#allocation7 + $0xec0] sm:$0xff] }
 0x733   : > { %v4184_v4 = vadd.f32 %v4183_v3, %v4182_v62  ;;  %v5716_v3 = vpack.c.bf16 %v1960_v60, %v1959_v59  ;;  %v2228_v59 = vld [vmem:[#allocation7 + $0xec8] sm:$0xff]  ;;  %v2195_v60 = vld [vmem:[#allocation7 + $0xdc0] sm:$0xff] }
 0x735   : > { %v1576_v5 = vadd.f32 %v4184_v4, %v3842_v2  ;;  %v1943_v4 = vld [vmem:[#allocation7 + $0xcc0] sm:$0xff] }
 0x737   : > { %v1646_v10 = vadd.f32 %v1645_v61, %v1576_v5  ;;  %v1944_v5 = vld [vmem:[#allocation7 + $0xcc8] sm:$0xff] }
 0x738   : > { %v5718_v8 = vpack.c.bf16 %v1944_v5, %v1943_v4  ;;  %v2229_v4 = vld [vmem:[#allocation7 + $0xed0] sm:$0xff] }
 0x739   : > { %v1649_v0 = vmax.f32 %v1646_v10, 0.0  ;;  %v1945_v10 = vld [vmem:[#allocation7 + $0xcd0] sm:$0xff] }
 0x73b   : > { %4974 = vmatmul.mubr.f32.vlgmr.msra.gmra.mrb[14].mxu0 %v1649_v0 }
 0x73c   : > { %5655 = vmatpush3.bf16.msra.mxu0 %v5654_v12  ;;  %v1946_v12 = vld [vmem:[#allocation7 + $0xcd8] sm:$0xff] }
 0x73d   : > { %5657 = vmatprep.subr.bf16.mxu0 %v5656_v13  ;;  %v1963_v13 = vld [vmem:[#allocation7 + $0xd60] sm:$0xff]  ;;  %v5722_v17 = vpack.c.bf16 %v1946_v12, %v1945_v10 }
 0x73e   : > { %v5724_v18 = vpack.c.bf16 %v1964_v14, %v1963_v13  ;;  %v2215_v12 = vld [vmem:[#allocation7 + $0xe60] sm:$0xff] }
 0x73f   : > { %v2231_v13 = vld [vmem:[#allocation7 + $0xee0] sm:$0xff] }
 0x740   : > { %5659 = vmatpush3.bf16.msra.mxu0 %v5658_v19  ;;  %v1947_v19 = vld [vmem:[#allocation7 + $0xce0] sm:$0xff] }
 0x741   : > { %5661 = vmatprep.subr.bf16.mxu0 %v5660_v20  ;;  %v1948_v20 = vld [vmem:[#allocation7 + $0xce8] sm:$0xff] }
 0x742   : > { %v5726_v23 = vpack.c.bf16 %v1948_v20, %v1947_v19  ;;  %v2217_v19 = vld [vmem:[#allocation7 + $0xe70] sm:$0xff]  ;;  %v2218_v20 = vld [vmem:[#allocation7 + $0xe78] sm:$0xff] }
 0x744   : > { %5663 = vmatpush3.bf16.msra.mxu0 %v5662_v25  ;;  %v1949_v25 = vld [vmem:[#allocation7 + $0xcf0] sm:$0xff] }
 0x745   : > { %5665 = vmatprep.subr.bf16.mxu0 %v5664_v26  ;;  %v1950_v26 = vld [vmem:[#allocation7 + $0xcf8] sm:$0xff] }
 0x746   : > { %v5730_v29 = vpack.c.bf16 %v1950_v26, %v1949_v25  ;;  %v2234_v25 = vld [vmem:[#allocation7 + $0xef8] sm:$0xff]  ;;  %v2201_v26 = vld [vmem:[#allocation7 + $0xdf0] sm:$0xff] }
 0x748   : > { %v1865_v38 = vpop.f32.mrb[14].mxu1  ;;  %5667 = vmatpush3.bf16.msra.mxu0 %v5666_v31  ;;  %v1951_v31 = vld [vmem:[#allocation7 + $0xd00] sm:$0xff] }
 0x749   : > { %v1866_v15 = vadd.f32 %v3844_v35, %v1865_v38  ;;  %v5002_v40 = vpop.f32.mrb[15].mxu1  ;;  %5669 = vmatprep.subr.bf16.mxu0 %v5668_v32  ;;  %v1952_v32 = vld [vmem:[#allocation7 + $0xd08] sm:$0xff]  ;;  %v1954_v38 = vld [vmem:[#allocation7 + $0xd18] sm:$0xff] }
 0x74a   : > { %v5734_v35 = vpack.c.bf16 %v1952_v32, %v1951_v31  ;;  %v5738_v40 = vpack.c.bf16 %v1954_v38, %v1953_v37  ;;  %v2220_v31 = vld [vmem:[#allocation7 + $0xe88] sm:$0xff]  ;;  %v2235_v32 = vld [vmem:[#allocation7 + $0xf00] sm:$0xff] }
 0x74b   : > { %v1869_v48 = vmax.f32 %v1866_v15, 0.0  ;;  %v1972_v15 = vld [vmem:[#allocation7 + $0xda8] sm:$0xff]  ;;  %v5793_v37 = vpack.c.bf16 %v2236_v34, %v2235_v32  ;;  %v3846_v32 = vld [vmem:[#allocation9 + $0x11] ss:$0 sm:$0xff] }
 0x74c   : > { %5671 = vmatpush3.bf16.msra.mxu0 %v5670_v39  ;;  %v1971_v39 = vld [vmem:[#allocation7 + $0xda0] sm:$0xff] }
 0x74d   : > { %1870 = vst [vmem:[#allocation3 + $0x8] sm:$0xff] %v1869_v48  ;;  %5673 = vmatprep.subr.bf16.mxu0 %v5672_v42  ;;  %v5740_v42 = vpack.c.bf16 %v1972_v15, %v1971_v39  ;;  %v5742_v48 = vpack.c.bf16 %v1956_v44, %v1955_v43  ;;  %v2221_v39 = vld [vmem:[#allocation7 + $0xe90] sm:$0xff]  ;;  %v2222_v15 = vld [vmem:[#allocation7 + $0xe98] sm:$0xff] }
 0x74e   : > { %v2238_v43 = vld [vmem:[#allocation7 + $0xf18] sm:$0xff]  ;;  %v2205_v44 = vld [vmem:[#allocation7 + $0xe10] sm:$0xff] }
 0x750   : > { %5675 = vmatpush3.bf16.msra.mxu0 %v5674_v49  ;;  %v5744_v49 = vpack.c.bf16 %v1974_v47, %v1973_v45  ;;  %v2206_v45 = vld [vmem:[#allocation7 + $0xe18] sm:$0xff] }
 0x751   : > { %5677 = vmatprep.subr.bf16.mxu0 %v5676_v50  ;;  %v1957_v50 = vld [vmem:[#allocation7 + $0xd30] sm:$0xff] }
 0x752   : > { %v5746_v52 = vpack.c.bf16 %v1958_v51, %v1957_v50  ;;  %v2224_v50 = vld [vmem:[#allocation7 + $0xea8] sm:$0xff]  ;;  %v2239_v51 = vld [vmem:[#allocation7 + $0xf20] sm:$0xff] }
 0x754   : > { %5679 = vmatpush3.bf16.msra.mxu0 %v5678_v55  ;;  %v1875_v61 = vld [vmem:[#allocation3 + $0x9] ss:$2 sm:$0xf]  ;;  %v1874_v62 = vld [vmem:[#allocation3 + $0x8] ss:$2 sm:$0xf] }
 0x755   : > { %2114 = vmatprep.mubr.f32.mxu1 %v1875_v61  ;;  %5681 = vmatprep.subr.bf16.mxu0 %v5680_v56  ;;  %v1873_v2 = vld [vmem:[#allocation3 + $0x7] ss:$2 sm:$0xf]  ;;  %v1872_v0 = vld [vmem:[#allocation3 + $0x6] ss:$2 sm:$0xf] }
 0x756   : > { %2115 = vmatmul.mubr.f32.vlgmr.msra.gmra.mrb[16].mxu1 %v1874_v62  ;;  %2044 = vmatprep.mubr.f32.mxu0 %v1873_v2  ;;  %v1878_v16 = vld [vmem:[#allocation3 + $0xb] ss:$2 sm:$0xf]  ;;  %v1876_v53 = vld [vmem:[#allocation3 + $0xa] ss:$2 sm:$0xf]  ;;  %v5781_v62 = vpack.c.bf16 %v2228_v59, %v2227_v57 }
 0x757   : > { %v2211_v55 = vld [vmem:[#allocation7 + $0xe40] sm:$0xff]  ;;  %v2212_v56 = vld [vmem:[#allocation7 + $0xe48] sm:$0xff]  ;;  %v2213_v2 = vld [vmem:[#allocation7 + $0xe50] sm:$0xff] }
 0x758   : > { %5683 = vmatpush3.bf16.msra.mxu0 %v5682_v63  ;;  %v5748_v58 = vpack.c.bf16 %v2212_v56, %v2211_v55  ;;  %v2196_v61 = vld [vmem:[#allocation7 + $0xdc8] sm:$0xff]  ;;  %v2207_v55 = vld [vmem:[#allocation7 + $0xe20] sm:$0xff]  ;;  %v2225_v59 = vld [vmem:[#allocation7 + $0xeb0] sm:$0xff] }
 0x759   : > { %5717 = vmatprep.subr.bf16.mxu0 %v5716_v3  ;;  %v5750_v63 = vpack.c.bf16 %v2196_v61, %v2195_v60  ;;  %v2214_v3 = vld [vmem:[#allocation7 + $0xe58] sm:$0xff]  ;;  %v2208_v56 = vld [vmem:[#allocation7 + $0xe28] sm:$0xff]  ;;  %v2241_v61 = vld [vmem:[#allocation7 + $0xf30] sm:$0xff] }
 0x75a   : > { %5749 = vmatprep.subr.bf16.mxu1 %v5748_v58  ;;  %v5752_v5 = vpack.c.bf16 %v2214_v3, %v2213_v2  ;;  %v5774_v58 = vpack.c.bf16 %v2208_v56, %v2207_v55  ;;  %v2226_v60 = vld [vmem:[#allocation7 + $0xeb8] sm:$0xff]  ;;  %v2209_v2 = vld [vmem:[#allocation7 + $0xe30] sm:$0xff] }
 0x75b   : > { %2045 = vmatmul.mubr.f32.vlgmr.msra.gmra.mrb[16].mxu0 %v1872_v0  ;;  %5751 = vmatpush3.bf16.msra.mxu1 %v5750_v63  ;;  %v2216_v0 = vld [vmem:[#allocation7 + $0xe68] sm:$0xff]  ;;  %v2242_v63 = vld [vmem:[#allocation7 + $0xf38] sm:$0xff] }
 0x75c   : > { %5719 = vmatpush3.bf16.msra.mxu0 %v5718_v8  ;;  %2184 = vmatprep.mubr.f32.mxu0 %v1878_v16  ;;  %v2198_v8 = vld [vmem:[#allocation7 + $0xdd8] sm:$0xff]  ;;  %v5756_v14 = vpack.c.bf16 %v2216_v0, %v2215_v12  ;;  %v2232_v16 = vld [vmem:[#allocation7 + $0xee8] sm:$0xff] }
 0x75d   : > { %5721 = vmatprep.subr.bf16.mxu0 %v5720_v9  ;;  %v5784_v9 = vpack.c.bf16 %v2230_v6, %v2229_v4  ;;  %v5754_v10 = vpack.c.bf16 %v2198_v8, %v2197_v7  ;;  %5753 = vmatprep.subr.bf16.mxu1 %v5752_v5  ;;  %v5787_v21 = vpack.c.bf16 %v2232_v16, %v2231_v13  ;;  %v2210_v3 = vld [vmem:[#allocation7 + $0xe38] sm:$0xff]  ;;  %v2683_v6 = vld [vmem:[#allocation2 + $0x6] ss:$2 sm:$0xff]  ;;  %v2684_v7 = vld [vmem:[#allocation2 + $0x7] ss:$2 sm:$0xff] }
 0x75e   : > { %v5802_v4 = vpack.c.bf16 %v2242_v63, %v2241_v61  ;;  %v5778_v5 = vpack.c.bf16 %v2210_v3, %v2209_v2  ;;  %2692 = vrot.lane.b32.xlu1 %v2683_v6, %s6381_s17  ;;  %2696 = vrot.lane.b32.xlu0 %v2684_v7, %s6382_s18  ;;  %v2685_v8 = vld [vmem:[#allocation2 + $0x8] ss:$2 sm:$0xff]  ;;  %v2429_v61 = vld [vmem:[#allocation7 + $0x1060] sm:$0xff]  ;;  %v2432_v7 = vld [vmem:[#allocation7 + $0x1078] sm:$0xff] }
 0x75f   : > { %5755 = vmatpush3.bf16.msra.mxu1 %v5754_v10  ;;  %v2409_v10 = vld [vmem:[#allocation7 + $0xfc0] sm:$0xff]  ;;  %v2410_v12 = vld [vmem:[#allocation7 + $0xfc8] sm:$0xff]  ;;  %v2431_v6 = vld [vmem:[#allocation7 + $0x1070] sm:$0xff] }
 0x760   : > { %5723 = vmatpush3.bf16.msra.mxu0 %v5722_v17  ;;  %v2199_v17 = vld [vmem:[#allocation7 + $0xde0] sm:$0xff]  ;;  %5757 = vmatprep.subr.bf16.mxu1 %v5756_v14  ;;  %v5804_v0 = vpack.c.bf16 %v2410_v12, %v2409_v10  ;;  %v2687_v13 = vld [vmem:[#allocation2 + $0xa] ss:$2 sm:$0xff]  ;;  %v2688_v14 = vld [vmem:[#allocation2 + $0xb] ss:$2 sm:$0xff] }
 0x761   : > { %5725 = vmatprep.subr.bf16.mxu0 %v5724_v18  ;;  %v2200_v18 = vld [vmem:[#allocation7 + $0xde8] sm:$0xff]  ;;  %v2397_v2 = vld [vmem:[#allocation7 + $0xf60] sm:$0xff]  ;;  %v2416_v10 = vld [vmem:[#allocation7 + $0xff8] sm:$0xff] }
 0x762   : > { %v5758_v22 = vpack.c.bf16 %v2200_v18, %v2199_v17  ;;  %2700 = vrot.lane.b32.xlu1 %v2685_v8, %s6383_s5  ;;  %v2690_v16 = vld [vmem:[#allocation2 + $0xc] ss:$2 sm:$0xff]  ;;  %v3837_v17 = vld [vmem:[#allocation9 + $0x4] ss:$0 sm:$0xff]  ;;  %v5846_v8 = vpack.c.bf16 %v2432_v7, %v2431_v6 }
 0x763   : > { %v921_v18 = vadd.f32 %v3837_v17, %v6658_v41  ;;  %v2398_v3 = vld [vmem:[#allocation7 + $0xf68] sm:$0xff] }
 0x764   : > { %5727 = vmatpush3.bf16.msra.mxu0 %v5726_v23  ;;  %v2233_v23 = vld [vmem:[#allocation7 + $0xef0] sm:$0xff]  ;;  %5759 = vmatpush3.bf16.msra.mxu1 %v5758_v22  ;;  %v2434_v17 = vld [vmem:[#allocation7 + $0x1088] sm:$0xff] }
 0x765   : > { %5729 = vmatprep.subr.bf16.mxu0 %v5728_v24  ;;  %v5760_v24 = vpack.c.bf16 %v2218_v20, %v2217_v19  ;;  %v5790_v28 = vpack.c.bf16 %v2234_v25, %v2233_v23  ;;  %v3843_v19 = vld [vmem:[#allocation9 + $0xc] ss:$0 sm:$0xff] }
 0x766   : > { %2708 = vrot.lane.b32.xlu1 %v2687_v13, %s6385_s10  ;;  %v2400_v13 = vld [vmem:[#allocation7 + $0xf78] sm:$0xff] }
 0x767   : > { %5761 = vmatprep.subr.bf16.mxu1 %v5760_v24 }
 0x768   : > { %5731 = vmatpush3.bf16.msra.mxu0 %v5730_v29  ;;  %v5762_v29 = vpack.c.bf16 %v2202_v27, %v2201_v26 }
 0x769   : > { %5733 = vmatprep.subr.bf16.mxu0 %v5732_v30  ;;  %v2219_v30 = vld [vmem:[#allocation7 + $0xe80] sm:$0xff] }
 0x76a   : > { %5763 = vmatpush3.bf16.msra.mxu1 %v5762_v29  ;;  %v5764_v33 = vpack.c.bf16 %v2220_v31, %v2219_v30  ;;  %2716 = vrot.lane.b32.xlu1 %v2690_v16, %s6387_s12  ;;  %v2433_v16 = vld [vmem:[#allocation7 + $0x1080] sm:$0xff] }
 0x76c   : > { %5735 = vmatpush3.bf16.msra.mxu0 %v5734_v35  ;;  %v2203_v35 = vld [vmem:[#allocation7 + $0xe00] sm:$0xff]  ;;  %5765 = vmatprep.subr.bf16.mxu1 %v5764_v33 }
 0x76d   : > { %5737 = vmatprep.subr.bf16.mxu0 %v5736_v36  ;;  %v2204_v36 = vld [vmem:[#allocation7 + $0xe08] sm:$0xff] }
 0x76e   : > { %v5766_v38 = vpack.c.bf16 %v2204_v36, %v2203_v35 }
 0x770   : > { %5739 = vmatpush3.bf16.msra.mxu0 %v5738_v40  ;;  %5767 = vmatpush3.bf16.msra.mxu1 %v5766_v38  ;;  %v2237_v40 = vld [vmem:[#allocation7 + $0xf10] sm:$0xff] }
 0x771   : > { %5741 = vmatprep.subr.bf16.mxu0 %v5740_v42  ;;  %v5768_v42 = vpack.c.bf16 %v2222_v15, %v2221_v39  ;;  %v5796_v47 = vpack.c.bf16 %v2238_v43, %v2237_v40  ;;  %v2426_v15 = vld [vmem:[#allocation7 + $0x1048] sm:$0xff]  ;;  %v2393_v40 = vld [vmem:[#allocation7 + $0xf40] sm:$0xff]  ;;  %v2411_v43 = vld [vmem:[#allocation7 + $0xfd0] sm:$0xff] }
 0x773   : > { %5769 = vmatprep.subr.bf16.mxu1 %v5768_v42  ;;  %v2394_v42 = vld [vmem:[#allocation7 + $0xf48] sm:$0xff] }
 0x774   : > { %5743 = vmatpush3.bf16.msra.mxu0 %v5742_v48  ;;  %v5770_v48 = vpack.c.bf16 %v2206_v45, %v2205_v44  ;;  %v2412_v44 = vld [vmem:[#allocation7 + $0xfd8] sm:$0xff] }
 0x775   : > { %5745 = vmatprep.subr.bf16.mxu0 %v5744_v49  ;;  %v2223_v49 = vld [vmem:[#allocation7 + $0xea0] sm:$0xff]  ;;  %v5808_v56 = vpack.c.bf16 %v2412_v44, %v2411_v43  ;;  %v2423_v43 = vld [vmem:[#allocation7 + $0x1030] sm:$0xff] }
 0x776   : > { %5771 = vmatpush3.bf16.msra.mxu1 %v5770_v48  ;;  %v5806_v48 = vpack.c.bf16 %v2394_v42, %v2393_v40  ;;  %v2439_v40 = vld [vmem:[#allocation7 + $0x10b0] sm:$0xff]  ;;  %v2440_v42 = vld [vmem:[#allocation7 + $0x10b8] sm:$0xff] }
 0x777   : > { %v5858_v44 = vpack.c.bf16 %v2440_v42, %v2439_v40 }
 0x778   : > { %5747 = vmatpush3.bf16.msra.mxu0 %v5746_v52  ;;  %v5772_v52 = vpack.c.bf16 %v2224_v50, %v2223_v49  ;;  %v2428_v49 = vld [vmem:[#allocation7 + $0x1058] sm:$0xff]  ;;  %v2395_v50 = vld [vmem:[#allocation7 + $0xf50] sm:$0xff] }
 0x779   : > { %5780 = vmatprep.subr.bf16.mxu0 %v6379_v1 }
 0x77a   : > { %5773 = vmatprep.subr.bf16.mxu1 %v5772_v52 }
 0x77b   : > { %2185 = vmatmul.mubr.f32.vlgmr.msra.gmra.mrb[18].mxu0 %v1876_v53  ;;  %v2240_v53 = vld [vmem:[#allocation7 + $0xf28] sm:$0xff]  ;;  %5775 = vmatpush3.bf16.msra.mxu1 %v5774_v58 }
 0x77c   : > { %5035 = vmatprep.mubr.msk.f32.mxu0 %vm6380_vm1, %v6697_v54  ;;  %5782 = vmatpush3.bf16.msra.mxu0 %v5781_v62  ;;  %v5799_v57 = vpack.c.bf16 %v2240_v53, %v2239_v51  ;;  %v5776_v62 = vpack.c.bf16 %v2226_v60, %v2225_v59  ;;  %v2396_v51 = vld [vmem:[#allocation7 + $0xf58] sm:$0xff]  ;;  %v2414_v58 = vld [vmem:[#allocation7 + $0xfe8] sm:$0xff] }
 0x77d   : > { %5783 = vmatprep.subr.bf16.mxu0 %v6379_v1  ;;  %v5810_v60 = vpack.c.bf16 %v2396_v51, %v2395_v50 }
 0x77e   : > { %5777 = vmatprep.subr.bf16.mxu1 %v5776_v62  ;;  %v2430_v62 = vld [vmem:[#allocation7 + $0x1068] sm:$0xff] }
 0x77f   : > { %5779 = vmatpush3.bf16.msra.mxu1 %v5778_v5  ;;  %v5814_v5 = vpack.c.bf16 %v2398_v3, %v2397_v2  ;;  %v2588_v2 = vld [vmem:[#allocation7 + $0x10c8] sm:$0xff] }
 0x780   : > { %5785 = vmatpush3.bf16.msra.mxu0 %v5784_v9  ;;  %v2686_v9 = vld [vmem:[#allocation2 + $0x9] ss:$2 sm:$0xff]  ;;  %5805 = vmatprep.subr.bf16.mxu1 %v5804_v0 }
 0x781   : > { %5786 = vmatprep.subr.bf16.mxu0 %v6379_v1  ;;  %2704 = vrot.lane.b32.xlu0 %v2686_v9, %s6384_s6  ;;  %v2415_v9 = vld [vmem:[#allocation7 + $0xff0] sm:$0xff] }
 0x782   : > { %v5816_v12 = vpack.c.bf16 %v2416_v10, %v2415_v9  ;;  %v2399_v0 = vld [vmem:[#allocation7 + $0xf70] sm:$0xff] }
 0x783   : > { %v2589_v10 = vld [vmem:[#allocation7 + $0x10d0] sm:$0xff] }
 0x784   : > { %5788 = vmatpush3.bf16.msra.mxu0 %v5787_v21  ;;  %v924_v21 = vadd.f32 %v921_v18, %v6619_v46  ;;  %v5849_v18 = vpack.c.bf16 %v2434_v17, %v2433_v16  ;;  %v2591_v17 = vld [vmem:[#allocation7 + $0x10e0] sm:$0xff] }
 0x785   : > { %5789 = vmatprep.subr.bf16.mxu0 %v6379_v1  ;;  %2712 = vrot.lane.b32.xlu0 %v2688_v14, %s6386_s11  ;;  %v5818_v14 = vpack.c.bf16 %v2400_v13, %v2399_v0  ;;  %v2731_v13 = vld [vmem:[#allocation7 + $0x1160] sm:$0xff] }
 0x786   : > { %v925_v25 = vmax.f32 %v924_v21, 0.0 }
 0x788   : > { %5791 = vmatpush3.bf16.msra.mxu0 %v5790_v28 }
 0x789   : > { %5792 = vmatprep.subr.bf16.mxu0 %v6379_v1 }
 0x78c   : > { %5794 = vmatpush3.bf16.msra.mxu0 %v5793_v37 }
 0x78d   : > { %5795 = vmatprep.subr.bf16.mxu0 %v6379_v1 }
 0x790   : > { %5797 = vmatpush3.bf16.msra.mxu0 %v5796_v47  ;;  %v2427_v47 = vld [vmem:[#allocation7 + $0x1050] sm:$0xff] }
 0x791   : > { %5798 = vmatprep.subr.bf16.mxu0 %v6379_v1  ;;  %v5840_v59 = vpack.c.bf16 %v2428_v49, %v2427_v47  ;;  %v2407_v47 = vld [vmem:[#allocation7 + $0xfb0] sm:$0xff] }
 0x794   : > { %5800 = vmatpush3.bf16.msra.mxu0 %v5799_v57  ;;  %v2413_v57 = vld [vmem:[#allocation7 + $0xfe0] sm:$0xff] }
 0x795   : > { %5801 = vmatprep.subr.bf16.mxu0 %v6379_v1  ;;  %v5812_v63 = vpack.c.bf16 %v2414_v58, %v2413_v57 }
 0x798   : > { %5803 = vmatpush3.bf16.msra.mxu0 %v5802_v4  ;;  %v5843_v4 = vpack.c.bf16 %v2430_v62, %v2429_v61  ;;  %v2727_v61 = vld [vmem:[#allocation7 + $0x1140] sm:$0xff]  ;;  %v2728_v62 = vld [vmem:[#allocation7 + $0x1148] sm:$0xff] }
 0x799   : > { %5836 = vmatprep.subr.bf16.mxu0 %v6379_v1  ;;  %v5885_v3 = vpack.c.bf16 %v2728_v62, %v2727_v61  ;;  %v2600_v61 = vld [vmem:[#allocation7 + $0x1128] sm:$0xff] }
 0x80e   : > { %v1737_v20 = vpop.f32.mrb[14].mxu0 }
 0x80f   : > { %v1738_v22 = vadd.f32 %v3843_v19, %v1737_v20  ;;  %v4975_v23 = vpop.f32.mrb[15].mxu0  ;;  %v2417_v19 = vld [vmem:[#allocation7 + $0x1000] sm:$0xff]  ;;  %v2418_v20 = vld [vmem:[#allocation7 + $0x1008] sm:$0xff] }
 0x810   : > { %v5820_v21 = vpack.c.bf16 %v2418_v20, %v2417_v19  ;;  %v2402_v23 = vld [vmem:[#allocation7 + $0xf88] sm:$0xff]  ;;  %v2733_v20 = vld [vmem:[#allocation7 + $0x1170] sm:$0xff] }
 0x811   : > { %v1741_v24 = vadd.f32 %v1738_v22, %v6671_v11  ;;  %v2425_v11 = vld [vmem:[#allocation7 + $0x1040] sm:$0xff] }
 0x812   : > { %v5837_v45 = vpack.c.bf16 %v2426_v15, %v2425_v11  ;;  %v2401_v22 = vld [vmem:[#allocation7 + $0xf80] sm:$0xff]  ;;  %v2406_v11 = vld [vmem:[#allocation7 + $0xfa8] sm:$0xff] }
 0x813   : > { %v1742_v26 = vmax.f32 %v1741_v24, 0.0  ;;  %v5822_v24 = vpack.c.bf16 %v2402_v23, %v2401_v22  ;;  %v2593_v23 = vld [vmem:[#allocation7 + $0x10f0] sm:$0xff] }
 0x815   : > { %v6717_v27 = vadd.f32 %v1742_v26, %v925_v25  ;;  %v2435_v25 = vld [vmem:[#allocation7 + $0x1090] sm:$0xff]  ;;  %v2436_v26 = vld [vmem:[#allocation7 + $0x1098] sm:$0xff] }
 0x829   : > { %v4299_v28 = vpop.f32.mrb[16].mxu1 }
 0x82a   : > { %v4300_v29 = vpop.f32.mrb[17].mxu1 }
 0x82b   : > { %v4301_v30 = vadd.f32 %v4300_v29, %v4299_v28  ;;  %v5852_v28 = vpack.c.bf16 %v2436_v26, %v2435_v25  ;;  %v2419_v29 = vld [vmem:[#allocation7 + $0x1010] sm:$0xff]  ;;  %v2693_v26 = vpop.permute.xlu1 %2692 }
 0x82e   : > { %v4264_v31 = vpop.f32.mrb[16].mxu0 }
 0x82f   : > { %v4265_v33 = vpop.f32.mrb[17].mxu0 }
 0x830   : > { %v4266_v34 = vadd.f32 %v4265_v33, %v4264_v31  ;;  %v2404_v33 = vld [vmem:[#allocation7 + $0xf98] sm:$0xff] }
 0x832   : > { %v2047_v41 = vadd.f32 %v4266_v34, %v3846_v32  ;;  %v2403_v32 = vld [vmem:[#allocation7 + $0xf90] sm:$0xff] }
 0x833   : > { %v5826_v34 = vpack.c.bf16 %v2404_v33, %v2403_v32  ;;  %v2596_v32 = vld [vmem:[#allocation7 + $0x1108] sm:$0xff] }
 0x834   : > { %v2117_v35 = vadd.f32 %v4301_v30, %v2047_v41  ;;  %v2420_v30 = vld [vmem:[#allocation7 + $0x1018] sm:$0xff]  ;;  %v2437_v41 = vld [vmem:[#allocation7 + $0x10a0] sm:$0xff] }
 0x835   : > { %v5824_v31 = vpack.c.bf16 %v2420_v30, %v2419_v29  ;;  %v2736_v29 = vld [vmem:[#allocation7 + $0x1188] sm:$0xff] }
 0x84e   : > { %v4334_v36 = vpop.f32.mrb[18].mxu0 }
 0x84f   : > { %v4335_v37 = vpop.f32.mrb[19].mxu0 }
 0x850   : > { %v4336_v46 = vadd.f32 %v4335_v37, %v4334_v36  ;;  %v2421_v37 = vld [vmem:[#allocation7 + $0x1020] sm:$0xff] }
 0x852   : > { %v2187_v38 = vadd.f32 %v4336_v46, %v2117_v35  ;;  %v2438_v35 = vld [vmem:[#allocation7 + $0x10a8] sm:$0xff] }
 0x853   : > { %v5855_v36 = vpack.c.bf16 %v2438_v35, %v2437_v41  ;;  %v2422_v46 = vld [vmem:[#allocation7 + $0x1028] sm:$0xff]  ;;  %v2737_v35 = vld [vmem:[#allocation7 + $0x1190] sm:$0xff] }
 0x854   : > { %v2190_v39 = vmax.f32 %v2187_v38, 0.0  ;;  %v5828_v38 = vpack.c.bf16 %v2422_v46, %v2421_v37 }
 0x856   : > { %2191 = vst [vmem:[#allocation4 + $0x1] sm:$0xf] %v2190_v39  ;;  %v2405_v39 = vld [vmem:[#allocation7 + $0xfa0] sm:$0xff] }
 0x857   : > { %v5830_v15 = vpack.c.bf16 %v2406_v11, %v2405_v39  ;;  %v2739_v11 = vld [vmem:[#allocation7 + $0x11a0] sm:$0xff] }
 0x85d   : > { %v2193_v52 = vld [vmem:[#allocation4 + $0x1] sm:$0xf] }
 0x85e   : > { %v2194_v53 = vld [vmem:[#allocation4 + $0x2] sm:$0xf]  ;;  %2312 = vmatprep.mubr.f32.mxu1 %v2193_v52 }
 0x85f   : > { %v2192_v55 = vld [vmem:[#allocation4] sm:$0xf]  ;;  %5036 = vmatmul.mubr.f32.vlgmr.msra.gmra.mrb[20].mxu0 %v2194_v53 }
 0x860   : > { %2313 = vmatmul.mubr.f32.vlgmr.msra.gmra.mrb[18].mxu1 %v2192_v55  ;;  %5838 = vmatpush3.bf16.msra.mxu0 %v5837_v45  ;;  %v2424_v45 = vld [vmem:[#allocation7 + $0x1038] sm:$0xff]  ;;  %v3847_v55 = vld [vmem:[#allocation9 + $0x12] ss:$0 sm:$0xff] }
 0x861   : > { %5807 = vmatpush3.bf16.msra.mxu1 %v5806_v48  ;;  %5839 = vmatprep.subr.bf16.mxu0 %v6379_v1  ;;  %v2408_v48 = vld [vmem:[#allocation7 + $0xfb8] sm:$0xff]  ;;  %v5832_v49 = vpack.c.bf16 %v2424_v45, %v2423_v43 }
 0x862   : > { %5809 = vmatprep.subr.bf16.mxu1 %v5808_v56  ;;  %5070 = vmatprep.mubr.msk.f32.mxu0 %vm6380_vm1, %v6697_v54  ;;  %v5834_v50 = vpack.c.bf16 %v2408_v48, %v2407_v47  ;;  %v2741_v47 = vld [vmem:[#allocation7 + $0x11b0] sm:$0xff]  ;;  %v2742_v48 = vld [vmem:[#allocation7 + $0x11b8] sm:$0xff] }
 0x864   : > { %5841 = vmatpush3.bf16.msra.mxu0 %v5840_v59 }
 0x865   : > { %5811 = vmatpush3.bf16.msra.mxu1 %v5810_v60  ;;  %5842 = vmatprep.subr.bf16.mxu0 %v6379_v1 }
 0x866   : > { %5813 = vmatprep.subr.bf16.mxu1 %v5812_v63  ;;  %v2587_v63 = vld [vmem:[#allocation7 + $0x10c0] sm:$0xff] }
 0x867   : > { %v5861_v9 = vpack.c.bf16 %v2588_v2, %v2587_v63  ;;  %v2601_v63 = vld [vmem:[#allocation7 + $0x1130] sm:$0xff]  ;;  %v2602_v2 = vld [vmem:[#allocation7 + $0x1138] sm:$0xff] }
 0x868   : > { %5844 = vmatpush3.bf16.msra.mxu0 %v5843_v4  ;;  %v2729_v4 = vld [vmem:[#allocation7 + $0x1150] sm:$0xff] }
 0x869   : > { %5815 = vmatpush3.bf16.msra.mxu1 %v5814_v5  ;;  %5845 = vmatprep.subr.bf16.mxu0 %v6379_v1  ;;  %v2730_v5 = vld [vmem:[#allocation7 + $0x1158] sm:$0xff] }
 0x86a   : > { %5817 = vmatprep.subr.bf16.mxu1 %v5816_v12  ;;  %v2590_v12 = vld [vmem:[#allocation7 + $0x10d8] sm:$0xff]  ;;  %v5888_v0 = vpack.c.bf16 %v2730_v5, %v2729_v4  ;;  %v2846_v4 = vld [vmem:[#allocation7 + $0x1240] sm:$0xff]  ;;  %v2847_v5 = vld [vmem:[#allocation7 + $0x1248] sm:$0xff] }
 0x86b   : > { %v5864_v16 = vpack.c.bf16 %v2590_v12, %v2589_v10  ;;  %v2862_v10 = vld [vmem:[#allocation7 + $0x12c0] sm:$0xff]  ;;  %v2863_v12 = vld [vmem:[#allocation7 + $0x12c8] sm:$0xff] }
 0x86c   : > { %5847 = vmatpush3.bf16.msra.mxu0 %v5846_v8 }
 0x86d   : > { %5848 = vmatprep.subr.bf16.mxu0 %v6379_v1  ;;  %5819 = vmatpush3.bf16.msra.mxu1 %v5818_v14  ;;  %v2732_v14 = vld [vmem:[#allocation7 + $0x1168] sm:$0xff] }
 0x86e   : > { %5821 = vmatprep.subr.bf16.mxu1 %v5820_v21  ;;  %v5891_v19 = vpack.c.bf16 %v2732_v14, %v2731_v13  ;;  %v2734_v21 = vld [vmem:[#allocation7 + $0x1178] sm:$0xff]  ;;  %v2880_v13 = vld [vmem:[#allocation7 + $0x1350] sm:$0xff] }
 0x86f   : > { %v5894_v25 = vpack.c.bf16 %v2734_v21, %v2733_v20  ;;  %v2881_v14 = vld [vmem:[#allocation7 + $0x1358] sm:$0xff]  ;;  %v2882_v20 = vld [vmem:[#allocation7 + $0x1360] sm:$0xff]  ;;  %v2883_v21 = vld [vmem:[#allocation7 + $0x1368] sm:$0xff] }
 0x870   : > { %5850 = vmatpush3.bf16.msra.mxu0 %v5849_v18  ;;  %v2592_v18 = vld [vmem:[#allocation7 + $0x10e8] sm:$0xff] }
 0x871   : > { %5851 = vmatprep.subr.bf16.mxu0 %v6379_v1  ;;  %5823 = vmatpush3.bf16.msra.mxu1 %v5822_v24  ;;  %v5867_v22 = vpack.c.bf16 %v2592_v18, %v2591_v17  ;;  %v2594_v24 = vld [vmem:[#allocation7 + $0x10f8] sm:$0xff]  ;;  %v2864_v17 = vld [vmem:[#allocation7 + $0x12d0] sm:$0xff] }
 0x872   : > { %5825 = vmatprep.subr.bf16.mxu1 %v5824_v31  ;;  %v5870_v30 = vpack.c.bf16 %v2594_v24, %v2593_v23  ;;  %v2595_v31 = vld [vmem:[#allocation7 + $0x1100] sm:$0xff]  ;;  %v2865_v18 = vld [vmem:[#allocation7 + $0x12d8] sm:$0xff]  ;;  %v2867_v24 = vld [vmem:[#allocation7 + $0x12e8] sm:$0xff] }
 0x873   : > { %v5873_v37 = vpack.c.bf16 %v2596_v32, %v2595_v31  ;;  %v2866_v23 = vld [vmem:[#allocation7 + $0x12e0] sm:$0xff] }
 0x874   : > { %5853 = vmatpush3.bf16.msra.mxu0 %v5852_v28  ;;  %v2735_v28 = vld [vmem:[#allocation7 + $0x1180] sm:$0xff] }
 0x875   : > { %5854 = vmatprep.subr.bf16.mxu0 %v6379_v1  ;;  %5827 = vmatpush3.bf16.msra.mxu1 %v5826_v34  ;;  %v2697_v34 = vpop.permute.xlu0 %2696  ;;  %v5897_v41 = vpack.c.bf16 %v2736_v29, %v2735_v28  ;;  %v2868_v29 = vld [vmem:[#allocation7 + $0x12f0] sm:$0xff]  ;;  %v2886_v32 = vld [vmem:[#allocation7 + $0x1380] sm:$0xff] }
 0x876   : > { %5829 = vmatprep.subr.bf16.mxu1 %v5828_v38  ;;  %v2701_v38 = vpop.permute.xlu1 %2700 }
 0x878   : > { %5856 = vmatpush3.bf16.msra.mxu0 %v5855_v36  ;;  %v2738_v36 = vld [vmem:[#allocation7 + $0x1198] sm:$0xff] }
 0x879   : > { %5857 = vmatprep.subr.bf16.mxu0 %v6379_v1  ;;  %5831 = vmatpush3.bf16.msra.mxu1 %v5830_v15  ;;  %v5900_v39 = vpack.c.bf16 %v2738_v36, %v2737_v35  ;;  %v2740_v15 = vld [vmem:[#allocation7 + $0x11a8] sm:$0xff]  ;;  %v2705_v42 = vpop.permute.xlu0 %2704 }
 0x87a   : > { %5833 = vmatprep.subr.bf16.mxu1 %v5832_v49  ;;  %v5903_v43 = vpack.c.bf16 %v2740_v15, %v2739_v11  ;;  %v2709_v45 = vpop.permute.xlu1 %2708  ;;  %v2871_v35 = vld [vmem:[#allocation7 + $0x1308] sm:$0xff]  ;;  %v2873_v11 = vld [vmem:[#allocation7 + $0x1318] sm:$0xff] }
 0x87c   : > { %5859 = vmatpush3.bf16.msra.mxu0 %v5858_v44 }
 0x87d   : > { %5884 = vmatprep.subr.bf16.mxu0 %v6379_v1  ;;  %5835 = vmatpush3.bf16.msra.mxu1 %v5834_v50  ;;  %v2713_v50 = vpop.permute.xlu0 %2712 }
 0x87e   : > { %5860 = vmatprep.subr.bf16.mxu1 %v6379_v1 }
 0x932   : > { %v2384_v51 = vpop.f32.mrb[20].mxu0 }
 0x933   : > { %v4369_v52 = vpop.f32.mrb[18].mxu1  ;;  %v5037_v53 = vpop.f32.mrb[21].mxu0 }
 0x934   : > { %v4370_v56 = vpop.f32.mrb[19].mxu1  ;;  %v2717_v53 = vpop.permute.xlu1 %2716 }
 0x935   : > { %v4371_v57 = vadd.f32 %v4370_v56, %v4369_v52  ;;  %v2597_v56 = vld [vmem:[#allocation7 + $0x1110] sm:$0xff] }
 0x937   : > { %v2315_v58 = vadd.f32 %v4371_v57, %v3847_v55  ;;  %v2598_v57 = vld [vmem:[#allocation7 + $0x1118] sm:$0xff] }
 0x939   : > { %v6730_v59 = vadd.f32 %v2384_v51, %v2315_v58  ;;  %v5906_v51 = vpack.c.bf16 %v2742_v48, %v2741_v47  ;;  %v5876_v58 = vpack.c.bf16 %v2598_v57, %v2597_v56  ;;  %v2892_v48 = vld [vmem:[#allocation7 + $0x13b0] sm:$0xff]  ;;  %v2943_v56 = vld [vmem:[#allocation7 + $0x1548] sm:$0xff] }
 0x93b   : > { %v2388_v60 = vmax.f32 %v6730_v59, 0.0 }
 0x93d   : > { %2389 = vst [vmem:[#allocation4 + $0x1] sm:$0xf] %v2388_v60  ;;  %v2599_v60 = vld [vmem:[#allocation7 + $0x1120] sm:$0xff] }
 0x93e   : > { %v5879_v62 = vpack.c.bf16 %v2600_v61, %v2599_v60 }
 0x944   : > { %v2391_v6 = vld [vmem:[#allocation4 + $0x1] sm:$0xf] }
 0x945   : > { %v2392_v7 = vld [vmem:[#allocation4 + $0x2] sm:$0xf]  ;;  %2510 = vmatprep.mubr.f32.mxu1 %v2391_v6  ;;  %v2878_v6 = vld [vmem:[#allocation7 + $0x1340] sm:$0xff] }
 0x946   : > { %v2390_v8 = vld [vmem:[#allocation4] sm:$0xf]  ;;  %5071 = vmatmul.mubr.f32.vlgmr.msra.gmra.mrb[22].mxu0 %v2392_v7  ;;  %v5908_v7 = vpack.c.bf16 %v2847_v5, %v2846_v4  ;;  %v2830_v4 = vld [vmem:[#allocation7 + $0x11c0] sm:$0xff]  ;;  %v2831_v5 = vld [vmem:[#allocation7 + $0x11c8] sm:$0xff] }
 0x947   : > { %5886 = vmatpush3.bf16.msra.mxu0 %v5885_v3  ;;  %2511 = vmatmul.mubr.f32.vlgmr.msra.gmra.mrb[20].mxu1 %v2390_v8  ;;  %v5882_v3 = vpack.c.bf16 %v2602_v2, %v2601_v63  ;;  %v2879_v8 = vld [vmem:[#allocation7 + $0x1348] sm:$0xff] }
 0x948   : > { %5887 = vmatprep.subr.bf16.mxu0 %v6379_v1  ;;  %5140 = vmatprep.mubr.msk.f32.mxu0 %vm6380_vm1, %v6697_v54 }
 0x949   : > { %5862 = vmatpush3.bf16.msra.mxu1 %v5861_v9  ;;  %5105 = vmatprep.mubr.msk.f32.mxu1 %vm6380_vm1, %v6697_v54  ;;  %v2682_v54 = vld [vmem:[#allocation2 + $0x5] ss:$2 sm:$0xff]  ;;  %v5940_v9 = vpack.c.bf16 %v2879_v8, %v2878_v6 }
 0x94a   : > { %5863 = vmatprep.subr.bf16.mxu1 %v6379_v1  ;;  %v2719_v33 = vsel %vm218_vm0, %v2682_v54, %v2693_v26  ;;  %v2884_v26 = vld [vmem:[#allocation7 + $0x1370] sm:$0xff]  ;;  %v2885_v54 = vld [vmem:[#allocation7 + $0x1378] sm:$0xff] }
 0x94b   : > { %5889 = vmatpush3.bf16.msra.mxu0 %v5888_v0  ;;  %v2720_v46 = vsel %vm249_vm2, %v2719_v33, %v2697_v34  ;;  %v5942_v0 = vpack.c.bf16 %v2863_v12, %v2862_v10  ;;  %v5952_v28 = vpack.c.bf16 %v2885_v54, %v2884_v26  ;;  %v2887_v33 = vld [vmem:[#allocation7 + $0x1388] sm:$0xff]  ;;  %v2848_v6 = vld [vmem:[#allocation7 + $0x1250] sm:$0xff]  ;;  %v2837_v26 = vld [vmem:[#allocation7 + $0x11f8] sm:$0xff] }
 0x94c   : > { %5890 = vmatprep.subr.bf16.mxu0 %v6379_v1  ;;  %v2721_v40 = vsel %vm947_vm3, %v2720_v46, %v2701_v38  ;;  %v5956_v34 = vpack.c.bf16 %v2887_v33, %v2886_v32  ;;  %v2889_v46 = vld [vmem:[#allocation7 + $0x1398] sm:$0xff]  ;;  %v2854_v54 = vld [vmem:[#allocation7 + $0x1280] sm:$0xff]  ;;  %v2839_v32 = vld [vmem:[#allocation7 + $0x1208] sm:$0xff] }
 0x94d   : > { %5865 = vmatpush3.bf16.msra.mxu1 %v5864_v16  ;;  %v2722_v44 = vsel %vm962_vm4, %v2721_v40, %v2705_v42  ;;  %v5944_v16 = vpack.c.bf16 %v2881_v14, %v2880_v13  ;;  %v2890_v40 = vld [vmem:[#allocation7 + $0x13a0] sm:$0xff]  ;;  %v2891_v42 = vld [vmem:[#allocation7 + $0x13a8] sm:$0xff]  ;;  %v2833_v13 = vld [vmem:[#allocation7 + $0x11d8] sm:$0xff] }
 0x94e   : > { %5866 = vmatprep.subr.bf16.mxu1 %v6379_v1  ;;  %v2723_v49 = vsel %vm1776_vm5, %v2722_v44, %v2709_v45  ;;  %v2874_v44 = vld [vmem:[#allocation7 + $0x1320] sm:$0xff]  ;;  %v2875_v45 = vld [vmem:[#allocation7 + $0x1328] sm:$0xff]  ;;  %v2856_v33 = vld [vmem:[#allocation7 + $0x1290] sm:$0xff] }
 0x94f   : > { %5892 = vmatpush3.bf16.msra.mxu0 %v5891_v19  ;;  %v2724_v52 = vsel %vm1795_vm6, %v2723_v49, %v2713_v50  ;;  %v5946_v19 = vpack.c.bf16 %v2865_v18, %v2864_v17  ;;  %v5966_v47 = vpack.c.bf16 %v2875_v45, %v2874_v44  ;;  %v2893_v49 = vld [vmem:[#allocation7 + $0x13b8] sm:$0xff]  ;;  %v2850_v14 = vld [vmem:[#allocation7 + $0x1260] sm:$0xff] }
 0x950   : > { %5893 = vmatprep.subr.bf16.mxu0 %v6379_v1  ;;  %v2726_v55 = vsel %vm2725_vm7, %v2724_v52, %v2717_v53  ;;  %v5968_v50 = vpack.c.bf16 %v2893_v49, %v2892_v48  ;;  %v2877_v52 = vld [vmem:[#allocation7 + $0x1338] sm:$0xff] }
 0x951   : > { %5868 = vmatpush3.bf16.msra.mxu1 %v5867_v22  ;;  %v5948_v22 = vpack.c.bf16 %v2883_v21, %v2882_v20  ;;  %v2835_v20 = vld [vmem:[#allocation7 + $0x11e8] sm:$0xff]  ;;  %v2852_v21 = vld [vmem:[#allocation7 + $0x1270] sm:$0xff]  ;;  %v2861_v44 = vld [vmem:[#allocation7 + $0x12b8] sm:$0xff] }
 0x952   : > { %5869 = vmatprep.subr.bf16.mxu1 %v6379_v1 }
 0x953   : > { %5895 = vmatpush3.bf16.msra.mxu0 %v5894_v25  ;;  %v5950_v25 = vpack.c.bf16 %v2867_v24, %v2866_v23 }
 0x954   : > { %5896 = vmatprep.subr.bf16.mxu0 %v6379_v1 }
 0x955   : > { %5871 = vmatpush3.bf16.msra.mxu1 %v5870_v30  ;;  %v2869_v30 = vld [vmem:[#allocation7 + $0x12f8] sm:$0xff] }
 0x956   : > { %5872 = vmatprep.subr.bf16.mxu1 %v6379_v1  ;;  %v5954_v31 = vpack.c.bf16 %v2869_v30, %v2868_v29 }
 0x957   : > { %5898 = vmatpush3.bf16.msra.mxu0 %v5897_v41  ;;  %v2870_v41 = vld [vmem:[#allocation7 + $0x1300] sm:$0xff] }
 0x958   : > { %5899 = vmatprep.subr.bf16.mxu0 %v6379_v1  ;;  %v5958_v36 = vpack.c.bf16 %v2871_v35, %v2870_v41 }
 0x959   : > { %5874 = vmatpush3.bf16.msra.mxu1 %v5873_v37  ;;  %v2888_v37 = vld [vmem:[#allocation7 + $0x1390] sm:$0xff] }
 0x95a   : > { %5875 = vmatprep.subr.bf16.mxu1 %v6379_v1  ;;  %v5960_v38 = vpack.c.bf16 %v2889_v46, %v2888_v37  ;;  %v2841_v37 = vld [vmem:[#allocation7 + $0x1218] sm:$0xff]  ;;  %v2858_v46 = vld [vmem:[#allocation7 + $0x12a0] sm:$0xff] }
 0x95b   : > { %5901 = vmatpush3.bf16.msra.mxu0 %v5900_v39  ;;  %v2872_v39 = vld [vmem:[#allocation7 + $0x1310] sm:$0xff] }
 0x95c   : > { %5902 = vmatprep.subr.bf16.mxu0 %v6379_v1  ;;  %v5962_v15 = vpack.c.bf16 %v2873_v11, %v2872_v39 }
 0x95d   : > { %5877 = vmatpush3.bf16.msra.mxu1 %v5876_v58 }
 0x95e   : > { %5878 = vmatprep.subr.bf16.mxu1 %v6379_v1 }
 0x95f   : > { %5904 = vmatpush3.bf16.msra.mxu0 %v5903_v43  ;;  %v5964_v43 = vpack.c.bf16 %v2891_v42, %v2890_v40  ;;  %v2843_v40 = vld [vmem:[#allocation7 + $0x1228] sm:$0xff]  ;;  %v3850_v42 = vld [vmem:[#allocation9 + $0x18] ss:$0 sm:$0xff] }
 0x960   : > { %5905 = vmatprep.subr.bf16.mxu0 %v6379_v1 }
 0x961   : > { %5880 = vmatpush3.bf16.msra.mxu1 %v5879_v62  ;;  %v3848_v62 = vld [vmem:[#allocation9 + $0x13] ss:$0 sm:$0xff] }
 0x962   : > { %5881 = vmatprep.subr.bf16.mxu1 %v6379_v1 }
 0x963   : > { %5907 = vmatpush3.bf16.msra.mxu0 %v5906_v51  ;;  %v2876_v51 = vld [vmem:[#allocation7 + $0x1330] sm:$0xff] }
 0x964   : > { %5941 = vmatprep.subr.bf16.mxu0 %v5940_v9  ;;  %v5970_v53 = vpack.c.bf16 %v2877_v52, %v2876_v51  ;;  %v5910_v9 = vpack.c.bf16 %v2831_v5, %v2830_v4  ;;  %v2844_v51 = vld [vmem:[#allocation7 + $0x1230] sm:$0xff]  ;;  %v2845_v52 = vld [vmem:[#allocation7 + $0x1238] sm:$0xff] }
 0x965   : > { %5883 = vmatpush3.bf16.msra.mxu1 %v5882_v3  ;;  %v2944_v4 = vld [vmem:[#allocation7 + $0x1550] sm:$0xff]  ;;  %v2945_v5 = vld [vmem:[#allocation7 + $0x1558] sm:$0xff] }
 0x966   : > { %5141 = vmatmul.mubr.f32.vlgmr.msra.gmra.mrb[24].mxu0 %v2726_v55  ;;  %5909 = vmatprep.subr.bf16.mxu1 %v5908_v7  ;;  %v2942_v55 = vld [vmem:[#allocation7 + $0x1540] sm:$0xff]  ;;  %v2849_v7 = vld [vmem:[#allocation7 + $0x1258] sm:$0xff] }
 0x967   : > { %5943 = vmatpush3.bf16.msra.mxu0 %v5942_v0  ;;  %v6004_v57 = vpack.c.bf16 %v2943_v56, %v2942_v55  ;;  %v5912_v12 = vpack.c.bf16 %v2849_v7, %v2848_v6  ;;  %v2832_v0 = vld [vmem:[#allocation7 + $0x11d0] sm:$0xff]  ;;  %v2911_v55 = vld [vmem:[#allocation7 + $0x1448] sm:$0xff]  ;;  %v2897_v7 = vld [vmem:[#allocation7 + $0x13d8] sm:$0xff] }
 0x968   : > { %5945 = vmatprep.subr.bf16.mxu0 %v5944_v16  ;;  %v2851_v16 = vld [vmem:[#allocation7 + $0x1268] sm:$0xff]  ;;  %v5914_v17 = vpack.c.bf16 %v2833_v13, %v2832_v0  ;;  %v2896_v6 = vld [vmem:[#allocation7 + $0x13d0] sm:$0xff]  ;;  %v2914_v0 = vld [vmem:[#allocation7 + $0x1460] sm:$0xff] }
 0x969   : > { %v5916_v18 = vpack.c.bf16 %v2851_v16, %v2850_v14  ;;  %v2915_v13 = vld [vmem:[#allocation7 + $0x1468] sm:$0xff]  ;;  %v2946_v14 = vld [vmem:[#allocation7 + $0x1560] sm:$0xff] }
 0x96a   : > { %v2947_v16 = vld [vmem:[#allocation7 + $0x1568] sm:$0xff] }
 0x96b   : > { %5947 = vmatpush3.bf16.msra.mxu0 %v5946_v19  ;;  %v2834_v19 = vld [vmem:[#allocation7 + $0x11e0] sm:$0xff] }
 0x96c   : > { %5949 = vmatprep.subr.bf16.mxu0 %v5948_v22  ;;  %v2853_v22 = vld [vmem:[#allocation7 + $0x1278] sm:$0xff]  ;;  %v5918_v23 = vpack.c.bf16 %v2835_v20, %v2834_v19 }
 0x96d   : > { %v5920_v24 = vpack.c.bf16 %v2853_v22, %v2852_v21  ;;  %v6008_v22 = vpack.c.bf16 %v2945_v5, %v2944_v4  ;;  %v2936_v5 = vld [vmem:[#allocation7 + $0x1510] sm:$0xff] }
 0x96f   : > { %5951 = vmatpush3.bf16.msra.mxu0 %v5950_v25  ;;  %v2836_v25 = vld [vmem:[#allocation7 + $0x11f0] sm:$0xff] }
 0x970   : > { %5953 = vmatprep.subr.bf16.mxu0 %v5952_v28  ;;  %v2855_v28 = vld [vmem:[#allocation7 + $0x1288] sm:$0xff]  ;;  %v5922_v29 = vpack.c.bf16 %v2837_v26, %v2836_v25 }
 0x971   : > { %v5924_v30 = vpack.c.bf16 %v2855_v28, %v2854_v54  ;;  %v5978_v54 = vpack.c.bf16 %v2897_v7, %v2896_v6  ;;  %v2937_v6 = vld [vmem:[#allocation7 + $0x1518] sm:$0xff]  ;;  %v2922_v7 = vld [vmem:[#allocation7 + $0x14a0] sm:$0xff] }
 0x973   : > { %5955 = vmatpush3.bf16.msra.mxu0 %v5954_v31  ;;  %v2838_v31 = vld [vmem:[#allocation7 + $0x1200] sm:$0xff] }
 0x974   : > { %5957 = vmatprep.subr.bf16.mxu0 %v5956_v34  ;;  %v2857_v34 = vld [vmem:[#allocation7 + $0x1298] sm:$0xff]  ;;  %v5926_v41 = vpack.c.bf16 %v2839_v32, %v2838_v31  ;;  %v2930_v31 = vld [vmem:[#allocation7 + $0x14e0] sm:$0xff]  ;;  %v2931_v32 = vld [vmem:[#allocation7 + $0x14e8] sm:$0xff] }
 0x975   : > { %v5928_v35 = vpack.c.bf16 %v2857_v34, %v2856_v33  ;;  %v2916_v33 = vld [vmem:[#allocation7 + $0x1470] sm:$0xff]  ;;  %v2917_v34 = vld [vmem:[#allocation7 + $0x1478] sm:$0xff] }
 0x977   : > { %5959 = vmatpush3.bf16.msra.mxu0 %v5958_v36  ;;  %v2840_v36 = vld [vmem:[#allocation7 + $0x1210] sm:$0xff] }
 0x978   : > { %5961 = vmatprep.subr.bf16.mxu0 %v5960_v38  ;;  %v2859_v38 = vld [vmem:[#allocation7 + $0x12a8] sm:$0xff]  ;;  %v5930_v39 = vpack.c.bf16 %v2841_v37, %v2840_v36  ;;  %v6014_v37 = vpack.c.bf16 %v2931_v32, %v2930_v31  ;;  %v2941_v31 = vld [vmem:[#allocation7 + $0x1538] sm:$0xff] }
 0x979   : > { %v5932_v11 = vpack.c.bf16 %v2859_v38, %v2858_v46  ;;  %v2900_v46 = vld [vmem:[#allocation7 + $0x13f0] sm:$0xff]  ;;  %v2901_v38 = vld [vmem:[#allocation7 + $0x13f8] sm:$0xff] }
 0x97b   : > { %5963 = vmatpush3.bf16.msra.mxu0 %v5962_v15  ;;  %v2842_v15 = vld [vmem:[#allocation7 + $0x1220] sm:$0xff] }
 0x97c   : > { %5965 = vmatprep.subr.bf16.mxu0 %v5964_v43  ;;  %v2860_v43 = vld [vmem:[#allocation7 + $0x12b0] sm:$0xff] }
 0x97f   : > { %5967 = vmatpush3.bf16.msra.mxu0 %v5966_v47  ;;  %v5934_v47 = vpack.c.bf16 %v2843_v40, %v2842_v15  ;;  %v2932_v15 = vld [vmem:[#allocation7 + $0x14f0] sm:$0xff]  ;;  %v2933_v40 = vld [vmem:[#allocation7 + $0x14f8] sm:$0xff] }
 0x980   : > { %5969 = vmatprep.subr.bf16.mxu0 %v5968_v50  ;;  %v5936_v50 = vpack.c.bf16 %v2861_v44, %v2860_v43  ;;  %v2919_v43 = vld [vmem:[#allocation7 + $0x1488] sm:$0xff]  ;;  %v2950_v44 = vld [vmem:[#allocation7 + $0x1580] sm:$0xff] }
 0x983   : > { %5971 = vmatpush3.bf16.msra.mxu0 %v5970_v53  ;;  %v2910_v53 = vld [vmem:[#allocation7 + $0x1440] sm:$0xff] }
 0x984   : > { %6005 = vmatprep.subr.bf16.mxu0 %v6004_v57  ;;  %v5938_v57 = vpack.c.bf16 %v2845_v52, %v2844_v51 }
 0xa19   : > { %v2582_v58 = vpop.f32.mrb[22].mxu0 }
 0xa1a   : > { %v4421_v60 = vpop.f32.mrb[20].mxu1  ;;  %v5072_v61 = vpop.f32.mrb[23].mxu0 }
 0xa1b   : > { %v4422_v63 = vpop.f32.mrb[21].mxu1  ;;  %v2895_v61 = vld [vmem:[#allocation7 + $0x13c8] sm:$0xff] }
 0xa1c   : > { %v4423_v2 = vadd.f32 %v4422_v63, %v4421_v60  ;;  %v2894_v60 = vld [vmem:[#allocation7 + $0x13c0] sm:$0xff]  ;;  %v2927_v63 = vld [vmem:[#allocation7 + $0x14c8] sm:$0xff] }
 0xa1e   : > { %v2513_v3 = vadd.f32 %v4423_v2, %v3848_v62  ;;  %v2926_v62 = vld [vmem:[#allocation7 + $0x14c0] sm:$0xff]  ;;  %v2912_v2 = vld [vmem:[#allocation7 + $0x1450] sm:$0xff] }
 0xa20   : > { %v2583_v8 = vadd.f32 %v2582_v58, %v2513_v3  ;;  %v5972_v58 = vpack.c.bf16 %v2911_v55, %v2910_v53  ;;  %v2913_v3 = vld [vmem:[#allocation7 + $0x1458] sm:$0xff]  ;;  %v2934_v53 = vld [vmem:[#allocation7 + $0x1500] sm:$0xff]  ;;  %v2935_v55 = vld [vmem:[#allocation7 + $0x1508] sm:$0xff] }
 0xa21   : > { %v5976_v21 = vpack.c.bf16 %v2913_v3, %v2912_v2  ;;  %v2905_v2 = vld [vmem:[#allocation7 + $0x1418] sm:$0xff] }
 0xa22   : > { %v2586_v10 = vmax.f32 %v2583_v8, 0.0  ;;  %v2928_v8 = vld [vmem:[#allocation7 + $0x14d0] sm:$0xff] }
 0xa24   : > { %5106 = vmatmul.mubr.f32.vlgmr.msra.gmra.mrb[22].mxu1 %v2586_v10  ;;  %v5974_v10 = vpack.c.bf16 %v2895_v61, %v2894_v60  ;;  %v2953_v60 = vld [vmem:[#allocation7 + $0x1598] sm:$0xff] }
 0xa25   : > { %5911 = vmatpush3.bf16.msra.mxu1 %v5910_v9  ;;  %v2929_v9 = vld [vmem:[#allocation7 + $0x14d8] sm:$0xff] }
 0xa26   : > { %5913 = vmatprep.subr.bf16.mxu1 %v5912_v12  ;;  %v6006_v12 = vpack.c.bf16 %v2927_v63, %v2926_v62  ;;  %v6010_v28 = vpack.c.bf16 %v2929_v9, %v2928_v8  ;;  %v6022_v62 = vpack.c.bf16 %v2935_v55, %v2934_v53  ;;  %v2904_v63 = vld [vmem:[#allocation7 + $0x1410] sm:$0xff]  ;;  %v2923_v8 = vld [vmem:[#allocation7 + $0x14a8] sm:$0xff]  ;;  %v2954_v9 = vld [vmem:[#allocation7 + $0x15a0] sm:$0xff] }
 0xa27   : > { %v3268_v53 = vld [vmem:[#allocation7 + $0x1660] sm:$0xff]  ;;  %v3269_v55 = vld [vmem:[#allocation7 + $0x1668] sm:$0xff] }
 0xa29   : > { %5915 = vmatpush3.bf16.msra.mxu1 %v5914_v17 }
 0xa2a   : > { %5917 = vmatprep.subr.bf16.mxu1 %v5916_v18 }
 0xa2d   : > { %5919 = vmatpush3.bf16.msra.mxu1 %v5918_v23  ;;  %v2898_v23 = vld [vmem:[#allocation7 + $0x13e0] sm:$0xff] }
 0xa2e   : > { %5921 = vmatprep.subr.bf16.mxu1 %v5920_v24  ;;  %v2899_v24 = vld [vmem:[#allocation7 + $0x13e8] sm:$0xff] }
 0xa2f   : > { %v5982_v36 = vpack.c.bf16 %v2899_v24, %v2898_v23  ;;  %v2957_v23 = vld [vmem:[#allocation7 + $0x15b8] sm:$0xff] }
 0xa31   : > { %5923 = vmatpush3.bf16.msra.mxu1 %v5922_v29  ;;  %v5980_v29 = vpack.c.bf16 %v2915_v13, %v2914_v0  ;;  %v6026_v0 = vpack.c.bf16 %v2937_v6, %v2936_v5  ;;  %v2906_v13 = vld [vmem:[#allocation7 + $0x1420] sm:$0xff]  ;;  %v3286_v5 = vld [vmem:[#allocation7 + $0x16f0] sm:$0xff]  ;;  %v3287_v6 = vld [vmem:[#allocation7 + $0x16f8] sm:$0xff] }
 0xa32   : > { %5925 = vmatprep.subr.bf16.mxu1 %v5924_v30  ;;  %v6012_v30 = vpack.c.bf16 %v2947_v16, %v2946_v14  ;;  %v2907_v14 = vld [vmem:[#allocation7 + $0x1428] sm:$0xff]  ;;  %v5996_v16 = vpack.c.bf16 %v2923_v8, %v2922_v7  ;;  %v6078_v7 = vpack.c.bf16 %v3287_v6, %v3286_v5  ;;  %v3254_v8 = vld [vmem:[#allocation7 + $0x15f0] sm:$0xff] }
 0xa33   : > { %v5998_v24 = vpack.c.bf16 %v2907_v14, %v2906_v13  ;;  %v3288_v13 = vld [vmem:[#allocation7 + $0x1700] sm:$0xff] }
 0xa35   : > { %5927 = vmatpush3.bf16.msra.mxu1 %v5926_v41  ;;  %v2948_v41 = vld [vmem:[#allocation7 + $0x1570] sm:$0xff] }
 0xa36   : > { %5929 = vmatprep.subr.bf16.mxu1 %v5928_v35  ;;  %v2949_v35 = vld [vmem:[#allocation7 + $0x1578] sm:$0xff] }
 0xa39   : > { %v2814_v45 = vpop.f32.mrb[24].mxu0  ;;  %5931 = vmatpush3.bf16.msra.mxu1 %v5930_v39  ;;  %v5984_v39 = vpack.c.bf16 %v2917_v34, %v2916_v33 }
 0xa3a   : > { %v2815_v48 = vadd.f32 %v3850_v42, %v2814_v45  ;;  %v5142_v49 = vpop.f32.mrb[25].mxu0  ;;  %5933 = vmatprep.subr.bf16.mxu1 %v5932_v11  ;;  %v6016_v11 = vpack.c.bf16 %v2949_v35, %v2948_v41  ;;  %v2918_v42 = vld [vmem:[#allocation7 + $0x1480] sm:$0xff]  ;;  %v2951_v45 = vld [vmem:[#allocation7 + $0x1588] sm:$0xff] }
 0xa3b   : > { %v2902_v49 = vld [vmem:[#allocation7 + $0x1400] sm:$0xff]  ;;  %v5988_v51 = vpack.c.bf16 %v2919_v43, %v2918_v42  ;;  %v6020_v52 = vpack.c.bf16 %v2951_v45, %v2950_v44  ;;  %v3266_v43 = vld [vmem:[#allocation7 + $0x1650] sm:$0xff]  ;;  %v3267_v44 = vld [vmem:[#allocation7 + $0x1658] sm:$0xff] }
 0xa3c   : > { %v2818_v56 = vmax.f32 %v2815_v48, 0.0  ;;  %v6018_v48 = vpack.c.bf16 %v2933_v40, %v2932_v15  ;;  %v6758_v35 = vld [vmem:[#allocation3] sm:$0xff]  ;;  %v3249_v15 = vld [vmem:[#allocation7 + $0x15c8] sm:$0xff]  ;;  %v3282_v45 = vld [vmem:[#allocation7 + $0x16d0] sm:$0xff] }
 0xa3d   : > { %5935 = vmatpush3.bf16.msra.mxu1 %v5934_v47  ;;  %v5986_v47 = vpack.c.bf16 %v2901_v38, %v2900_v46  ;;  %v3280_v46 = vld [vmem:[#allocation7 + $0x16c0] sm:$0xff] }
 0xa3e   : > { %2819 = vst [vmem:[#allocation3 + $0x8] sm:$0xff] %v2818_v56  ;;  %5937 = vmatprep.subr.bf16.mxu1 %v5936_v50  ;;  %v2903_v50 = vld [vmem:[#allocation7 + $0x1408] sm:$0xff]  ;;  %v2920_v56 = vld [vmem:[#allocation7 + $0x1490] sm:$0xff] }
 0xa3f   : > { %v5990_v61 = vpack.c.bf16 %v2903_v50, %v2902_v49  ;;  %v3250_v49 = vld [vmem:[#allocation7 + $0x15d0] sm:$0xff]  ;;  %v3251_v50 = vld [vmem:[#allocation7 + $0x15d8] sm:$0xff] }
 0xa41   : > { %5939 = vmatpush3.bf16.msra.mxu1 %v5938_v57  ;;  %v2921_v57 = vld [vmem:[#allocation7 + $0x1498] sm:$0xff] }
 0xa42   : > { %5973 = vmatprep.subr.bf16.mxu1 %v5972_v58  ;;  %v2952_v58 = vld [vmem:[#allocation7 + $0x1590] sm:$0xff]  ;;  %v5992_v3 = vpack.c.bf16 %v2921_v57, %v2920_v56  ;;  %v3284_v56 = vld [vmem:[#allocation7 + $0x16e0] sm:$0xff]  ;;  %v6044_v57 = vpack.c.bf16 %v3269_v55, %v3268_v53 }
 0xa43   : > { %v6024_v4 = vpack.c.bf16 %v2953_v60, %v2952_v58  ;;  %v3285_v58 = vld [vmem:[#allocation7 + $0x16e8] sm:$0xff]  ;;  %v3252_v60 = vld [vmem:[#allocation7 + $0x15e0] sm:$0xff] }
 0xa45   : > { %v2822_v17 = vld [vmem:[#allocation3 + $0x6] ss:$2 sm:$0xf]  ;;  %v2821_v19 = vld [vmem:[#allocation3 + $0x5] ss:$2 sm:$0xf] }
 0xa46   : > { %v2824_v18 = vld [vmem:[#allocation3 + $0x8] ss:$2 sm:$0xf]  ;;  %3027 = vmatprep.mubr.f32.mxu1 %v2822_v17  ;;  %v2823_v20 = vld [vmem:[#allocation3 + $0x7] ss:$2 sm:$0xf] }
 0xa47   : > { %3097 = vmatprep.mubr.f32.mxu0 %v2824_v18  ;;  %3028 = vmatmul.mubr.f32.vlgmr.msra.gmra.mrb[24].mxu1 %v2821_v19  ;;  %v2826_v25 = vld [vmem:[#allocation3 + $0xa] ss:$2 sm:$0xf]  ;;  %v2938_v18 = vld [vmem:[#allocation7 + $0x1520] sm:$0xff] }
 0xa48   : > { %3098 = vmatmul.mubr.f32.vlgmr.msra.gmra.mrb[26].mxu0 %v2823_v20  ;;  %5975 = vmatpush3.bf16.msra.mxu1 %v5974_v10  ;;  %v2829_v26 = vld [vmem:[#allocation3 + $0xc] ss:$2 sm:$0xf]  ;;  %v2825_v34 = vld [vmem:[#allocation3 + $0x9] ss:$2 sm:$0xf] }
 0xa49   : > { %6007 = vmatpush3.bf16.msra.mxu0 %v6006_v12  ;;  %3167 = vmatprep.mubr.f32.mxu1 %v2826_v25  ;;  %v2955_v10 = vld [vmem:[#allocation7 + $0x15a8] sm:$0xff]  ;;  %v5994_v12 = vpack.c.bf16 %v2905_v2, %v2904_v63  ;;  %v2924_v20 = vld [vmem:[#allocation7 + $0x14b0] sm:$0xff]  ;;  %v3271_v63 = vld [vmem:[#allocation7 + $0x1678] sm:$0xff]  ;;  %v6075_v2 = vpack.c.bf16 %v3285_v58, %v3284_v56 }
 0xa4a   : > { %3237 = vmatprep.mubr.f32.mxu0 %v2829_v26  ;;  %5977 = vmatprep.subr.bf16.mxu1 %v5976_v21  ;;  %v6028_v17 = vpack.c.bf16 %v2955_v10, %v2954_v9  ;;  %v2939_v19 = vld [vmem:[#allocation7 + $0x1528] sm:$0xff]  ;;  %v2925_v21 = vld [vmem:[#allocation7 + $0x14b8] sm:$0xff]  ;;  %v2908_v26 = vld [vmem:[#allocation7 + $0x1430] sm:$0xff] }
 0xa4b   : > { %6009 = vmatprep.subr.bf16.mxu0 %v6008_v22  ;;  %v2956_v22 = vld [vmem:[#allocation7 + $0x15b0] sm:$0xff]  ;;  %v6030_v25 = vpack.c.bf16 %v2939_v19, %v2938_v18  ;;  %v3255_v9 = vld [vmem:[#allocation7 + $0x15f8] sm:$0xff]  ;;  %v3257_v18 = vld [vmem:[#allocation7 + $0x1608] sm:$0xff] }
 0xa4c   : > { %5979 = vmatpush3.bf16.msra.mxu1 %v5978_v54  ;;  %v6000_v54 = vpack.c.bf16 %v2925_v21, %v2924_v20  ;;  %v2827_v41 = vld [vmem:[#allocation3 + $0xb] ss:$2 sm:$0xf]  ;;  %v6050_v10 = vpack.c.bf16 %v3255_v9, %v3254_v8 }
 0xa4d   : > { %6011 = vmatpush3.bf16.msra.mxu0 %v6010_v28  ;;  %5981 = vmatprep.subr.bf16.mxu1 %v5980_v29  ;;  %v6032_v28 = vpack.c.bf16 %v2957_v23, %v2956_v22  ;;  %v2909_v29 = vld [vmem:[#allocation7 + $0x1438] sm:$0xff]  ;;  %v3274_v21 = vld [vmem:[#allocation7 + $0x1690] sm:$0xff] }
 0xa4e   : > { %6013 = vmatprep.subr.bf16.mxu0 %v6012_v30  ;;  %v2940_v30 = vld [vmem:[#allocation7 + $0x1530] sm:$0xff]  ;;  %v6002_v32 = vpack.c.bf16 %v2909_v29, %v2908_v26  ;;  %v3275_v22 = vld [vmem:[#allocation7 + $0x1698] sm:$0xff] }
 0xa4f   : > { %v6034_v33 = vpack.c.bf16 %v2941_v31, %v2940_v30  ;;  %v3290_v23 = vld [vmem:[#allocation7 + $0x1710] sm:$0xff]  ;;  %v3276_v30 = vld [vmem:[#allocation7 + $0x16a0] sm:$0xff]  ;;  %v3277_v31 = vld [vmem:[#allocation7 + $0x16a8] sm:$0xff] }
 0xa50   : > { %5983 = vmatpush3.bf16.msra.mxu1 %v5982_v36  ;;  %v3264_v36 = vld [vmem:[#allocation7 + $0x1640] sm:$0xff]  ;;  %v3258_v26 = vld [vmem:[#allocation7 + $0x1610] sm:$0xff] }
 0xa51   : > { %6015 = vmatpush3.bf16.msra.mxu0 %v6014_v37  ;;  %5985 = vmatprep.subr.bf16.mxu1 %v5984_v39  ;;  %v3265_v37 = vld [vmem:[#allocation7 + $0x1648] sm:$0xff] }
 0xa52   : > { %6017 = vmatprep.subr.bf16.mxu0 %v6016_v11  ;;  %v6036_v38 = vpack.c.bf16 %v3265_v37, %v3264_v36  ;;  %v3281_v39 = vld [vmem:[#allocation7 + $0x16c8] sm:$0xff]  ;;  %v3248_v11 = vld [vmem:[#allocation7 + $0x15c0] sm:$0xff] }
 0xa53   : > { %v6069_v40 = vpack.c.bf16 %v3281_v39, %v3280_v46  ;;  %v6038_v42 = vpack.c.bf16 %v3249_v15, %v3248_v11  ;;  %v3261_v36 = vld [vmem:[#allocation7 + $0x1628] sm:$0xff]  ;;  %v3279_v39 = vld [vmem:[#allocation7 + $0x16b8] sm:$0xff]  ;;  %v3294_v11 = vld [vmem:[#allocation7 + $0x1730] sm:$0xff] }
 0xa54   : > { %5987 = vmatpush3.bf16.msra.mxu1 %v5986_v47  ;;  %v6040_v47 = vpack.c.bf16 %v3267_v44, %v3266_v43  ;;  %v3263_v43 = vld [vmem:[#allocation7 + $0x1638] sm:$0xff] }
 0xa55   : > { %6019 = vmatpush3.bf16.msra.mxu0 %v6018_v48  ;;  %5989 = vmatprep.subr.bf16.mxu1 %v5988_v51  ;;  %v3283_v48 = vld [vmem:[#allocation7 + $0x16d8] sm:$0xff] }
 0xa56   : > { %6021 = vmatprep.subr.bf16.mxu0 %v6020_v52  ;;  %v6072_v51 = vpack.c.bf16 %v3283_v48, %v3282_v45  ;;  %v6042_v52 = vpack.c.bf16 %v3251_v50, %v3250_v49  ;;  %v3463_v48 = vld [vmem:[#allocation7 + $0x17c8] sm:$0xff]  ;;  %v3849_v50 = vld [vmem:[#allocation9 + $0x14] ss:$0 sm:$0xff] }
 0xa58   : > { %5991 = vmatpush3.bf16.msra.mxu1 %v5990_v61  ;;  %v3253_v61 = vld [vmem:[#allocation7 + $0x15e8] sm:$0xff] }
 0xa59   : > { %6023 = vmatpush3.bf16.msra.mxu0 %v6022_v62  ;;  %5993 = vmatprep.subr.bf16.mxu1 %v5992_v3  ;;  %v3270_v62 = vld [vmem:[#allocation7 + $0x1670] sm:$0xff]  ;;  %v6046_v3 = vpack.c.bf16 %v3253_v61, %v3252_v60  ;;  %v3851_v61 = vld [vmem:[#allocation9 + $0x19] ss:$0 sm:$0xff] }
 0xa5a   : > { %6025 = vmatprep.subr.bf16.mxu0 %v6024_v4  ;;  %v6048_v4 = vpack.c.bf16 %v3271_v63, %v3270_v62 }
 0xa5c   : > { %5995 = vmatpush3.bf16.msra.mxu1 %v5994_v12  ;;  %v3272_v12 = vld [vmem:[#allocation7 + $0x1680] sm:$0xff] }
 0xa5d   : > { %6027 = vmatpush3.bf16.msra.mxu0 %v6026_v0  ;;  %5997 = vmatprep.subr.bf16.mxu1 %v5996_v16  ;;  %v3273_v0 = vld [vmem:[#allocation7 + $0x1688] sm:$0xff] }
 0xa5e   : > { %6029 = vmatprep.subr.bf16.mxu0 %v6028_v17  ;;  %v6052_v14 = vpack.c.bf16 %v3273_v0, %v3272_v12  ;;  %v3289_v16 = vld [vmem:[#allocation7 + $0x1708] sm:$0xff]  ;;  %v3256_v17 = vld [vmem:[#allocation7 + $0x1600] sm:$0xff] }
 0xa5f   : > { %v6081_v19 = vpack.c.bf16 %v3289_v16, %v3288_v13  ;;  %v6054_v20 = vpack.c.bf16 %v3257_v18, %v3256_v17  ;;  %v3446_v16 = vld [vmem:[#allocation7 + $0x1740] sm:$0xff]  ;;  %v3447_v17 = vld [vmem:[#allocation7 + $0x1748] sm:$0xff]  ;;  %v3464_v18 = vld [vmem:[#allocation7 + $0x17d0] sm:$0xff] }
 0xa60   : > { %5999 = vmatpush3.bf16.msra.mxu1 %v5998_v24  ;;  %v6056_v24 = vpack.c.bf16 %v3275_v22, %v3274_v21  ;;  %v3480_v21 = vld [vmem:[#allocation7 + $0x1850] sm:$0xff]  ;;  %v6094_v22 = vpack.c.bf16 %v3447_v17, %v3446_v16  ;;  %v3477_v17 = vld [vmem:[#allocation7 + $0x1838] sm:$0xff] }
 0xa61   : > { %6031 = vmatpush3.bf16.msra.mxu0 %v6030_v25  ;;  %6001 = vmatprep.subr.bf16.mxu1 %v6000_v54  ;;  %v3291_v25 = vld [vmem:[#allocation7 + $0x1718] sm:$0xff]  ;;  %v3476_v16 = vld [vmem:[#allocation7 + $0x1830] sm:$0xff] }
 0xa62   : > { %6033 = vmatprep.subr.bf16.mxu0 %v6032_v28  ;;  %v3259_v54 = vld [vmem:[#allocation7 + $0x1618] sm:$0xff]  ;;  %v6084_v28 = vpack.c.bf16 %v3291_v25, %v3290_v23 }
 0xa63   : > { %v6058_v29 = vpack.c.bf16 %v3259_v54, %v3258_v26  ;;  %v3481_v23 = vld [vmem:[#allocation7 + $0x1858] sm:$0xff] }
 0xa64   : > { %6003 = vmatpush3.bf16.msra.mxu1 %v6002_v32  ;;  %v3292_v32 = vld [vmem:[#allocation7 + $0x1720] sm:$0xff]  ;;  %v3449_v25 = vld [vmem:[#allocation7 + $0x1758] sm:$0xff] }
 0xa65   : > { %6035 = vmatpush3.bf16.msra.mxu0 %v6034_v33  ;;  %6037 = vmatprep.subr.bf16.mxu1 %v6036_v38  ;;  %v6060_v33 = vpack.c.bf16 %v3277_v31, %v3276_v30  ;;  %v3278_v38 = vld [vmem:[#allocation7 + $0x16b0] sm:$0xff]  ;;  %v3466_v30 = vld [vmem:[#allocation7 + $0x17e0] sm:$0xff]  ;;  %v3467_v31 = vld [vmem:[#allocation7 + $0x17e8] sm:$0xff] }
 0xa66   : > { %6068 = vmatprep.subr.bf16.mxu0 %v6379_v1  ;;  %v6064_v15 = vpack.c.bf16 %v3279_v39, %v3278_v38 }
 0xa67   : > { %3168 = vmatmul.mubr.f32.vlgmr.msra.gmra.mrb[26].mxu1 %v2825_v34  ;;  %v3293_v34 = vld [vmem:[#allocation7 + $0x1728] sm:$0xff] }
 0xa68   : > { %3238 = vmatmul.mubr.f32.vlgmr.msra.gmra.mrb[28].mxu0 %v2827_v41  ;;  %6039 = vmatpush3.bf16.msra.mxu1 %v6038_v42  ;;  %v3260_v41 = vld [vmem:[#allocation7 + $0x1620] sm:$0xff]  ;;  %v6087_v37 = vpack.c.bf16 %v3293_v34, %v3292_v32  ;;  %v3262_v42 = vld [vmem:[#allocation7 + $0x1630] sm:$0xff]  ;;  %v6128_v32 = vpack.c.bf16 %v3481_v23, %v3480_v21 }
 0xa69   : > { %5175 = vmatprep.mubr.msk.f32.mxu0 %vm6380_vm1, %v6758_v35  ;;  %6070 = vmatpush3.bf16.msra.mxu0 %v6069_v40  ;;  %v6062_v46 = vpack.c.bf16 %v3261_v36, %v3260_v41  ;;  %v3295_v40 = vld [vmem:[#allocation7 + $0x1738] sm:$0xff]  ;;  %v6066_v45 = vpack.c.bf16 %v3263_v43, %v3262_v42  ;;  %v3482_v34 = vld [vmem:[#allocation7 + $0x1860] sm:$0xff]  ;;  %v3483_v41 = vld [vmem:[#allocation7 + $0x1868] sm:$0xff]  ;;  %v6100_v36 = vpack.c.bf16 %v3467_v31, %v3466_v30 }
 0xa6a   : > { %6071 = vmatprep.subr.bf16.mxu0 %v6379_v1  ;;  %6041 = vmatprep.subr.bf16.mxu1 %v6040_v47  ;;  %v6090_v44 = vpack.c.bf16 %v3295_v40, %v3294_v11  ;;  %v3462_v47 = vld [vmem:[#allocation7 + $0x17c0] sm:$0xff]  ;;  %v6131_v38 = vpack.c.bf16 %v3483_v41, %v3482_v34  ;;  %v3468_v11 = vld [vmem:[#allocation7 + $0x17f0] sm:$0xff]  ;;  %v3485_v43 = vld [vmem:[#allocation7 + $0x1878] sm:$0xff] }
 0xa6b   : > { %v6092_v49 = vpack.c.bf16 %v3463_v48, %v3462_v47  ;;  %v3484_v40 = vld [vmem:[#allocation7 + $0x1870] sm:$0xff]  ;;  %v3640_v34 = vld [vmem:[#allocation7 + $0x18c0] sm:$0xff]  ;;  %v3641_v41 = vld [vmem:[#allocation7 + $0x18c8] sm:$0xff] }
 0xa6c   : > { %6043 = vmatpush3.bf16.msra.mxu1 %v6042_v52  ;;  %v6134_v47 = vpack.c.bf16 %v3485_v43, %v3484_v40  ;;  %v3460_v21 = vld [vmem:[#allocation7 + $0x17b0] sm:$0xff]  ;;  %v3644_v40 = vld [vmem:[#allocation7 + $0x18e0] sm:$0xff] }
 0xa6d   : > { %6073 = vmatpush3.bf16.msra.mxu0 %v6072_v51  ;;  %6045 = vmatprep.subr.bf16.mxu1 %v6044_v57 }
 0xa6e   : > { %6074 = vmatprep.subr.bf16.mxu0 %v6379_v1 }
 0xa70   : > { %6047 = vmatpush3.bf16.msra.mxu1 %v6046_v3 }
 0xa71   : > { %6076 = vmatpush3.bf16.msra.mxu0 %v6075_v2  ;;  %6049 = vmatprep.subr.bf16.mxu1 %v6048_v4 }
 0xa72   : > { %6077 = vmatprep.subr.bf16.mxu0 %v6379_v1 }
 0xa74   : > { %6051 = vmatpush3.bf16.msra.mxu1 %v6050_v10 }
 0xa75   : > { %6079 = vmatpush3.bf16.msra.mxu0 %v6078_v7  ;;  %6053 = vmatprep.subr.bf16.mxu1 %v6052_v14  ;;  %v3479_v14 = vld [vmem:[#allocation7 + $0x1848] sm:$0xff] }
 0xa76   : > { %6080 = vmatprep.subr.bf16.mxu0 %v6379_v1 }
 0xa78   : > { %6055 = vmatpush3.bf16.msra.mxu1 %v6054_v20 }
 0xa79   : > { %6082 = vmatpush3.bf16.msra.mxu0 %v6081_v19  ;;  %6057 = vmatprep.subr.bf16.mxu1 %v6056_v24  ;;  %v3465_v19 = vld [vmem:[#allocation7 + $0x17d8] sm:$0xff]  ;;  %v3448_v24 = vld [vmem:[#allocation7 + $0x1750] sm:$0xff] }
 0xa7a   : > { %6083 = vmatprep.subr.bf16.mxu0 %v6379_v1 }
 0xa7c   : > { %6059 = vmatpush3.bf16.msra.mxu1 %v6058_v29  ;;  %v6096_v29 = vpack.c.bf16 %v3465_v19, %v3464_v18  ;;  %v3492_v18 = vld [vmem:[#allocation7 + $0x18b0] sm:$0xff]  ;;  %v6120_v19 = vpack.c.bf16 %v3477_v17, %v3476_v16 }
 0xa7d   : > { %6085 = vmatpush3.bf16.msra.mxu0 %v6084_v28  ;;  %6061 = vmatprep.subr.bf16.mxu1 %v6060_v33  ;;  %v6098_v33 = vpack.c.bf16 %v3449_v25, %v3448_v24 }
 0xa7e   : > { %6086 = vmatprep.subr.bf16.mxu0 %v6379_v1 }
 0xa80   : > { %6063 = vmatpush3.bf16.msra.mxu1 %v6062_v46  ;;  %v3451_v46 = vld [vmem:[#allocation7 + $0x1768] sm:$0xff] }
 0xa81   : > { %6088 = vmatpush3.bf16.msra.mxu0 %v6087_v37  ;;  %6065 = vmatprep.subr.bf16.mxu1 %v6064_v15  ;;  %v3450_v37 = vld [vmem:[#allocation7 + $0x1760] sm:$0xff]  ;;  %v3469_v15 = vld [vmem:[#allocation7 + $0x17f8] sm:$0xff] }
 0xa82   : > { %6089 = vmatprep.subr.bf16.mxu0 %v6379_v1  ;;  %v6102_v39 = vpack.c.bf16 %v3451_v46, %v3450_v37  ;;  %v6104_v42 = vpack.c.bf16 %v3469_v15, %v3468_v11  ;;  %v3642_v37 = vld [vmem:[#allocation7 + $0x18d0] sm:$0xff]  ;;  %v3643_v46 = vld [vmem:[#allocation7 + $0x18d8] sm:$0xff] }
 0xa83   : > { %v6152_v15 = vpack.c.bf16 %v3643_v46, %v3642_v37 }
 0xa84   : > { %6067 = vmatpush3.bf16.msra.mxu1 %v6066_v45  ;;  %v3453_v45 = vld [vmem:[#allocation7 + $0x1778] sm:$0xff] }
 0xa85   : > { %6091 = vmatpush3.bf16.msra.mxu0 %v6090_v44  ;;  %6093 = vmatprep.subr.bf16.mxu1 %v6092_v49  ;;  %v3452_v44 = vld [vmem:[#allocation7 + $0x1770] sm:$0xff]  ;;  %v3470_v49 = vld [vmem:[#allocation7 + $0x1800] sm:$0xff] }
 0xa86   : > { %6124 = vmatprep.subr.bf16.mxu0 %v6379_v1  ;;  %v6106_v48 = vpack.c.bf16 %v3453_v45, %v3452_v44  ;;  %v3646_v44 = vld [vmem:[#allocation7 + $0x18f0] sm:$0xff]  ;;  %v3647_v45 = vld [vmem:[#allocation7 + $0x18f8] sm:$0xff] }
 0xaf7   : > { %v2674_v51 = vpop.f32.mrb[22].mxu1 }
 0xaf8   : > { %v2675_v52 = vadd.f32 %v3849_v50, %v2674_v51  ;;  %v5107_v53 = vpop.f32.mrb[23].mxu1  ;;  %v3471_v50 = vld [vmem:[#allocation7 + $0x1808] sm:$0xff]  ;;  %v3486_v51 = vld [vmem:[#allocation7 + $0x1880] sm:$0xff] }
 0xaf9   : > { %v3487_v53 = vld [vmem:[#allocation7 + $0x1888] sm:$0xff] }
 0xafa   : > { %v2678_v55 = vadd.f32 %v2675_v52, %v6730_v59  ;;  %v6108_v52 = vpack.c.bf16 %v3471_v50, %v3470_v49  ;;  %v3649_v49 = vld [vmem:[#allocation7 + $0x1908] sm:$0xff] }
 0xafc   : > { %v2679_v56 = vmax.f32 %v2678_v55, 0.0  ;;  %v3454_v55 = vld [vmem:[#allocation7 + $0x1780] sm:$0xff] }
 0xafe   : > { %v6772_v57 = vadd.f32 %v2679_v56, %v6717_v27  ;;  %v3478_v27 = vld [vmem:[#allocation7 + $0x1840] sm:$0xff]  ;;  %v3455_v56 = vld [vmem:[#allocation7 + $0x1788] sm:$0xff] }
 0xaff   : > { %v6125_v20 = vpack.c.bf16 %v3479_v14, %v3478_v27 }
 0xb1a   : > { %v4507_v58 = vpop.f32.mrb[24].mxu1 }
 0xb1b   : > { %v4542_v60 = vpop.f32.mrb[26].mxu0  ;;  %v4508_v62 = vpop.f32.mrb[25].mxu1 }
 0xb1c   : > { %v4543_v63 = vpop.f32.mrb[27].mxu0  ;;  %v4509_v2 = vadd.f32 %v4508_v62, %v4507_v58  ;;  %v6137_v58 = vpack.c.bf16 %v3487_v53, %v3486_v51  ;;  %v3473_v62 = vld [vmem:[#allocation7 + $0x1818] sm:$0xff]  ;;  %v3652_v53 = vld [vmem:[#allocation7 + $0x1920] sm:$0xff] }
 0xb1d   : > { %v4544_v3 = vadd.f32 %v4543_v63, %v4542_v60  ;;  %v6110_v60 = vpack.c.bf16 %v3455_v56, %v3454_v55  ;;  %v3488_v63 = vld [vmem:[#allocation7 + $0x1890] sm:$0xff]  ;;  %v3651_v51 = vld [vmem:[#allocation7 + $0x1918] sm:$0xff]  ;;  %v3653_v55 = vld [vmem:[#allocation7 + $0x1928] sm:$0xff] }
 0xb1e   : > { %v3030_v4 = vadd.f32 %v4509_v2, %v3851_v61  ;;  %v3472_v61 = vld [vmem:[#allocation7 + $0x1810] sm:$0xff]  ;;  %v6167_v56 = vpack.c.bf16 %v3653_v55, %v3652_v53 }
 0xb1f   : > { %v6112_v2 = vpack.c.bf16 %v3473_v62, %v3472_v61 }
 0xb20   : > { %v3100_v5 = vadd.f32 %v4544_v3, %v3030_v4  ;;  %v3489_v3 = vld [vmem:[#allocation7 + $0x1898] sm:$0xff]  ;;  %v3456_v4 = vld [vmem:[#allocation7 + $0x1790] sm:$0xff] }
 0xb3a   : > { %v4577_v6 = vpop.f32.mrb[26].mxu1 }
 0xb3b   : > { %v4612_v7 = vpop.f32.mrb[28].mxu0  ;;  %v4578_v8 = vpop.f32.mrb[27].mxu1 }
 0xb3c   : > { %v4613_v9 = vpop.f32.mrb[29].mxu0  ;;  %v4579_v10 = vadd.f32 %v4578_v8, %v4577_v6  ;;  %v6140_v6 = vpack.c.bf16 %v3489_v3, %v3488_v63  ;;  %v3474_v8 = vld [vmem:[#allocation7 + $0x1820] sm:$0xff]  ;;  %v3853_v3 = vld [vmem:[#allocation9 + $0x1b] ss:$0 sm:$0xff] }
 0xb3d   : > { %v4614_v12 = vadd.f32 %v4613_v9, %v4612_v7  ;;  %v3475_v9 = vld [vmem:[#allocation7 + $0x1828] sm:$0xff] }
 0xb3e   : > { %v3170_v59 = vadd.f32 %v4579_v10, %v3100_v5  ;;  %v3457_v5 = vld [vmem:[#allocation7 + $0x1798] sm:$0xff]  ;;  %v3490_v10 = vld [vmem:[#allocation7 + $0x18a0] sm:$0xff] }
 0xb3f   : > { %v6114_v7 = vpack.c.bf16 %v3457_v5, %v3456_v4 }
 0xb40   : > { %v3240_v0 = vadd.f32 %v4614_v12, %v3170_v59  ;;  %v6116_v12 = vpack.c.bf16 %v3475_v9, %v3474_v8  ;;  %v3491_v59 = vld [vmem:[#allocation7 + $0x18a8] sm:$0xff]  ;;  %v3854_v9 = vld [vmem:[#allocation9 + $0x1c] ss:$0 sm:$0xff] }
 0xb41   : > { %v6143_v27 = vpack.c.bf16 %v3491_v59, %v3490_v10 }
 0xb42   : > { %v3243_v13 = vmax.f32 %v3240_v0, 0.0  ;;  %v3458_v0 = vld [vmem:[#allocation7 + $0x17a0] sm:$0xff] }
 0xb44   : > { %3244 = vst [vmem:[#allocation4 + $0x1] sm:$0xf] %v3243_v13  ;;  %v3459_v13 = vld [vmem:[#allocation7 + $0x17a8] sm:$0xff] }
 0xb45   : > { %v6118_v14 = vpack.c.bf16 %v3459_v13, %v3458_v0 }
 0xb4b   : > { %v3246_v26 = vld [vmem:[#allocation4 + $0x1] sm:$0xf] }
 0xb4c   : > { %v3247_v54 = vld [vmem:[#allocation4 + $0x2] sm:$0xf]  ;;  %3365 = vmatprep.mubr.f32.mxu1 %v3246_v26 }
 0xb4d   : > { %v3245_v28 = vld [vmem:[#allocation4] sm:$0xf]  ;;  %5176 = vmatmul.mubr.f32.vlgmr.msra.gmra.mrb[30].mxu0 %v3247_v54 }
 0xb4e   : > { %3366 = vmatmul.mubr.f32.vlgmr.msra.gmra.mrb[28].mxu1 %v3245_v28  ;;  %6126 = vmatpush3.bf16.msra.mxu0 %v6125_v20  ;;  %v3493_v20 = vld [vmem:[#allocation7 + $0x18b8] sm:$0xff] }
 0xb4f   : > { %6095 = vmatpush3.bf16.msra.mxu1 %v6094_v22  ;;  %6127 = vmatprep.subr.bf16.mxu0 %v6379_v1  ;;  %v3461_v22 = vld [vmem:[#allocation7 + $0x17b8] sm:$0xff]  ;;  %v6146_v23 = vpack.c.bf16 %v3493_v20, %v3492_v18 }
 0xb50   : > { %6097 = vmatprep.subr.bf16.mxu1 %v6096_v29  ;;  %5210 = vmatprep.mubr.msk.f32.mxu0 %vm6380_vm1, %v6758_v35  ;;  %v6122_v24 = vpack.c.bf16 %v3461_v22, %v3460_v21  ;;  %v3852_v28 = vld [vmem:[#allocation9 + $0x1a] ss:$0 sm:$0xff] }
 0xb52   : > { %6129 = vmatpush3.bf16.msra.mxu0 %v6128_v32 }
 0xb53   : > { %6099 = vmatpush3.bf16.msra.mxu1 %v6098_v33  ;;  %6130 = vmatprep.subr.bf16.mxu0 %v6379_v1 }
 0xb54   : > { %6101 = vmatprep.subr.bf16.mxu1 %v6100_v36  ;;  %v6149_v36 = vpack.c.bf16 %v3641_v41, %v3640_v34 }
 0xb56   : > { %6132 = vmatpush3.bf16.msra.mxu0 %v6131_v38 }
 0xb57   : > { %6103 = vmatpush3.bf16.msra.mxu1 %v6102_v39  ;;  %6133 = vmatprep.subr.bf16.mxu0 %v6379_v1 }
 0xb58   : > { %6105 = vmatprep.subr.bf16.mxu1 %v6104_v42  ;;  %v3645_v42 = vld [vmem:[#allocation7 + $0x18e8] sm:$0xff] }
 0xb59   : > { %v6155_v43 = vpack.c.bf16 %v3645_v42, %v3644_v40 }
 0xb5a   : > { %6135 = vmatpush3.bf16.msra.mxu0 %v6134_v47  ;;  %v6158_v47 = vpack.c.bf16 %v3647_v45, %v3646_v44 }
 0xb5b   : > { %6107 = vmatpush3.bf16.msra.mxu1 %v6106_v48  ;;  %6136 = vmatprep.subr.bf16.mxu0 %v6379_v1  ;;  %v3648_v48 = vld [vmem:[#allocation7 + $0x1900] sm:$0xff] }
 0xb5c   : > { %6109 = vmatprep.subr.bf16.mxu1 %v6108_v52  ;;  %v6161_v50 = vpack.c.bf16 %v3649_v49, %v3648_v48 }
 0xb5e   : > { %6138 = vmatpush3.bf16.msra.mxu0 %v6137_v58  ;;  %v3654_v58 = vld [vmem:[#allocation7 + $0x1930] sm:$0xff] }
 0xb5f   : > { %6111 = vmatpush3.bf16.msra.mxu1 %v6110_v60  ;;  %6139 = vmatprep.subr.bf16.mxu0 %v6379_v1  ;;  %v3655_v60 = vld [vmem:[#allocation7 + $0x1938] sm:$0xff] }
 0xb60   : > { %6113 = vmatprep.subr.bf16.mxu1 %v6112_v2  ;;  %v6170_v61 = vpack.c.bf16 %v3655_v60, %v3654_v58 }
 0xb62   : > { %6141 = vmatpush3.bf16.msra.mxu0 %v6140_v6 }
 0xb63   : > { %6115 = vmatpush3.bf16.msra.mxu1 %v6114_v7  ;;  %6142 = vmatprep.subr.bf16.mxu0 %v6379_v1 }
 0xb64   : > { %6117 = vmatprep.subr.bf16.mxu1 %v6116_v12 }
 0xb66   : > { %6144 = vmatpush3.bf16.msra.mxu0 %v6143_v27 }
 0xb67   : > { %6119 = vmatpush3.bf16.msra.mxu1 %v6118_v14  ;;  %6145 = vmatprep.subr.bf16.mxu0 %v6379_v1 }
 0xb68   : > { %6121 = vmatprep.subr.bf16.mxu1 %v6120_v19 }
 0xb6a   : > { %6147 = vmatpush3.bf16.msra.mxu0 %v6146_v23 }
 0xb6b   : > { %6123 = vmatpush3.bf16.msra.mxu1 %v6122_v24 }
 0xb6c   : > { %6148 = vmatprep.subr.bf16.mxu1 %v6379_v1 }
 0xc20   : > { %v3437_v25 = vpop.f32.mrb[30].mxu0 }
 0xc21   : > { %v4647_v26 = vpop.f32.mrb[28].mxu1  ;;  %v5177_v54 = vpop.f32.mrb[31].mxu0 }
 0xc22   : > { %v4648_v29 = vpop.f32.mrb[29].mxu1 }
 0xc23   : > { %v4649_v30 = vadd.f32 %v4648_v29, %v4647_v26 }
 0xc25   : > { %v3368_v31 = vadd.f32 %v4649_v30, %v3852_v28 }
 0xc27   : > { %v6784_v32 = vadd.f32 %v3437_v25, %v3368_v31 }
 0xc29   : > { %v3441_v33 = vmax.f32 %v6784_v32, 0.0 }
 0xc2b   : > { %3442 = vst [vmem:[#allocation4 + $0x1] sm:$0xf] %v3441_v33 }
 0xc32   : > { %v3444_v38 = vld [vmem:[#allocation4 + $0x1] sm:$0xf] }
 0xc33   : > { %v3445_v39 = vld [vmem:[#allocation4 + $0x2] sm:$0xf]  ;;  %3563 = vmatprep.mubr.f32.mxu1 %v3444_v38 }
 0xc34   : > { %v3443_v11 = vld [vmem:[#allocation4] sm:$0xf]  ;;  %5211 = vmatmul.mubr.f32.vlgmr.msra.gmra.mrb[32].mxu0 %v3445_v39 }
 0xc35   : > { %3564 = vmatmul.mubr.f32.vlgmr.msra.gmra.mrb[30].mxu1 %v3443_v11 }
 0xc36   : > { %6150 = vmatpush3.bf16.msra.mxu1 %v6149_v36  ;;  %5245 = vmatprep.mubr.msk.f32.mxu1 %vm6380_vm1, %v6758_v35  ;;  %v3650_v35 = vld [vmem:[#allocation7 + $0x1910] sm:$0xff] }
 0xc37   : > { %6151 = vmatprep.subr.bf16.mxu1 %v6379_v1  ;;  %v6164_v52 = vpack.c.bf16 %v3651_v51, %v3650_v35 }
 0xc3a   : > { %6153 = vmatpush3.bf16.msra.mxu1 %v6152_v15 }
 0xc3b   : > { %6154 = vmatprep.subr.bf16.mxu1 %v6379_v1 }
 0xc3e   : > { %6156 = vmatpush3.bf16.msra.mxu1 %v6155_v43 }
 0xc3f   : > { %6157 = vmatprep.subr.bf16.mxu1 %v6379_v1 }
 0xc42   : > { %6159 = vmatpush3.bf16.msra.mxu1 %v6158_v47 }
 0xc43   : > { %6160 = vmatprep.subr.bf16.mxu1 %v6379_v1 }
 0xc46   : > { %6162 = vmatpush3.bf16.msra.mxu1 %v6161_v50 }
 0xc47   : > { %6163 = vmatprep.subr.bf16.mxu1 %v6379_v1 }
 0xc4a   : > { %6165 = vmatpush3.bf16.msra.mxu1 %v6164_v52 }
 0xc4b   : > { %6166 = vmatprep.subr.bf16.mxu1 %v6379_v1 }
 0xc4e   : > { %6168 = vmatpush3.bf16.msra.mxu1 %v6167_v56 }
 0xc4f   : > { %6169 = vmatprep.subr.bf16.mxu1 %v6379_v1 }
 0xc52   : > { %6171 = vmatpush3.bf16.msra.mxu1 %v6170_v61 }
 0xd07   : > { %v3635_v62 = vpop.f32.mrb[32].mxu0 }
 0xd08   : > { %v4699_v63 = vpop.f32.mrb[30].mxu1  ;;  %v5212_v2 = vpop.f32.mrb[33].mxu0 }
 0xd09   : > { %v4700_v4 = vpop.f32.mrb[31].mxu1 }
 0xd0a   : > { %v4701_v5 = vadd.f32 %v4700_v4, %v4699_v63 }
 0xd0c   : > { %v3566_v6 = vadd.f32 %v4701_v5, %v3853_v3 }
 0xd0e   : > { %v3636_v7 = vadd.f32 %v3635_v62, %v3566_v6 }
 0xd10   : > { %v3639_v8 = vmax.f32 %v3636_v7, 0.0 }
 0xd12   : > { %5246 = vmatmul.mubr.f32.vlgmr.msra.gmra.mrb[32].mxu1 %v3639_v8 }
 0xde5   : > { %v3727_v10 = vpop.f32.mrb[32].mxu1 }
 0xde6   : > { %v3728_v1 = vadd.f32 %v3854_v9, %v3727_v10  ;;  %v5247_v12 = vpop.f32.mrb[33].mxu1 }
 0xde8   : > { %v3731_v59 = vadd.f32 %v3728_v1, %v6784_v32 }
 0xdea   : > { %v3732_v0 = vmax.f32 %v3731_v59, 0.0 }
 0xdec   : > { %v3733_v13 = vadd.f32 %v3732_v0, %v6772_v57 }
 0xdee   : > { %3734 = vst [vmem:[%s217_s24] sm:$0xf] %v3733_v13 }
 0xdef PF: > { %p14_p9 = scmp.ge.s32.totalorder %s6507_s27, 4   ;;  %s6831_s12 = smov %s6363_s13 }
 0xdf0   : > { %s6832_s13 = smov %s6367_s14  ;;  %s6833_s14 = smov %s6518_s30 }
 0xdf1   : > { %s6834_s15 = smov %s6507_s27  ;;  %16 = sbr.rel (!%p14_p9) target bundleno = 4 (0x4), region = 96 }
 0xdf8   :  { %3754 = vsyncpa [#allocation6], 1 }
 0xdf9   :  { %3756 = vsyncpa [#allocation6 + $0x1], 1 }
 0xdfa   :  { %3757 = vsyncpa [#allocation8], 1 }

</bundles_post_ra>
